<compile_context>
chip_gen: v6e
topology: v6e:2x2x1
jax: 0.10.0
libtpu: 0.0.40
codegen_flags: <defaults>
</compile_context>

<pallas_src>
import functools

import jax
import jax.numpy as jnp
from jax import lax
from jax.experimental import pallas as pl
from jax.experimental.pallas import tpu as pltpu

KSIZE = 7
PAD = (KSIZE - 1) // 2  # 3


def _round_up(v, m):
    return (v + m - 1) // m * m


def _pick_block_batch(n, c, hw, itemsize):
    """Images per grid step: amortize per-step overhead, stay VMEM-friendly,
    and keep >= 2 grid steps (when possible) so the 'parallel' axis feeds both
    v7x TensorCores."""
    per_img = c * hw * itemsize + hw * 4
    budget = 8 * 1024 * 1024          # per x block; ~4x with in/out double buffering
    bt = max(1, min(n, budget // max(per_img, 1)))
    if n >= 2:
        bt = min(bt, max(1, n // 2))  # keep at least 2 grid steps
    while n % bt:                     # require bt | n (safe with input/output aliasing)
        bt -= 1
    return bt


def _make_spatial_gate_kernel(in_planes, bt, C, H, W, tabattention):
    """Kernel factory: all shapes and the tabattention flag are compile-time constants."""
    HPAD = H + 2 * PAD

    def kernel(*refs):
        if tabattention:
            emb_ref, w_ref, b_ref, x_ref, o_ref, pad_ref = refs
        else:
            w_ref, b_ref, x_ref, o_ref, pad_ref = refs
            emb_ref = None

        # Re-zero the aligned padded scratch every step (keeps the zero halo valid and
        # avoids any cross-iteration scratch dependence under "parallel" semantics).
        pad_ref[...] = jnp.zeros_like(pad_ref)

        # --- ChannelPool on the lane-dense (bt, C, HW) block (no full f32 copy kept) ---
        x = x_ref[...]                                       # native dtype
        mx = jnp.max(x, axis=1).astype(jnp.float32)          # (bt, HW)
        mean = jnp.sum(x.astype(jnp.float32), axis=1) * (1.0 / C)

        # Scatter the pooled planes into the padded scratch interior, one row at a time
        # (flat lane slice -> spatial row), avoiding an in-kernel reshape of the bulk data.
        for h in range(H):
            sl = slice(h * W, (h + 1) * W)
            pad_ref[0, :, PAD + h, PAD:PAD + W] = mx[:, sl]
            pad_ref[1, :, PAD + h, PAD:PAD + W] = mean[:, sl]
        if tabattention:
            emb = emb_ref[...][:, 0].astype(jnp.float32)     # (bt, H, W), already spatial
            pad_ref[2, :, PAD:PAD + H, PAD:PAD + W] = emb

        # --- 7x7 conv (single output channel), BN folded into w/b held in SMEM ---
        acc = jnp.zeros((bt, H, W), jnp.float32)
        for p in range(in_planes):
            # Hoist the 7 kw lane shifts out of the 49-tap loop; inside only sublane
            # (kh) slices remain (XLU work overlaps the VPU FMAs).
            cols = [pad_ref[p, :, 0:HPAD, kw:kw + W] for kw in range(KSIZE)]
            for kh in range(KSIZE):
                for kw in range(KSIZE):
                    wk = w_ref[p * KSIZE * KSIZE + kh * KSIZE + kw]   # SMEM scalar
                    acc = acc + wk * cols[kw][:, kh:kh + H, :]

        scale = jax.nn.sigmoid(acc + b_ref[0])               # (bt, H, W), f32

        # Spatial -> flat without a reshape: a single lane-dim concatenate.
        scale_flat = jnp.concatenate([scale[:, h, :] for h in range(H)], axis=-1)
        scale_c = scale_flat[:, None, :].astype(o_ref.dtype)  # (bt, 1, HW)

        # --- modulate the full feature map, lane-dense, native dtype ---
        o_ref[...] = x_ref[...] * scale_c

    return kernel


@functools.partial(jax.jit, static_argnames=("tabattention",))
def spatial_gate(x, conv_w, bn_gamma, bn_beta, bn_mean, bn_var,
                 tab, emb_w, emb_b, tabattention):
    """SpatialGate.forward. x: (N, C, H, W); conv_w: (1, in_planes, 7, 7)."""
    N, C, H, W = x.shape
    HW = H * W
    in_planes = 3 if tabattention else 2
    eps = 1e-5

    # Fold BatchNorm (inference) into the conv: y = g*(conv(x)-m)/sqrt(v+eps)+b
    inv_std = 1.0 / jnp.sqrt(bn_var + eps)                   # (1,)
    w_scale = (bn_gamma * inv_std)[0]
    w_fold = (conv_w * w_scale).reshape(-1).astype(jnp.float32)            # (in_planes*49,)
    b_fold = (bn_beta - bn_gamma * bn_mean * inv_std).reshape(1).astype(jnp.float32)

    # Lane-dense layout for the bulk path (free XLA reshape).
    x_flat = x.reshape(N, C, HW)

    bt = _pick_block_batch(N, C, HW, x.dtype.itemsize)
    grid = (N // bt,)

    # Aligned padded-plane scratch: (H+6 -> multiple of 8 sublanes, W+6 -> 128 lanes).
    HP = _round_up(H + 2 * PAD, 8)
    WP = _round_up(W + 2 * PAD, 128)

    inputs, in_specs = [], []
    if tabattention:
        # Tiny matmul hoisted out of the kernel (plain XLA); kept spatial (it is small).
        embedded = jax.nn.relu(tab @ emb_w + emb_b).astype(jnp.float32).reshape(N, 1, H, W)
        inputs.append(embedded)
        in_specs.append(pl.BlockSpec((bt, 1, H, W), lambda n: (n, 0, 0, 0)))

    inputs += [w_fold, b_fold, x_flat]
    in_specs += [
        pl.BlockSpec(memory_space=pltpu.MemorySpace.SMEM),    # folded conv weights
        pl.BlockSpec(memory_space=pltpu.MemorySpace.SMEM),    # folded bias
        pl.BlockSpec((bt, C, HW), lambda n: (n, 0, 0)),       # x block, lane-dense
    ]
    x_idx = len(inputs) - 1

    kernel = _make_spatial_gate_kernel(in_planes, bt, C, H, W, tabattention)

    flops = int(N * HW * (3 * C + 2 * in_planes * KSIZE * KSIZE + 4))
    bytes_accessed = int(2 * N * C * HW * x.dtype.itemsize
                         + (N * HW * 4 if tabattention else 0)
                         + (in_planes * KSIZE * KSIZE + 1) * 4)

    out_flat = pl.pallas_call(
        kernel,
        out_shape=jax.ShapeDtypeStruct((N, C, HW), x.dtype),
        grid_spec=pltpu.PrefetchScalarGridSpec(
            num_scalar_prefetch=0,
            grid=grid,
            in_specs=in_specs,
            out_specs=pl.BlockSpec((bt, C, HW), lambda n: (n, 0, 0)),
            scratch_shapes=[pltpu.VMEM((in_planes, bt, HP, WP), jnp.float32)],
        ),
        compiler_params=pltpu.CompilerParams(
            dimension_semantics=("parallel",),
            vmem_limit_bytes=32 * 1024 * 1024,
        ),
        input_output_aliases={x_idx: 0},
        cost_estimate=pl.CostEstimate(
            flops=flops, transcendentals=int(N * HW), bytes_accessed=bytes_accessed),
    )(*inputs)

    return out_flat.reshape(N, C, H, W)


def spatial_gate_ref(x, conv_w, bn_gamma, bn_beta, bn_mean, bn_var,
                     tab, emb_w, emb_b, tabattention):
    """Pure-JAX reference (same inference semantics)."""
    N, C, H, W = x.shape
    eps = 1e-5
    mx = jnp.max(x, axis=1, keepdims=True)
    mean = jnp.mean(x, axis=1, keepdims=True)
    xc = jnp.concatenate([mx, mean], axis=1)
    if tabattention:
        emb = jax.nn.relu(tab @ emb_w + emb_b).reshape(N, 1, H, W)
        xc = jnp.concatenate([xc, emb], axis=1)
    out = lax.conv_general_dilated(
        xc, conv_w, window_strides=(1, 1), padding=((PAD, PAD), (PAD, PAD)),
        dimension_numbers=("NCHW", "OIHW", "NCHW"))
    inv_std = 1.0 / jnp.sqrt(bn_var + eps)
    out = (bn_gamma.reshape(1, -1, 1, 1) * (out - bn_mean.reshape(1, -1, 1, 1))
           * inv_std.reshape(1, -1, 1, 1) + bn_beta.reshape(1, -1, 1, 1))
    scale = jax.nn.sigmoid(out)
    return x * scale


if __name__ == "__main__":
    key = jax.random.PRNGKey(0)
    ks = jax.random.split(key, 8)

    N, C, H, W = 2, 8, 16, 16
    n_tab = 6

    x = jax.random.normal(ks[0], (N, C, H, W), dtype=jnp.float32)
    tab = jax.random.normal(ks[1], (N, n_tab), dtype=jnp.float32)

    gamma = jnp.array([1.3], jnp.float32)
    beta = jnp.array([-0.2], jnp.float32)
    rmean = jnp.array([0.05], jnp.float32)
    rvar = jnp.array([0.9], jnp.float32)

    # --- tabattention=True (3 input planes to the spatial conv) ---
    conv_w3 = jax.random.normal(ks[2], (1, 3, KSIZE, KSIZE), jnp.float32) * 0.1
    emb_w = jax.random.normal(ks[3], (n_tab, H * W), jnp.float32) * 0.2
    emb_b = jax.random.normal(ks[4], (H * W,), jnp.float32) * 0.1

    out = spatial_gate(x, conv_w3, gamma, beta, rmean, rvar,
                       tab, emb_w, emb_b, tabattention=True)
    out = jax.block_until_ready(out)
    ref = spatial_gate_ref(x, conv_w3, gamma, beta, rmean, rvar,
                           tab, emb_w, emb_b, tabattention=True)
    assert out.shape == (N, C, H, W)
    assert jnp.allclose(out, ref, atol=1e-5, rtol=1e-5)

    # --- tabattention=False (plain CBAM-style spatial gate, tab ignored) ---
    conv_w2 = jax.random.normal(ks[5], (1, 2, KSIZE, KSIZE), jnp.float32) * 0.1
    out2 = spatial_gate(x, conv_w2, gamma, beta, rmean, rvar,
                        None, None, None, tabattention=False)
    out2 = jax.block_until_ready(out2)
    ref2 = spatial_gate_ref(x, conv_w2, gamma, beta, rmean, rvar,
                            None, None, None, tabattention=False)
    assert jnp.allclose(out2, ref2, atol=1e-5, rtol=1e-5)

    print("KERNEL_OK")
</pallas_src>

<mosaic_0001>
module attributes {stable_mosaic.version = 11 : i64} {
  func.func @kernel(%arg0: i32, %arg1: memref<1x1x16x16xf32, #tpu.memory_space<vmem>>, %arg2: memref<147xf32, #tpu.memory_space<smem>>, %arg3: memref<1xf32, #tpu.memory_space<smem>>, %arg4: memref<1x8x256xf32, #tpu.memory_space<vmem>>, %arg5: memref<1x8x256xf32, #tpu.memory_space<vmem>>, %arg6: memref<3x1x24x128xf32, #tpu.memory_space<vmem>>) attributes {dimension_semantics = [#tpu.dimension_semantics<parallel>], iteration_bounds = array<i64: 2>, scalar_prefetch = 0 : i64, scratch_operands = 1 : i64, tpu.core_type = #tpu.core_type<tc>, window_params = [{transform_indices = @transform_0, window_bounds = array<i64: 1, 1, 16, 16>}, {transform_indices = @transform_1, window_bounds = array<i64: 147>}, {transform_indices = @transform_2, window_bounds = array<i64: 1>}, {transform_indices = @transform_3, window_bounds = array<i64: 1, 8, 256>}, {transform_indices = @transform_4, window_bounds = array<i64: 1, 8, 256>}]} {
    %cst = arith.constant 0.000000e+00 : f32
    %0 = vector.broadcast %cst : f32 to vector<3x1x24x128xf32>
    %c0 = arith.constant 0 : index
    %c0_0 = arith.constant 0 : index
    %c0_1 = arith.constant 0 : index
    %c0_2 = arith.constant 0 : index
    %1 = vector.load %arg6[%c0, %c0_0, %c0_1, %c0_2] : memref<3x1x24x128xf32, #tpu.memory_space<vmem>>, vector<3x1x24x128xf32>
    tpu.vector_store %arg6[%c0, %c0_0, %c0_1, %c0_2], %0 {strides = array<i32>} : memref<3x1x24x128xf32, #tpu.memory_space<vmem>>, vector<3x1x24x128xf32>,
    %c0_3 = arith.constant 0 : index
    %c0_4 = arith.constant 0 : index
    %c0_5 = arith.constant 0 : index
    %2 = vector.load %arg4[%c0_3, %c0_4, %c0_5] : memref<1x8x256xf32, #tpu.memory_space<vmem>>, vector<1x8x256xf32>
    %cst_6 = arith.constant dense<0xFF800000> : vector<1x256xf32>
    %3 = vector.multi_reduction <maximumf>, %2, %cst_6 [1] : vector<1x8x256xf32> to vector<1x256xf32>
    %cst_7 = arith.constant dense<0.000000e+00> : vector<1x256xf32>
    %4 = vector.multi_reduction <add>, %2, %cst_7 [1] : vector<1x8x256xf32> to vector<1x256xf32>
    %cst_8 = arith.constant 1.250000e-01 : f32
    %5 = vector.broadcast %cst_8 : f32 to vector<1x256xf32>
    %6 = arith.mulf %4, %5 : vector<1x256xf32>
    %7 = vector.extract_strided_slice %3 {offsets = [0, 0], sizes = [1, 16], strides = [1, 1]} : vector<1x256xf32> to vector<1x16xf32>
    %c0_9 = arith.constant 0 : index
    %c0_10 = arith.constant 0 : index
    %c3 = arith.constant 3 : index
    %c3_11 = arith.constant 3 : index
    %8 = vector.load %arg6[%c0_9, %c0_10, %c3, %c3_11] : memref<3x1x24x128xf32, #tpu.memory_space<vmem>>, vector<1x1x1x16xf32>
    %9 = vector.shape_cast %8 : vector<1x1x1x16xf32> to vector<1x16xf32>
    %10 = vector.shape_cast %7 : vector<1x16xf32> to vector<1x1x1x16xf32>
    tpu.vector_store %arg6[%c0_9, %c0_10, %c3, %c3_11], %10 {strides = array<i32>} : memref<3x1x24x128xf32, #tpu.memory_space<vmem>>, vector<1x1x1x16xf32>,
    %11 = vector.extract_strided_slice %6 {offsets = [0, 0], sizes = [1, 16], strides = [1, 1]} : vector<1x256xf32> to vector<1x16xf32>
    %c1 = arith.constant 1 : index
    %c0_12 = arith.constant 0 : index
    %c3_13 = arith.constant 3 : index
    %c3_14 = arith.constant 3 : index
    %12 = vector.load %arg6[%c1, %c0_12, %c3_13, %c3_14] : memref<3x1x24x128xf32, #tpu.memory_space<vmem>>, vector<1x1x1x16xf32>
    %13 = vector.shape_cast %12 : vector<1x1x1x16xf32> to vector<1x16xf32>
    %14 = vector.shape_cast %11 : vector<1x16xf32> to vector<1x1x1x16xf32>
    tpu.vector_store %arg6[%c1, %c0_12, %c3_13, %c3_14], %14 {strides = array<i32>} : memref<3x1x24x128xf32, #tpu.memory_space<vmem>>, vector<1x1x1x16xf32>,
    %15 = vector.extract_strided_slice %3 {offsets = [0, 16], sizes = [1, 16], strides = [1, 1]} : vector<1x256xf32> to vector<1x16xf32>
    %c0_15 = arith.constant 0 : index
    %c0_16 = arith.constant 0 : index
    %c4 = arith.constant 4 : index
    %c3_17 = arith.constant 3 : index
    %16 = vector.load %arg6[%c0_15, %c0_16, %c4, %c3_17] : memref<3x1x24x128xf32, #tpu.memory_space<vmem>>, vector<1x1x1x16xf32>
    %17 = vector.shape_cast %16 : vector<1x1x1x16xf32> to vector<1x16xf32>
    %18 = vector.shape_cast %15 : vector<1x16xf32> to vector<1x1x1x16xf32>
    tpu.vector_store %arg6[%c0_15, %c0_16, %c4, %c3_17], %18 {strides = array<i32>} : memref<3x1x24x128xf32, #tpu.memory_space<vmem>>, vector<1x1x1x16xf32>,
    %19 = vector.extract_strided_slice %6 {offsets = [0, 16], sizes = [1, 16], strides = [1, 1]} : vector<1x256xf32> to vector<1x16xf32>
    %c1_18 = arith.constant 1 : index
    %c0_19 = arith.constant 0 : index
    %c4_20 = arith.constant 4 : index
    %c3_21 = arith.constant 3 : index
    %20 = vector.load %arg6[%c1_18, %c0_19, %c4_20, %c3_21] : memref<3x1x24x128xf32, #tpu.memory_space<vmem>>, vector<1x1x1x16xf32>
    %21 = vector.shape_cast %20 : vector<1x1x1x16xf32> to vector<1x16xf32>
    %22 = vector.shape_cast %19 : vector<1x16xf32> to vector<1x1x1x16xf32>
    tpu.vector_store %arg6[%c1_18, %c0_19, %c4_20, %c3_21], %22 {strides = array<i32>} : memref<3x1x24x128xf32, #tpu.memory_space<vmem>>, vector<1x1x1x16xf32>,
    %23 = vector.extract_strided_slice %3 {offsets = [0, 32], sizes = [1, 16], strides = [1, 1]} : vector<1x256xf32> to vector<1x16xf32>
    %c0_22 = arith.constant 0 : index
    %c0_23 = arith.constant 0 : index
    %c5 = arith.constant 5 : index
    %c3_24 = arith.constant 3 : index
    %24 = vector.load %arg6[%c0_22, %c0_23, %c5, %c3_24] : memref<3x1x24x128xf32, #tpu.memory_space<vmem>>, vector<1x1x1x16xf32>
    %25 = vector.shape_cast %24 : vector<1x1x1x16xf32> to vector<1x16xf32>
    %26 = vector.shape_cast %23 : vector<1x16xf32> to vector<1x1x1x16xf32>
    tpu.vector_store %arg6[%c0_22, %c0_23, %c5, %c3_24], %26 {strides = array<i32>} : memref<3x1x24x128xf32, #tpu.memory_space<vmem>>, vector<1x1x1x16xf32>,
    %27 = vector.extract_strided_slice %6 {offsets = [0, 32], sizes = [1, 16], strides = [1, 1]} : vector<1x256xf32> to vector<1x16xf32>
    %c1_25 = arith.constant 1 : index
    %c0_26 = arith.constant 0 : index
    %c5_27 = arith.constant 5 : index
    %c3_28 = arith.constant 3 : index
    %28 = vector.load %arg6[%c1_25, %c0_26, %c5_27, %c3_28] : memref<3x1x24x128xf32, #tpu.memory_space<vmem>>, vector<1x1x1x16xf32>
    %29 = vector.shape_cast %28 : vector<1x1x1x16xf32> to vector<1x16xf32>
    %30 = vector.shape_cast %27 : vector<1x16xf32> to vector<1x1x1x16xf32>
    tpu.vector_store %arg6[%c1_25, %c0_26, %c5_27, %c3_28], %30 {strides = array<i32>} : memref<3x1x24x128xf32, #tpu.memory_space<vmem>>, vector<1x1x1x16xf32>,
    %31 = vector.extract_strided_slice %3 {offsets = [0, 48], sizes = [1, 16], strides = [1, 1]} : vector<1x256xf32> to vector<1x16xf32>
    %c0_29 = arith.constant 0 : index
    %c0_30 = arith.constant 0 : index
    %c6 = arith.constant 6 : index
    %c3_31 = arith.constant 3 : index
    %32 = vector.load %arg6[%c0_29, %c0_30, %c6, %c3_31] : memref<3x1x24x128xf32, #tpu.memory_space<vmem>>, vector<1x1x1x16xf32>
    %33 = vector.shape_cast %32 : vector<1x1x1x16xf32> to vector<1x16xf32>
    %34 = vector.shape_cast %31 : vector<1x16xf32> to vector<1x1x1x16xf32>
    tpu.vector_store %arg6[%c0_29, %c0_30, %c6, %c3_31], %34 {strides = array<i32>} : memref<3x1x24x128xf32, #tpu.memory_space<vmem>>, vector<1x1x1x16xf32>,
    %35 = vector.extract_strided_slice %6 {offsets = [0, 48], sizes = [1, 16], strides = [1, 1]} : vector<1x256xf32> to vector<1x16xf32>
    %c1_32 = arith.constant 1 : index
    %c0_33 = arith.constant 0 : index
    %c6_34 = arith.constant 6 : index
    %c3_35 = arith.constant 3 : index
    %36 = vector.load %arg6[%c1_32, %c0_33, %c6_34, %c3_35] : memref<3x1x24x128xf32, #tpu.memory_space<vmem>>, vector<1x1x1x16xf32>
    %37 = vector.shape_cast %36 : vector<1x1x1x16xf32> to vector<1x16xf32>
    %38 = vector.shape_cast %35 : vector<1x16xf32> to vector<1x1x1x16xf32>
    tpu.vector_store %arg6[%c1_32, %c0_33, %c6_34, %c3_35], %38 {strides = array<i32>} : memref<3x1x24x128xf32, #tpu.memory_space<vmem>>, vector<1x1x1x16xf32>,
    %39 = vector.extract_strided_slice %3 {offsets = [0, 64], sizes = [1, 16], strides = [1, 1]} : vector<1x256xf32> to vector<1x16xf32>
    %c0_36 = arith.constant 0 : index
    %c0_37 = arith.constant 0 : index
    %c7 = arith.constant 7 : index
    %c3_38 = arith.constant 3 : index
    %40 = vector.load %arg6[%c0_36, %c0_37, %c7, %c3_38] : memref<3x1x24x128xf32, #tpu.memory_space<vmem>>, vector<1x1x1x16xf32>
    %41 = vector.shape_cast %40 : vector<1x1x1x16xf32> to vector<1x16xf32>
    %42 = vector.shape_cast %39 : vector<1x16xf32> to vector<1x1x1x16xf32>
    tpu.vector_store %arg6[%c0_36, %c0_37, %c7, %c3_38], %42 {strides = array<i32>} : memref<3x1x24x128xf32, #tpu.memory_space<vmem>>, vector<1x1x1x16xf32>,
    %43 = vector.extract_strided_slice %6 {offsets = [0, 64], sizes = [1, 16], strides = [1, 1]} : vector<1x256xf32> to vector<1x16xf32>
    %c1_39 = arith.constant 1 : index
    %c0_40 = arith.constant 0 : index
    %c7_41 = arith.constant 7 : index
    %c3_42 = arith.constant 3 : index
    %44 = vector.load %arg6[%c1_39, %c0_40, %c7_41, %c3_42] : memref<3x1x24x128xf32, #tpu.memory_space<vmem>>, vector<1x1x1x16xf32>
    %45 = vector.shape_cast %44 : vector<1x1x1x16xf32> to vector<1x16xf32>
    %46 = vector.shape_cast %43 : vector<1x16xf32> to vector<1x1x1x16xf32>
    tpu.vector_store %arg6[%c1_39, %c0_40, %c7_41, %c3_42], %46 {strides = array<i32>} : memref<3x1x24x128xf32, #tpu.memory_space<vmem>>, vector<1x1x1x16xf32>,
    %47 = vector.extract_strided_slice %3 {offsets = [0, 80], sizes = [1, 16], strides = [1, 1]} : vector<1x256xf32> to vector<1x16xf32>
    %c0_43 = arith.constant 0 : index
    %c0_44 = arith.constant 0 : index
    %c8 = arith.constant 8 : index
    %c3_45 = arith.constant 3 : index
    %48 = vector.load %arg6[%c0_43, %c0_44, %c8, %c3_45] : memref<3x1x24x128xf32, #tpu.memory_space<vmem>>, vector<1x1x1x16xf32>
    %49 = vector.shape_cast %48 : vector<1x1x1x16xf32> to vector<1x16xf32>
    %50 = vector.shape_cast %47 : vector<1x16xf32> to vector<1x1x1x16xf32>
    tpu.vector_store %arg6[%c0_43, %c0_44, %c8, %c3_45], %50 {strides = array<i32>} : memref<3x1x24x128xf32, #tpu.memory_space<vmem>>, vector<1x1x1x16xf32>,
    %51 = vector.extract_strided_slice %6 {offsets = [0, 80], sizes = [1, 16], strides = [1, 1]} : vector<1x256xf32> to vector<1x16xf32>
    %c1_46 = arith.constant 1 : index
    %c0_47 = arith.constant 0 : index
    %c8_48 = arith.constant 8 : index
    %c3_49 = arith.constant 3 : index
    %52 = vector.load %arg6[%c1_46, %c0_47, %c8_48, %c3_49] : memref<3x1x24x128xf32, #tpu.memory_space<vmem>>, vector<1x1x1x16xf32>
    %53 = vector.shape_cast %52 : vector<1x1x1x16xf32> to vector<1x16xf32>
    %54 = vector.shape_cast %51 : vector<1x16xf32> to vector<1x1x1x16xf32>
    tpu.vector_store %arg6[%c1_46, %c0_47, %c8_48, %c3_49], %54 {strides = array<i32>} : memref<3x1x24x128xf32, #tpu.memory_space<vmem>>, vector<1x1x1x16xf32>,
    %55 = vector.extract_strided_slice %3 {offsets = [0, 96], sizes = [1, 16], strides = [1, 1]} : vector<1x256xf32> to vector<1x16xf32>
    %c0_50 = arith.constant 0 : index
    %c0_51 = arith.constant 0 : index
    %c9 = arith.constant 9 : index
    %c3_52 = arith.constant 3 : index
    %56 = vector.load %arg6[%c0_50, %c0_51, %c9, %c3_52] : memref<3x1x24x128xf32, #tpu.memory_space<vmem>>, vector<1x1x1x16xf32>
    %57 = vector.shape_cast %56 : vector<1x1x1x16xf32> to vector<1x16xf32>
    %58 = vector.shape_cast %55 : vector<1x16xf32> to vector<1x1x1x16xf32>
    tpu.vector_store %arg6[%c0_50, %c0_51, %c9, %c3_52], %58 {strides = array<i32>} : memref<3x1x24x128xf32, #tpu.memory_space<vmem>>, vector<1x1x1x16xf32>,
    %59 = vector.extract_strided_slice %6 {offsets = [0, 96], sizes = [1, 16], strides = [1, 1]} : vector<1x256xf32> to vector<1x16xf32>
    %c1_53 = arith.constant 1 : index
    %c0_54 = arith.constant 0 : index
    %c9_55 = arith.constant 9 : index
    %c3_56 = arith.constant 3 : index
    %60 = vector.load %arg6[%c1_53, %c0_54, %c9_55, %c3_56] : memref<3x1x24x128xf32, #tpu.memory_space<vmem>>, vector<1x1x1x16xf32>
    %61 = vector.shape_cast %60 : vector<1x1x1x16xf32> to vector<1x16xf32>
    %62 = vector.shape_cast %59 : vector<1x16xf32> to vector<1x1x1x16xf32>
    tpu.vector_store %arg6[%c1_53, %c0_54, %c9_55, %c3_56], %62 {strides = array<i32>} : memref<3x1x24x128xf32, #tpu.memory_space<vmem>>, vector<1x1x1x16xf32>,
    %63 = vector.extract_strided_slice %3 {offsets = [0, 112], sizes = [1, 16], strides = [1, 1]} : vector<1x256xf32> to vector<1x16xf32>
    %c0_57 = arith.constant 0 : index
    %c0_58 = arith.constant 0 : index
    %c10 = arith.constant 10 : index
    %c3_59 = arith.constant 3 : index
    %64 = vector.load %arg6[%c0_57, %c0_58, %c10, %c3_59] : memref<3x1x24x128xf32, #tpu.memory_space<vmem>>, vector<1x1x1x16xf32>
    %65 = vector.shape_cast %64 : vector<1x1x1x16xf32> to vector<1x16xf32>
    %66 = vector.shape_cast %63 : vector<1x16xf32> to vector<1x1x1x16xf32>
    tpu.vector_store %arg6[%c0_57, %c0_58, %c10, %c3_59], %66 {strides = array<i32>} : memref<3x1x24x128xf32, #tpu.memory_space<vmem>>, vector<1x1x1x16xf32>,
    %67 = vector.extract_strided_slice %6 {offsets = [0, 112], sizes = [1, 16], strides = [1, 1]} : vector<1x256xf32> to vector<1x16xf32>
    %c1_60 = arith.constant 1 : index
    %c0_61 = arith.constant 0 : index
    %c10_62 = arith.constant 10 : index
    %c3_63 = arith.constant 3 : index
    %68 = vector.load %arg6[%c1_60, %c0_61, %c10_62, %c3_63] : memref<3x1x24x128xf32, #tpu.memory_space<vmem>>, vector<1x1x1x16xf32>
    %69 = vector.shape_cast %68 : vector<1x1x1x16xf32> to vector<1x16xf32>
    %70 = vector.shape_cast %67 : vector<1x16xf32> to vector<1x1x1x16xf32>
    tpu.vector_store %arg6[%c1_60, %c0_61, %c10_62, %c3_63], %70 {strides = array<i32>} : memref<3x1x24x128xf32, #tpu.memory_space<vmem>>, vector<1x1x1x16xf32>,
    %71 = vector.extract_strided_slice %3 {offsets = [0, 128], sizes = [1, 16], strides = [1, 1]} : vector<1x256xf32> to vector<1x16xf32>
    %c0_64 = arith.constant 0 : index
    %c0_65 = arith.constant 0 : index
    %c11 = arith.constant 11 : index
    %c3_66 = arith.constant 3 : index
    %72 = vector.load %arg6[%c0_64, %c0_65, %c11, %c3_66] : memref<3x1x24x128xf32, #tpu.memory_space<vmem>>, vector<1x1x1x16xf32>
    %73 = vector.shape_cast %72 : vector<1x1x1x16xf32> to vector<1x16xf32>
    %74 = vector.shape_cast %71 : vector<1x16xf32> to vector<1x1x1x16xf32>
    tpu.vector_store %arg6[%c0_64, %c0_65, %c11, %c3_66], %74 {strides = array<i32>} : memref<3x1x24x128xf32, #tpu.memory_space<vmem>>, vector<1x1x1x16xf32>,
    %75 = vector.extract_strided_slice %6 {offsets = [0, 128], sizes = [1, 16], strides = [1, 1]} : vector<1x256xf32> to vector<1x16xf32>
    %c1_67 = arith.constant 1 : index
    %c0_68 = arith.constant 0 : index
    %c11_69 = arith.constant 11 : index
    %c3_70 = arith.constant 3 : index
    %76 = vector.load %arg6[%c1_67, %c0_68, %c11_69, %c3_70] : memref<3x1x24x128xf32, #tpu.memory_space<vmem>>, vector<1x1x1x16xf32>
    %77 = vector.shape_cast %76 : vector<1x1x1x16xf32> to vector<1x16xf32>
    %78 = vector.shape_cast %75 : vector<1x16xf32> to vector<1x1x1x16xf32>
    tpu.vector_store %arg6[%c1_67, %c0_68, %c11_69, %c3_70], %78 {strides = array<i32>} : memref<3x1x24x128xf32, #tpu.memory_space<vmem>>, vector<1x1x1x16xf32>,
    %79 = vector.extract_strided_slice %3 {offsets = [0, 144], sizes = [1, 16], strides = [1, 1]} : vector<1x256xf32> to vector<1x16xf32>
    %c0_71 = arith.constant 0 : index
    %c0_72 = arith.constant 0 : index
    %c12 = arith.constant 12 : index
    %c3_73 = arith.constant 3 : index
    %80 = vector.load %arg6[%c0_71, %c0_72, %c12, %c3_73] : memref<3x1x24x128xf32, #tpu.memory_space<vmem>>, vector<1x1x1x16xf32>
    %81 = vector.shape_cast %80 : vector<1x1x1x16xf32> to vector<1x16xf32>
    %82 = vector.shape_cast %79 : vector<1x16xf32> to vector<1x1x1x16xf32>
    tpu.vector_store %arg6[%c0_71, %c0_72, %c12, %c3_73], %82 {strides = array<i32>} : memref<3x1x24x128xf32, #tpu.memory_space<vmem>>, vector<1x1x1x16xf32>,
    %83 = vector.extract_strided_slice %6 {offsets = [0, 144], sizes = [1, 16], strides = [1, 1]} : vector<1x256xf32> to vector<1x16xf32>
    %c1_74 = arith.constant 1 : index
    %c0_75 = arith.constant 0 : index
    %c12_76 = arith.constant 12 : index
    %c3_77 = arith.constant 3 : index
    %84 = vector.load %arg6[%c1_74, %c0_75, %c12_76, %c3_77] : memref<3x1x24x128xf32, #tpu.memory_space<vmem>>, vector<1x1x1x16xf32>
    %85 = vector.shape_cast %84 : vector<1x1x1x16xf32> to vector<1x16xf32>
    %86 = vector.shape_cast %83 : vector<1x16xf32> to vector<1x1x1x16xf32>
    tpu.vector_store %arg6[%c1_74, %c0_75, %c12_76, %c3_77], %86 {strides = array<i32>} : memref<3x1x24x128xf32, #tpu.memory_space<vmem>>, vector<1x1x1x16xf32>,
    %87 = vector.extract_strided_slice %3 {offsets = [0, 160], sizes = [1, 16], strides = [1, 1]} : vector<1x256xf32> to vector<1x16xf32>
    %c0_78 = arith.constant 0 : index
    %c0_79 = arith.constant 0 : index
    %c13 = arith.constant 13 : index
    %c3_80 = arith.constant 3 : index
    %88 = vector.load %arg6[%c0_78, %c0_79, %c13, %c3_80] : memref<3x1x24x128xf32, #tpu.memory_space<vmem>>, vector<1x1x1x16xf32>
    %89 = vector.shape_cast %88 : vector<1x1x1x16xf32> to vector<1x16xf32>
    %90 = vector.shape_cast %87 : vector<1x16xf32> to vector<1x1x1x16xf32>
    tpu.vector_store %arg6[%c0_78, %c0_79, %c13, %c3_80], %90 {strides = array<i32>} : memref<3x1x24x128xf32, #tpu.memory_space<vmem>>, vector<1x1x1x16xf32>,
    %91 = vector.extract_strided_slice %6 {offsets = [0, 160], sizes = [1, 16], strides = [1, 1]} : vector<1x256xf32> to vector<1x16xf32>
    %c1_81 = arith.constant 1 : index
    %c0_82 = arith.constant 0 : index
    %c13_83 = arith.constant 13 : index
    %c3_84 = arith.constant 3 : index
    %92 = vector.load %arg6[%c1_81, %c0_82, %c13_83, %c3_84] : memref<3x1x24x128xf32, #tpu.memory_space<vmem>>, vector<1x1x1x16xf32>
    %93 = vector.shape_cast %92 : vector<1x1x1x16xf32> to vector<1x16xf32>
    %94 = vector.shape_cast %91 : vector<1x16xf32> to vector<1x1x1x16xf32>
    tpu.vector_store %arg6[%c1_81, %c0_82, %c13_83, %c3_84], %94 {strides = array<i32>} : memref<3x1x24x128xf32, #tpu.memory_space<vmem>>, vector<1x1x1x16xf32>,
    %95 = vector.extract_strided_slice %3 {offsets = [0, 176], sizes = [1, 16], strides = [1, 1]} : vector<1x256xf32> to vector<1x16xf32>
    %c0_85 = arith.constant 0 : index
    %c0_86 = arith.constant 0 : index
    %c14 = arith.constant 14 : index
    %c3_87 = arith.constant 3 : index
    %96 = vector.load %arg6[%c0_85, %c0_86, %c14, %c3_87] : memref<3x1x24x128xf32, #tpu.memory_space<vmem>>, vector<1x1x1x16xf32>
    %97 = vector.shape_cast %96 : vector<1x1x1x16xf32> to vector<1x16xf32>
    %98 = vector.shape_cast %95 : vector<1x16xf32> to vector<1x1x1x16xf32>
    tpu.vector_store %arg6[%c0_85, %c0_86, %c14, %c3_87], %98 {strides = array<i32>} : memref<3x1x24x128xf32, #tpu.memory_space<vmem>>, vector<1x1x1x16xf32>,
    %99 = vector.extract_strided_slice %6 {offsets = [0, 176], sizes = [1, 16], strides = [1, 1]} : vector<1x256xf32> to vector<1x16xf32>
    %c1_88 = arith.constant 1 : index
    %c0_89 = arith.constant 0 : index
    %c14_90 = arith.constant 14 : index
    %c3_91 = arith.constant 3 : index
    %100 = vector.load %arg6[%c1_88, %c0_89, %c14_90, %c3_91] : memref<3x1x24x128xf32, #tpu.memory_space<vmem>>, vector<1x1x1x16xf32>
    %101 = vector.shape_cast %100 : vector<1x1x1x16xf32> to vector<1x16xf32>
    %102 = vector.shape_cast %99 : vector<1x16xf32> to vector<1x1x1x16xf32>
    tpu.vector_store %arg6[%c1_88, %c0_89, %c14_90, %c3_91], %102 {strides = array<i32>} : memref<3x1x24x128xf32, #tpu.memory_space<vmem>>, vector<1x1x1x16xf32>,
    %103 = vector.extract_strided_slice %3 {offsets = [0, 192], sizes = [1, 16], strides = [1, 1]} : vector<1x256xf32> to vector<1x16xf32>
    %c0_92 = arith.constant 0 : index
    %c0_93 = arith.constant 0 : index
    %c15 = arith.constant 15 : index
    %c3_94 = arith.constant 3 : index
    %104 = vector.load %arg6[%c0_92, %c0_93, %c15, %c3_94] : memref<3x1x24x128xf32, #tpu.memory_space<vmem>>, vector<1x1x1x16xf32>
    %105 = vector.shape_cast %104 : vector<1x1x1x16xf32> to vector<1x16xf32>
    %106 = vector.shape_cast %103 : vector<1x16xf32> to vector<1x1x1x16xf32>
    tpu.vector_store %arg6[%c0_92, %c0_93, %c15, %c3_94], %106 {strides = array<i32>} : memref<3x1x24x128xf32, #tpu.memory_space<vmem>>, vector<1x1x1x16xf32>,
    %107 = vector.extract_strided_slice %6 {offsets = [0, 192], sizes = [1, 16], strides = [1, 1]} : vector<1x256xf32> to vector<1x16xf32>
    %c1_95 = arith.constant 1 : index
    %c0_96 = arith.constant 0 : index
    %c15_97 = arith.constant 15 : index
    %c3_98 = arith.constant 3 : index
    %108 = vector.load %arg6[%c1_95, %c0_96, %c15_97, %c3_98] : memref<3x1x24x128xf32, #tpu.memory_space<vmem>>, vector<1x1x1x16xf32>
    %109 = vector.shape_cast %108 : vector<1x1x1x16xf32> to vector<1x16xf32>
    %110 = vector.shape_cast %107 : vector<1x16xf32> to vector<1x1x1x16xf32>
    tpu.vector_store %arg6[%c1_95, %c0_96, %c15_97, %c3_98], %110 {strides = array<i32>} : memref<3x1x24x128xf32, #tpu.memory_space<vmem>>, vector<1x1x1x16xf32>,
    %111 = vector.extract_strided_slice %3 {offsets = [0, 208], sizes = [1, 16], strides = [1, 1]} : vector<1x256xf32> to vector<1x16xf32>
    %c0_99 = arith.constant 0 : index
    %c0_100 = arith.constant 0 : index
    %c16 = arith.constant 16 : index
    %c3_101 = arith.constant 3 : index
    %112 = vector.load %arg6[%c0_99, %c0_100, %c16, %c3_101] : memref<3x1x24x128xf32, #tpu.memory_space<vmem>>, vector<1x1x1x16xf32>
    %113 = vector.shape_cast %112 : vector<1x1x1x16xf32> to vector<1x16xf32>
    %114 = vector.shape_cast %111 : vector<1x16xf32> to vector<1x1x1x16xf32>
    tpu.vector_store %arg6[%c0_99, %c0_100, %c16, %c3_101], %114 {strides = array<i32>} : memref<3x1x24x128xf32, #tpu.memory_space<vmem>>, vector<1x1x1x16xf32>,
    %115 = vector.extract_strided_slice %6 {offsets = [0, 208], sizes = [1, 16], strides = [1, 1]} : vector<1x256xf32> to vector<1x16xf32>
    %c1_102 = arith.constant 1 : index
    %c0_103 = arith.constant 0 : index
    %c16_104 = arith.constant 16 : index
    %c3_105 = arith.constant 3 : index
    %116 = vector.load %arg6[%c1_102, %c0_103, %c16_104, %c3_105] : memref<3x1x24x128xf32, #tpu.memory_space<vmem>>, vector<1x1x1x16xf32>
    %117 = vector.shape_cast %116 : vector<1x1x1x16xf32> to vector<1x16xf32>
    %118 = vector.shape_cast %115 : vector<1x16xf32> to vector<1x1x1x16xf32>
    tpu.vector_store %arg6[%c1_102, %c0_103, %c16_104, %c3_105], %118 {strides = array<i32>} : memref<3x1x24x128xf32, #tpu.memory_space<vmem>>, vector<1x1x1x16xf32>,
    %119 = vector.extract_strided_slice %3 {offsets = [0, 224], sizes = [1, 16], strides = [1, 1]} : vector<1x256xf32> to vector<1x16xf32>
    %c0_106 = arith.constant 0 : index
    %c0_107 = arith.constant 0 : index
    %c17 = arith.constant 17 : index
    %c3_108 = arith.constant 3 : index
    %120 = vector.load %arg6[%c0_106, %c0_107, %c17, %c3_108] : memref<3x1x24x128xf32, #tpu.memory_space<vmem>>, vector<1x1x1x16xf32>
    %121 = vector.shape_cast %120 : vector<1x1x1x16xf32> to vector<1x16xf32>
    %122 = vector.shape_cast %119 : vector<1x16xf32> to vector<1x1x1x16xf32>
    tpu.vector_store %arg6[%c0_106, %c0_107, %c17, %c3_108], %122 {strides = array<i32>} : memref<3x1x24x128xf32, #tpu.memory_space<vmem>>, vector<1x1x1x16xf32>,
    %123 = vector.extract_strided_slice %6 {offsets = [0, 224], sizes = [1, 16], strides = [1, 1]} : vector<1x256xf32> to vector<1x16xf32>
    %c1_109 = arith.constant 1 : index
    %c0_110 = arith.constant 0 : index
    %c17_111 = arith.constant 17 : index
    %c3_112 = arith.constant 3 : index
    %124 = vector.load %arg6[%c1_109, %c0_110, %c17_111, %c3_112] : memref<3x1x24x128xf32, #tpu.memory_space<vmem>>, vector<1x1x1x16xf32>
    %125 = vector.shape_cast %124 : vector<1x1x1x16xf32> to vector<1x16xf32>
    %126 = vector.shape_cast %123 : vector<1x16xf32> to vector<1x1x1x16xf32>
    tpu.vector_store %arg6[%c1_109, %c0_110, %c17_111, %c3_112], %126 {strides = array<i32>} : memref<3x1x24x128xf32, #tpu.memory_space<vmem>>, vector<1x1x1x16xf32>,
    %127 = vector.extract_strided_slice %3 {offsets = [0, 240], sizes = [1, 16], strides = [1, 1]} : vector<1x256xf32> to vector<1x16xf32>
    %c0_113 = arith.constant 0 : index
    %c0_114 = arith.constant 0 : index
    %c18 = arith.constant 18 : index
    %c3_115 = arith.constant 3 : index
    %128 = vector.load %arg6[%c0_113, %c0_114, %c18, %c3_115] : memref<3x1x24x128xf32, #tpu.memory_space<vmem>>, vector<1x1x1x16xf32>
    %129 = vector.shape_cast %128 : vector<1x1x1x16xf32> to vector<1x16xf32>
    %130 = vector.shape_cast %127 : vector<1x16xf32> to vector<1x1x1x16xf32>
    tpu.vector_store %arg6[%c0_113, %c0_114, %c18, %c3_115], %130 {strides = array<i32>} : memref<3x1x24x128xf32, #tpu.memory_space<vmem>>, vector<1x1x1x16xf32>,
    %131 = vector.extract_strided_slice %6 {offsets = [0, 240], sizes = [1, 16], strides = [1, 1]} : vector<1x256xf32> to vector<1x16xf32>
    %c1_116 = arith.constant 1 : index
    %c0_117 = arith.constant 0 : index
    %c18_118 = arith.constant 18 : index
    %c3_119 = arith.constant 3 : index
    %132 = vector.load %arg6[%c1_116, %c0_117, %c18_118, %c3_119] : memref<3x1x24x128xf32, #tpu.memory_space<vmem>>, vector<1x1x1x16xf32>
    %133 = vector.shape_cast %132 : vector<1x1x1x16xf32> to vector<1x16xf32>
    %134 = vector.shape_cast %131 : vector<1x16xf32> to vector<1x1x1x16xf32>
    tpu.vector_store %arg6[%c1_116, %c0_117, %c18_118, %c3_119], %134 {strides = array<i32>} : memref<3x1x24x128xf32, #tpu.memory_space<vmem>>, vector<1x1x1x16xf32>,
    %c0_120 = arith.constant 0 : index
    %c0_121 = arith.constant 0 : index
    %c0_122 = arith.constant 0 : index
    %c0_123 = arith.constant 0 : index
    %135 = vector.load %arg1[%c0_120, %c0_121, %c0_122, %c0_123] : memref<1x1x16x16xf32, #tpu.memory_space<vmem>>, vector<1x1x16x16xf32>
    %136 = vector.shape_cast %135 : vector<1x1x16x16xf32> to vector<1x16x16xf32>
    %c2 = arith.constant 2 : index
    %c0_124 = arith.constant 0 : index
    %c3_125 = arith.constant 3 : index
    %c3_126 = arith.constant 3 : index
    %137 = vector.load %arg6[%c2, %c0_124, %c3_125, %c3_126] : memref<3x1x24x128xf32, #tpu.memory_space<vmem>>, vector<1x1x16x16xf32>
    %138 = vector.shape_cast %137 : vector<1x1x16x16xf32> to vector<1x16x16xf32>
    %139 = vector.shape_cast %136 : vector<1x16x16xf32> to vector<1x1x16x16xf32>
    tpu.vector_store %arg6[%c2, %c0_124, %c3_125, %c3_126], %139 {strides = array<i32>} : memref<3x1x24x128xf32, #tpu.memory_space<vmem>>, vector<1x1x16x16xf32>,
    %cst_127 = arith.constant 0.000000e+00 : f32
    %140 = vector.broadcast %cst_127 : f32 to vector<1x16x16xf32>
    %c0_128 = arith.constant 0 : index
    %c0_129 = arith.constant 0 : index
    %c0_130 = arith.constant 0 : index
    %c0_131 = arith.constant 0 : index
    %141 = vector.load %arg6[%c0_128, %c0_129, %c0_130, %c0_131] : memref<3x1x24x128xf32, #tpu.memory_space<vmem>>, vector<1x1x22x16xf32>
    %142 = vector.shape_cast %141 : vector<1x1x22x16xf32> to vector<1x22x16xf32>
    %c0_132 = arith.constant 0 : index
    %c0_133 = arith.constant 0 : index
    %c0_134 = arith.constant 0 : index
    %c1_135 = arith.constant 1 : index
    %143 = vector.load %arg6[%c0_132, %c0_133, %c0_134, %c1_135] : memref<3x1x24x128xf32, #tpu.memory_space<vmem>>, vector<1x1x22x16xf32>
    %144 = vector.shape_cast %143 : vector<1x1x22x16xf32> to vector<1x22x16xf32>
    %c0_136 = arith.constant 0 : index
    %c0_137 = arith.constant 0 : index
    %c0_138 = arith.constant 0 : index
    %c2_139 = arith.constant 2 : index
    %145 = vector.load %arg6[%c0_136, %c0_137, %c0_138, %c2_139] : memref<3x1x24x128xf32, #tpu.memory_space<vmem>>, vector<1x1x22x16xf32>
    %146 = vector.shape_cast %145 : vector<1x1x22x16xf32> to vector<1x22x16xf32>
    %c0_140 = arith.constant 0 : index
    %c0_141 = arith.constant 0 : index
    %c0_142 = arith.constant 0 : index
    %c3_143 = arith.constant 3 : index
    %147 = vector.load %arg6[%c0_140, %c0_141, %c0_142, %c3_143] : memref<3x1x24x128xf32, #tpu.memory_space<vmem>>, vector<1x1x22x16xf32>
    %148 = vector.shape_cast %147 : vector<1x1x22x16xf32> to vector<1x22x16xf32>
    %c0_144 = arith.constant 0 : index
    %c0_145 = arith.constant 0 : index
    %c0_146 = arith.constant 0 : index
    %c4_147 = arith.constant 4 : index
    %149 = vector.load %arg6[%c0_144, %c0_145, %c0_146, %c4_147] : memref<3x1x24x128xf32, #tpu.memory_space<vmem>>, vector<1x1x22x16xf32>
    %150 = vector.shape_cast %149 : vector<1x1x22x16xf32> to vector<1x22x16xf32>
    %c0_148 = arith.constant 0 : index
    %c0_149 = arith.constant 0 : index
    %c0_150 = arith.constant 0 : index
    %c5_151 = arith.constant 5 : index
    %151 = vector.load %arg6[%c0_148, %c0_149, %c0_150, %c5_151] : memref<3x1x24x128xf32, #tpu.memory_space<vmem>>, vector<1x1x22x16xf32>
    %152 = vector.shape_cast %151 : vector<1x1x22x16xf32> to vector<1x22x16xf32>
    %c0_152 = arith.constant 0 : index
    %c0_153 = arith.constant 0 : index
    %c0_154 = arith.constant 0 : index
    %c6_155 = arith.constant 6 : index
    %153 = vector.load %arg6[%c0_152, %c0_153, %c0_154, %c6_155] : memref<3x1x24x128xf32, #tpu.memory_space<vmem>>, vector<1x1x22x16xf32>
    %154 = vector.shape_cast %153 : vector<1x1x22x16xf32> to vector<1x22x16xf32>
    %c0_156 = arith.constant 0 : index
    %155 = memref.load %arg2[%c0_156] : memref<147xf32, #tpu.memory_space<smem>>
    %156 = vector.extract_strided_slice %142 {offsets = [0, 0, 0], sizes = [1, 16, 16], strides = [1, 1, 1]} : vector<1x22x16xf32> to vector<1x16x16xf32>
    %157 = vector.broadcast %155 : f32 to vector<1x16x16xf32>
    %158 = arith.mulf %157, %156 : vector<1x16x16xf32>
    %159 = arith.addf %140, %158 : vector<1x16x16xf32>
    %c1_157 = arith.constant 1 : index
    %160 = memref.load %arg2[%c1_157] : memref<147xf32, #tpu.memory_space<smem>>
    %161 = vector.extract_strided_slice %144 {offsets = [0, 0, 0], sizes = [1, 16, 16], strides = [1, 1, 1]} : vector<1x22x16xf32> to vector<1x16x16xf32>
    %162 = vector.broadcast %160 : f32 to vector<1x16x16xf32>
    %163 = arith.mulf %162, %161 : vector<1x16x16xf32>
    %164 = arith.addf %159, %163 : vector<1x16x16xf32>
    %c2_158 = arith.constant 2 : index
    %165 = memref.load %arg2[%c2_158] : memref<147xf32, #tpu.memory_space<smem>>
    %166 = vector.extract_strided_slice %146 {offsets = [0, 0, 0], sizes = [1, 16, 16], strides = [1, 1, 1]} : vector<1x22x16xf32> to vector<1x16x16xf32>
    %167 = vector.broadcast %165 : f32 to vector<1x16x16xf32>
    %168 = arith.mulf %167, %166 : vector<1x16x16xf32>
    %169 = arith.addf %164, %168 : vector<1x16x16xf32>
    %c3_159 = arith.constant 3 : index
    %170 = memref.load %arg2[%c3_159] : memref<147xf32, #tpu.memory_space<smem>>
    %171 = vector.extract_strided_slice %148 {offsets = [0, 0, 0], sizes = [1, 16, 16], strides = [1, 1, 1]} : vector<1x22x16xf32> to vector<1x16x16xf32>
    %172 = vector.broadcast %170 : f32 to vector<1x16x16xf32>
    %173 = arith.mulf %172, %171 : vector<1x16x16xf32>
    %174 = arith.addf %169, %173 : vector<1x16x16xf32>
    %c4_160 = arith.constant 4 : index
    %175 = memref.load %arg2[%c4_160] : memref<147xf32, #tpu.memory_space<smem>>
    %176 = vector.extract_strided_slice %150 {offsets = [0, 0, 0], sizes = [1, 16, 16], strides = [1, 1, 1]} : vector<1x22x16xf32> to vector<1x16x16xf32>
    %177 = vector.broadcast %175 : f32 to vector<1x16x16xf32>
    %178 = arith.mulf %177, %176 : vector<1x16x16xf32>
    %179 = arith.addf %174, %178 : vector<1x16x16xf32>
    %c5_161 = arith.constant 5 : index
    %180 = memref.load %arg2[%c5_161] : memref<147xf32, #tpu.memory_space<smem>>
    %181 = vector.extract_strided_slice %152 {offsets = [0, 0, 0], sizes = [1, 16, 16], strides = [1, 1, 1]} : vector<1x22x16xf32> to vector<1x16x16xf32>
    %182 = vector.broadcast %180 : f32 to vector<1x16x16xf32>
    %183 = arith.mulf %182, %181 : vector<1x16x16xf32>
    %184 = arith.addf %179, %183 : vector<1x16x16xf32>
    %c6_162 = arith.constant 6 : index
    %185 = memref.load %arg2[%c6_162] : memref<147xf32, #tpu.memory_space<smem>>
    %186 = vector.extract_strided_slice %154 {offsets = [0, 0, 0], sizes = [1, 16, 16], strides = [1, 1, 1]} : vector<1x22x16xf32> to vector<1x16x16xf32>
    %187 = vector.broadcast %185 : f32 to vector<1x16x16xf32>
    %188 = arith.mulf %187, %186 : vector<1x16x16xf32>
    %189 = arith.addf %184, %188 : vector<1x16x16xf32>
    %c7_163 = arith.constant 7 : index
    %190 = memref.load %arg2[%c7_163] : memref<147xf32, #tpu.memory_space<smem>>
    %191 = vector.extract_strided_slice %142 {offsets = [0, 1, 0], sizes = [1, 16, 16], strides = [1, 1, 1]} : vector<1x22x16xf32> to vector<1x16x16xf32>
    %192 = vector.broadcast %190 : f32 to vector<1x16x16xf32>
    %193 = arith.mulf %192, %191 : vector<1x16x16xf32>
    %194 = arith.addf %189, %193 : vector<1x16x16xf32>
    %c8_164 = arith.constant 8 : index
    %195 = memref.load %arg2[%c8_164] : memref<147xf32, #tpu.memory_space<smem>>
    %196 = vector.extract_strided_slice %144 {offsets = [0, 1, 0], sizes = [1, 16, 16], strides = [1, 1, 1]} : vector<1x22x16xf32> to vector<1x16x16xf32>
    %197 = vector.broadcast %195 : f32 to vector<1x16x16xf32>
    %198 = arith.mulf %197, %196 : vector<1x16x16xf32>
    %199 = arith.addf %194, %198 : vector<1x16x16xf32>
    %c9_165 = arith.constant 9 : index
    %200 = memref.load %arg2[%c9_165] : memref<147xf32, #tpu.memory_space<smem>>
    %201 = vector.extract_strided_slice %146 {offsets = [0, 1, 0], sizes = [1, 16, 16], strides = [1, 1, 1]} : vector<1x22x16xf32> to vector<1x16x16xf32>
    %202 = vector.broadcast %200 : f32 to vector<1x16x16xf32>
    %203 = arith.mulf %202, %201 : vector<1x16x16xf32>
    %204 = arith.addf %199, %203 : vector<1x16x16xf32>
    %c10_166 = arith.constant 10 : index
    %205 = memref.load %arg2[%c10_166] : memref<147xf32, #tpu.memory_space<smem>>
    %206 = vector.extract_strided_slice %148 {offsets = [0, 1, 0], sizes = [1, 16, 16], strides = [1, 1, 1]} : vector<1x22x16xf32> to vector<1x16x16xf32>
    %207 = vector.broadcast %205 : f32 to vector<1x16x16xf32>
    %208 = arith.mulf %207, %206 : vector<1x16x16xf32>
    %209 = arith.addf %204, %208 : vector<1x16x16xf32>
    %c11_167 = arith.constant 11 : index
    %210 = memref.load %arg2[%c11_167] : memref<147xf32, #tpu.memory_space<smem>>
    %211 = vector.extract_strided_slice %150 {offsets = [0, 1, 0], sizes = [1, 16, 16], strides = [1, 1, 1]} : vector<1x22x16xf32> to vector<1x16x16xf32>
    %212 = vector.broadcast %210 : f32 to vector<1x16x16xf32>
    %213 = arith.mulf %212, %211 : vector<1x16x16xf32>
    %214 = arith.addf %209, %213 : vector<1x16x16xf32>
    %c12_168 = arith.constant 12 : index
    %215 = memref.load %arg2[%c12_168] : memref<147xf32, #tpu.memory_space<smem>>
    %216 = vector.extract_strided_slice %152 {offsets = [0, 1, 0], sizes = [1, 16, 16], strides = [1, 1, 1]} : vector<1x22x16xf32> to vector<1x16x16xf32>
    %217 = vector.broadcast %215 : f32 to vector<1x16x16xf32>
    %218 = arith.mulf %217, %216 : vector<1x16x16xf32>
    %219 = arith.addf %214, %218 : vector<1x16x16xf32>
    %c13_169 = arith.constant 13 : index
    %220 = memref.load %arg2[%c13_169] : memref<147xf32, #tpu.memory_space<smem>>
    %221 = vector.extract_strided_slice %154 {offsets = [0, 1, 0], sizes = [1, 16, 16], strides = [1, 1, 1]} : vector<1x22x16xf32> to vector<1x16x16xf32>
    %222 = vector.broadcast %220 : f32 to vector<1x16x16xf32>
    %223 = arith.mulf %222, %221 : vector<1x16x16xf32>
    %224 = arith.addf %219, %223 : vector<1x16x16xf32>
    %c14_170 = arith.constant 14 : index
    %225 = memref.load %arg2[%c14_170] : memref<147xf32, #tpu.memory_space<smem>>
    %226 = vector.extract_strided_slice %142 {offsets = [0, 2, 0], sizes = [1, 16, 16], strides = [1, 1, 1]} : vector<1x22x16xf32> to vector<1x16x16xf32>
    %227 = vector.broadcast %225 : f32 to vector<1x16x16xf32>
    %228 = arith.mulf %227, %226 : vector<1x16x16xf32>
    %229 = arith.addf %224, %228 : vector<1x16x16xf32>
    %c15_171 = arith.constant 15 : index
    %230 = memref.load %arg2[%c15_171] : memref<147xf32, #tpu.memory_space<smem>>
    %231 = vector.extract_strided_slice %144 {offsets = [0, 2, 0], sizes = [1, 16, 16], strides = [1, 1, 1]} : vector<1x22x16xf32> to vector<1x16x16xf32>
    %232 = vector.broadcast %230 : f32 to vector<1x16x16xf32>
    %233 = arith.mulf %232, %231 : vector<1x16x16xf32>
    %234 = arith.addf %229, %233 : vector<1x16x16xf32>
    %c16_172 = arith.constant 16 : index
    %235 = memref.load %arg2[%c16_172] : memref<147xf32, #tpu.memory_space<smem>>
    %236 = vector.extract_strided_slice %146 {offsets = [0, 2, 0], sizes = [1, 16, 16], strides = [1, 1, 1]} : vector<1x22x16xf32> to vector<1x16x16xf32>
    %237 = vector.broadcast %235 : f32 to vector<1x16x16xf32>
    %238 = arith.mulf %237, %236 : vector<1x16x16xf32>
    %239 = arith.addf %234, %238 : vector<1x16x16xf32>
    %c17_173 = arith.constant 17 : index
    %240 = memref.load %arg2[%c17_173] : memref<147xf32, #tpu.memory_space<smem>>
    %241 = vector.extract_strided_slice %148 {offsets = [0, 2, 0], sizes = [1, 16, 16], strides = [1, 1, 1]} : vector<1x22x16xf32> to vector<1x16x16xf32>
    %242 = vector.broadcast %240 : f32 to vector<1x16x16xf32>
    %243 = arith.mulf %242, %241 : vector<1x16x16xf32>
    %244 = arith.addf %239, %243 : vector<1x16x16xf32>
    %c18_174 = arith.constant 18 : index
    %245 = memref.load %arg2[%c18_174] : memref<147xf32, #tpu.memory_space<smem>>
    %246 = vector.extract_strided_slice %150 {offsets = [0, 2, 0], sizes = [1, 16, 16], strides = [1, 1, 1]} : vector<1x22x16xf32> to vector<1x16x16xf32>
    %247 = vector.broadcast %245 : f32 to vector<1x16x16xf32>
    %248 = arith.mulf %247, %246 : vector<1x16x16xf32>
    %249 = arith.addf %244, %248 : vector<1x16x16xf32>
    %c19 = arith.constant 19 : index
    %250 = memref.load %arg2[%c19] : memref<147xf32, #tpu.memory_space<smem>>
    %251 = vector.extract_strided_slice %152 {offsets = [0, 2, 0], sizes = [1, 16, 16], strides = [1, 1, 1]} : vector<1x22x16xf32> to vector<1x16x16xf32>
    %252 = vector.broadcast %250 : f32 to vector<1x16x16xf32>
    %253 = arith.mulf %252, %251 : vector<1x16x16xf32>
    %254 = arith.addf %249, %253 : vector<1x16x16xf32>
    %c20 = arith.constant 20 : index
    %255 = memref.load %arg2[%c20] : memref<147xf32, #tpu.memory_space<smem>>
    %256 = vector.extract_strided_slice %154 {offsets = [0, 2, 0], sizes = [1, 16, 16], strides = [1, 1, 1]} : vector<1x22x16xf32> to vector<1x16x16xf32>
    %257 = vector.broadcast %255 : f32 to vector<1x16x16xf32>
    %258 = arith.mulf %257, %256 : vector<1x16x16xf32>
    %259 = arith.addf %254, %258 : vector<1x16x16xf32>
    %c21 = arith.constant 21 : index
    %260 = memref.load %arg2[%c21] : memref<147xf32, #tpu.memory_space<smem>>
    %261 = vector.extract_strided_slice %142 {offsets = [0, 3, 0], sizes = [1, 16, 16], strides = [1, 1, 1]} : vector<1x22x16xf32> to vector<1x16x16xf32>
    %262 = vector.broadcast %260 : f32 to vector<1x16x16xf32>
    %263 = arith.mulf %262, %261 : vector<1x16x16xf32>
    %264 = arith.addf %259, %263 : vector<1x16x16xf32>
    %c22 = arith.constant 22 : index
    %265 = memref.load %arg2[%c22] : memref<147xf32, #tpu.memory_space<smem>>
    %266 = vector.extract_strided_slice %144 {offsets = [0, 3, 0], sizes = [1, 16, 16], strides = [1, 1, 1]} : vector<1x22x16xf32> to vector<1x16x16xf32>
    %267 = vector.broadcast %265 : f32 to vector<1x16x16xf32>
    %268 = arith.mulf %267, %266 : vector<1x16x16xf32>
    %269 = arith.addf %264, %268 : vector<1x16x16xf32>
    %c23 = arith.constant 23 : index
    %270 = memref.load %arg2[%c23] : memref<147xf32, #tpu.memory_space<smem>>
    %271 = vector.extract_strided_slice %146 {offsets = [0, 3, 0], sizes = [1, 16, 16], strides = [1, 1, 1]} : vector<1x22x16xf32> to vector<1x16x16xf32>
    %272 = vector.broadcast %270 : f32 to vector<1x16x16xf32>
    %273 = arith.mulf %272, %271 : vector<1x16x16xf32>
    %274 = arith.addf %269, %273 : vector<1x16x16xf32>
    %c24 = arith.constant 24 : index
    %275 = memref.load %arg2[%c24] : memref<147xf32, #tpu.memory_space<smem>>
    %276 = vector.extract_strided_slice %148 {offsets = [0, 3, 0], sizes = [1, 16, 16], strides = [1, 1, 1]} : vector<1x22x16xf32> to vector<1x16x16xf32>
    %277 = vector.broadcast %275 : f32 to vector<1x16x16xf32>
    %278 = arith.mulf %277, %276 : vector<1x16x16xf32>
    %279 = arith.addf %274, %278 : vector<1x16x16xf32>
    %c25 = arith.constant 25 : index
    %280 = memref.load %arg2[%c25] : memref<147xf32, #tpu.memory_space<smem>>
    %281 = vector.extract_strided_slice %150 {offsets = [0, 3, 0], sizes = [1, 16, 16], strides = [1, 1, 1]} : vector<1x22x16xf32> to vector<1x16x16xf32>
    %282 = vector.broadcast %280 : f32 to vector<1x16x16xf32>
    %283 = arith.mulf %282, %281 : vector<1x16x16xf32>
    %284 = arith.addf %279, %283 : vector<1x16x16xf32>
    %c26 = arith.constant 26 : index
    %285 = memref.load %arg2[%c26] : memref<147xf32, #tpu.memory_space<smem>>
    %286 = vector.extract_strided_slice %152 {offsets = [0, 3, 0], sizes = [1, 16, 16], strides = [1, 1, 1]} : vector<1x22x16xf32> to vector<1x16x16xf32>
    %287 = vector.broadcast %285 : f32 to vector<1x16x16xf32>
    %288 = arith.mulf %287, %286 : vector<1x16x16xf32>
    %289 = arith.addf %284, %288 : vector<1x16x16xf32>
    %c27 = arith.constant 27 : index
    %290 = memref.load %arg2[%c27] : memref<147xf32, #tpu.memory_space<smem>>
    %291 = vector.extract_strided_slice %154 {offsets = [0, 3, 0], sizes = [1, 16, 16], strides = [1, 1, 1]} : vector<1x22x16xf32> to vector<1x16x16xf32>
    %292 = vector.broadcast %290 : f32 to vector<1x16x16xf32>
    %293 = arith.mulf %292, %291 : vector<1x16x16xf32>
    %294 = arith.addf %289, %293 : vector<1x16x16xf32>
    %c28 = arith.constant 28 : index
    %295 = memref.load %arg2[%c28] : memref<147xf32, #tpu.memory_space<smem>>
    %296 = vector.extract_strided_slice %142 {offsets = [0, 4, 0], sizes = [1, 16, 16], strides = [1, 1, 1]} : vector<1x22x16xf32> to vector<1x16x16xf32>
    %297 = vector.broadcast %295 : f32 to vector<1x16x16xf32>
    %298 = arith.mulf %297, %296 : vector<1x16x16xf32>
    %299 = arith.addf %294, %298 : vector<1x16x16xf32>
    %c29 = arith.constant 29 : index
    %300 = memref.load %arg2[%c29] : memref<147xf32, #tpu.memory_space<smem>>
    %301 = vector.extract_strided_slice %144 {offsets = [0, 4, 0], sizes = [1, 16, 16], strides = [1, 1, 1]} : vector<1x22x16xf32> to vector<1x16x16xf32>
    %302 = vector.broadcast %300 : f32 to vector<1x16x16xf32>
    %303 = arith.mulf %302, %301 : vector<1x16x16xf32>
    %304 = arith.addf %299, %303 : vector<1x16x16xf32>
    %c30 = arith.constant 30 : index
    %305 = memref.load %arg2[%c30] : memref<147xf32, #tpu.memory_space<smem>>
    %306 = vector.extract_strided_slice %146 {offsets = [0, 4, 0], sizes = [1, 16, 16], strides = [1, 1, 1]} : vector<1x22x16xf32> to vector<1x16x16xf32>
    %307 = vector.broadcast %305 : f32 to vector<1x16x16xf32>
    %308 = arith.mulf %307, %306 : vector<1x16x16xf32>
    %309 = arith.addf %304, %308 : vector<1x16x16xf32>
    %c31 = arith.constant 31 : index
    %310 = memref.load %arg2[%c31] : memref<147xf32, #tpu.memory_space<smem>>
    %311 = vector.extract_strided_slice %148 {offsets = [0, 4, 0], sizes = [1, 16, 16], strides = [1, 1, 1]} : vector<1x22x16xf32> to vector<1x16x16xf32>
    %312 = vector.broadcast %310 : f32 to vector<1x16x16xf32>
    %313 = arith.mulf %312, %311 : vector<1x16x16xf32>
    %314 = arith.addf %309, %313 : vector<1x16x16xf32>
    %c32 = arith.constant 32 : index
    %315 = memref.load %arg2[%c32] : memref<147xf32, #tpu.memory_space<smem>>
    %316 = vector.extract_strided_slice %150 {offsets = [0, 4, 0], sizes = [1, 16, 16], strides = [1, 1, 1]} : vector<1x22x16xf32> to vector<1x16x16xf32>
    %317 = vector.broadcast %315 : f32 to vector<1x16x16xf32>
    %318 = arith.mulf %317, %316 : vector<1x16x16xf32>
    %319 = arith.addf %314, %318 : vector<1x16x16xf32>
    %c33 = arith.constant 33 : index
    %320 = memref.load %arg2[%c33] : memref<147xf32, #tpu.memory_space<smem>>
    %321 = vector.extract_strided_slice %152 {offsets = [0, 4, 0], sizes = [1, 16, 16], strides = [1, 1, 1]} : vector<1x22x16xf32> to vector<1x16x16xf32>
    %322 = vector.broadcast %320 : f32 to vector<1x16x16xf32>
    %323 = arith.mulf %322, %321 : vector<1x16x16xf32>
    %324 = arith.addf %319, %323 : vector<1x16x16xf32>
    %c34 = arith.constant 34 : index
    %325 = memref.load %arg2[%c34] : memref<147xf32, #tpu.memory_space<smem>>
    %326 = vector.extract_strided_slice %154 {offsets = [0, 4, 0], sizes = [1, 16, 16], strides = [1, 1, 1]} : vector<1x22x16xf32> to vector<1x16x16xf32>
    %327 = vector.broadcast %325 : f32 to vector<1x16x16xf32>
    %328 = arith.mulf %327, %326 : vector<1x16x16xf32>
    %329 = arith.addf %324, %328 : vector<1x16x16xf32>
    %c35 = arith.constant 35 : index
    %330 = memref.load %arg2[%c35] : memref<147xf32, #tpu.memory_space<smem>>
    %331 = vector.extract_strided_slice %142 {offsets = [0, 5, 0], sizes = [1, 16, 16], strides = [1, 1, 1]} : vector<1x22x16xf32> to vector<1x16x16xf32>
    %332 = vector.broadcast %330 : f32 to vector<1x16x16xf32>
    %333 = arith.mulf %332, %331 : vector<1x16x16xf32>
    %334 = arith.addf %329, %333 : vector<1x16x16xf32>
    %c36 = arith.constant 36 : index
    %335 = memref.load %arg2[%c36] : memref<147xf32, #tpu.memory_space<smem>>
    %336 = vector.extract_strided_slice %144 {offsets = [0, 5, 0], sizes = [1, 16, 16], strides = [1, 1, 1]} : vector<1x22x16xf32> to vector<1x16x16xf32>
    %337 = vector.broadcast %335 : f32 to vector<1x16x16xf32>
    %338 = arith.mulf %337, %336 : vector<1x16x16xf32>
    %339 = arith.addf %334, %338 : vector<1x16x16xf32>
    %c37 = arith.constant 37 : index
    %340 = memref.load %arg2[%c37] : memref<147xf32, #tpu.memory_space<smem>>
    %341 = vector.extract_strided_slice %146 {offsets = [0, 5, 0], sizes = [1, 16, 16], strides = [1, 1, 1]} : vector<1x22x16xf32> to vector<1x16x16xf32>
    %342 = vector.broadcast %340 : f32 to vector<1x16x16xf32>
    %343 = arith.mulf %342, %341 : vector<1x16x16xf32>
    %344 = arith.addf %339, %343 : vector<1x16x16xf32>
    %c38 = arith.constant 38 : index
    %345 = memref.load %arg2[%c38] : memref<147xf32, #tpu.memory_space<smem>>
    %346 = vector.extract_strided_slice %148 {offsets = [0, 5, 0], sizes = [1, 16, 16], strides = [1, 1, 1]} : vector<1x22x16xf32> to vector<1x16x16xf32>
    %347 = vector.broadcast %345 : f32 to vector<1x16x16xf32>
    %348 = arith.mulf %347, %346 : vector<1x16x16xf32>
    %349 = arith.addf %344, %348 : vector<1x16x16xf32>
    %c39 = arith.constant 39 : index
    %350 = memref.load %arg2[%c39] : memref<147xf32, #tpu.memory_space<smem>>
    %351 = vector.extract_strided_slice %150 {offsets = [0, 5, 0], sizes = [1, 16, 16], strides = [1, 1, 1]} : vector<1x22x16xf32> to vector<1x16x16xf32>
    %352 = vector.broadcast %350 : f32 to vector<1x16x16xf32>
    %353 = arith.mulf %352, %351 : vector<1x16x16xf32>
    %354 = arith.addf %349, %353 : vector<1x16x16xf32>
    %c40 = arith.constant 40 : index
    %355 = memref.load %arg2[%c40] : memref<147xf32, #tpu.memory_space<smem>>
    %356 = vector.extract_strided_slice %152 {offsets = [0, 5, 0], sizes = [1, 16, 16], strides = [1, 1, 1]} : vector<1x22x16xf32> to vector<1x16x16xf32>
    %357 = vector.broadcast %355 : f32 to vector<1x16x16xf32>
    %358 = arith.mulf %357, %356 : vector<1x16x16xf32>
    %359 = arith.addf %354, %358 : vector<1x16x16xf32>
    %c41 = arith.constant 41 : index
    %360 = memref.load %arg2[%c41] : memref<147xf32, #tpu.memory_space<smem>>
    %361 = vector.extract_strided_slice %154 {offsets = [0, 5, 0], sizes = [1, 16, 16], strides = [1, 1, 1]} : vector<1x22x16xf32> to vector<1x16x16xf32>
    %362 = vector.broadcast %360 : f32 to vector<1x16x16xf32>
    %363 = arith.mulf %362, %361 : vector<1x16x16xf32>
    %364 = arith.addf %359, %363 : vector<1x16x16xf32>
    %c42 = arith.constant 42 : index
    %365 = memref.load %arg2[%c42] : memref<147xf32, #tpu.memory_space<smem>>
    %366 = vector.extract_strided_slice %142 {offsets = [0, 6, 0], sizes = [1, 16, 16], strides = [1, 1, 1]} : vector<1x22x16xf32> to vector<1x16x16xf32>
    %367 = vector.broadcast %365 : f32 to vector<1x16x16xf32>
    %368 = arith.mulf %367, %366 : vector<1x16x16xf32>
    %369 = arith.addf %364, %368 : vector<1x16x16xf32>
    %c43 = arith.constant 43 : index
    %370 = memref.load %arg2[%c43] : memref<147xf32, #tpu.memory_space<smem>>
    %371 = vector.extract_strided_slice %144 {offsets = [0, 6, 0], sizes = [1, 16, 16], strides = [1, 1, 1]} : vector<1x22x16xf32> to vector<1x16x16xf32>
    %372 = vector.broadcast %370 : f32 to vector<1x16x16xf32>
    %373 = arith.mulf %372, %371 : vector<1x16x16xf32>
    %374 = arith.addf %369, %373 : vector<1x16x16xf32>
    %c44 = arith.constant 44 : index
    %375 = memref.load %arg2[%c44] : memref<147xf32, #tpu.memory_space<smem>>
    %376 = vector.extract_strided_slice %146 {offsets = [0, 6, 0], sizes = [1, 16, 16], strides = [1, 1, 1]} : vector<1x22x16xf32> to vector<1x16x16xf32>
    %377 = vector.broadcast %375 : f32 to vector<1x16x16xf32>
    %378 = arith.mulf %377, %376 : vector<1x16x16xf32>
    %379 = arith.addf %374, %378 : vector<1x16x16xf32>
    %c45 = arith.constant 45 : index
    %380 = memref.load %arg2[%c45] : memref<147xf32, #tpu.memory_space<smem>>
    %381 = vector.extract_strided_slice %148 {offsets = [0, 6, 0], sizes = [1, 16, 16], strides = [1, 1, 1]} : vector<1x22x16xf32> to vector<1x16x16xf32>
    %382 = vector.broadcast %380 : f32 to vector<1x16x16xf32>
    %383 = arith.mulf %382, %381 : vector<1x16x16xf32>
    %384 = arith.addf %379, %383 : vector<1x16x16xf32>
    %c46 = arith.constant 46 : index
    %385 = memref.load %arg2[%c46] : memref<147xf32, #tpu.memory_space<smem>>
    %386 = vector.extract_strided_slice %150 {offsets = [0, 6, 0], sizes = [1, 16, 16], strides = [1, 1, 1]} : vector<1x22x16xf32> to vector<1x16x16xf32>
    %387 = vector.broadcast %385 : f32 to vector<1x16x16xf32>
    %388 = arith.mulf %387, %386 : vector<1x16x16xf32>
    %389 = arith.addf %384, %388 : vector<1x16x16xf32>
    %c47 = arith.constant 47 : index
    %390 = memref.load %arg2[%c47] : memref<147xf32, #tpu.memory_space<smem>>
    %391 = vector.extract_strided_slice %152 {offsets = [0, 6, 0], sizes = [1, 16, 16], strides = [1, 1, 1]} : vector<1x22x16xf32> to vector<1x16x16xf32>
    %392 = vector.broadcast %390 : f32 to vector<1x16x16xf32>
    %393 = arith.mulf %392, %391 : vector<1x16x16xf32>
    %394 = arith.addf %389, %393 : vector<1x16x16xf32>
    %c48 = arith.constant 48 : index
    %395 = memref.load %arg2[%c48] : memref<147xf32, #tpu.memory_space<smem>>
    %396 = vector.extract_strided_slice %154 {offsets = [0, 6, 0], sizes = [1, 16, 16], strides = [1, 1, 1]} : vector<1x22x16xf32> to vector<1x16x16xf32>
    %397 = vector.broadcast %395 : f32 to vector<1x16x16xf32>
    %398 = arith.mulf %397, %396 : vector<1x16x16xf32>
    %399 = arith.addf %394, %398 : vector<1x16x16xf32>
    %c1_175 = arith.constant 1 : index
    %c0_176 = arith.constant 0 : index
    %c0_177 = arith.constant 0 : index
    %c0_178 = arith.constant 0 : index
    %400 = vector.load %arg6[%c1_175, %c0_176, %c0_177, %c0_178] : memref<3x1x24x128xf32, #tpu.memory_space<vmem>>, vector<1x1x22x16xf32>
    %401 = vector.shape_cast %400 : vector<1x1x22x16xf32> to vector<1x22x16xf32>
    %c1_179 = arith.constant 1 : index
    %c0_180 = arith.constant 0 : index
    %c0_181 = arith.constant 0 : index
    %c1_182 = arith.constant 1 : index
    %402 = vector.load %arg6[%c1_179, %c0_180, %c0_181, %c1_182] : memref<3x1x24x128xf32, #tpu.memory_space<vmem>>, vector<1x1x22x16xf32>
    %403 = vector.shape_cast %402 : vector<1x1x22x16xf32> to vector<1x22x16xf32>
    %c1_183 = arith.constant 1 : index
    %c0_184 = arith.constant 0 : index
    %c0_185 = arith.constant 0 : index
    %c2_186 = arith.constant 2 : index
    %404 = vector.load %arg6[%c1_183, %c0_184, %c0_185, %c2_186] : memref<3x1x24x128xf32, #tpu.memory_space<vmem>>, vector<1x1x22x16xf32>
    %405 = vector.shape_cast %404 : vector<1x1x22x16xf32> to vector<1x22x16xf32>
    %c1_187 = arith.constant 1 : index
    %c0_188 = arith.constant 0 : index
    %c0_189 = arith.constant 0 : index
    %c3_190 = arith.constant 3 : index
    %406 = vector.load %arg6[%c1_187, %c0_188, %c0_189, %c3_190] : memref<3x1x24x128xf32, #tpu.memory_space<vmem>>, vector<1x1x22x16xf32>
    %407 = vector.shape_cast %406 : vector<1x1x22x16xf32> to vector<1x22x16xf32>
    %c1_191 = arith.constant 1 : index
    %c0_192 = arith.constant 0 : index
    %c0_193 = arith.constant 0 : index
    %c4_194 = arith.constant 4 : index
    %408 = vector.load %arg6[%c1_191, %c0_192, %c0_193, %c4_194] : memref<3x1x24x128xf32, #tpu.memory_space<vmem>>, vector<1x1x22x16xf32>
    %409 = vector.shape_cast %408 : vector<1x1x22x16xf32> to vector<1x22x16xf32>
    %c1_195 = arith.constant 1 : index
    %c0_196 = arith.constant 0 : index
    %c0_197 = arith.constant 0 : index
    %c5_198 = arith.constant 5 : index
    %410 = vector.load %arg6[%c1_195, %c0_196, %c0_197, %c5_198] : memref<3x1x24x128xf32, #tpu.memory_space<vmem>>, vector<1x1x22x16xf32>
    %411 = vector.shape_cast %410 : vector<1x1x22x16xf32> to vector<1x22x16xf32>
    %c1_199 = arith.constant 1 : index
    %c0_200 = arith.constant 0 : index
    %c0_201 = arith.constant 0 : index
    %c6_202 = arith.constant 6 : index
    %412 = vector.load %arg6[%c1_199, %c0_200, %c0_201, %c6_202] : memref<3x1x24x128xf32, #tpu.memory_space<vmem>>, vector<1x1x22x16xf32>
    %413 = vector.shape_cast %412 : vector<1x1x22x16xf32> to vector<1x22x16xf32>
    %c49 = arith.constant 49 : index
    %414 = memref.load %arg2[%c49] : memref<147xf32, #tpu.memory_space<smem>>
    %415 = vector.extract_strided_slice %401 {offsets = [0, 0, 0], sizes = [1, 16, 16], strides = [1, 1, 1]} : vector<1x22x16xf32> to vector<1x16x16xf32>
    %416 = vector.broadcast %414 : f32 to vector<1x16x16xf32>
    %417 = arith.mulf %416, %415 : vector<1x16x16xf32>
    %418 = arith.addf %399, %417 : vector<1x16x16xf32>
    %c50 = arith.constant 50 : index
    %419 = memref.load %arg2[%c50] : memref<147xf32, #tpu.memory_space<smem>>
    %420 = vector.extract_strided_slice %403 {offsets = [0, 0, 0], sizes = [1, 16, 16], strides = [1, 1, 1]} : vector<1x22x16xf32> to vector<1x16x16xf32>
    %421 = vector.broadcast %419 : f32 to vector<1x16x16xf32>
    %422 = arith.mulf %421, %420 : vector<1x16x16xf32>
    %423 = arith.addf %418, %422 : vector<1x16x16xf32>
    %c51 = arith.constant 51 : index
    %424 = memref.load %arg2[%c51] : memref<147xf32, #tpu.memory_space<smem>>
    %425 = vector.extract_strided_slice %405 {offsets = [0, 0, 0], sizes = [1, 16, 16], strides = [1, 1, 1]} : vector<1x22x16xf32> to vector<1x16x16xf32>
    %426 = vector.broadcast %424 : f32 to vector<1x16x16xf32>
    %427 = arith.mulf %426, %425 : vector<1x16x16xf32>
    %428 = arith.addf %423, %427 : vector<1x16x16xf32>
    %c52 = arith.constant 52 : index
    %429 = memref.load %arg2[%c52] : memref<147xf32, #tpu.memory_space<smem>>
    %430 = vector.extract_strided_slice %407 {offsets = [0, 0, 0], sizes = [1, 16, 16], strides = [1, 1, 1]} : vector<1x22x16xf32> to vector<1x16x16xf32>
    %431 = vector.broadcast %429 : f32 to vector<1x16x16xf32>
    %432 = arith.mulf %431, %430 : vector<1x16x16xf32>
    %433 = arith.addf %428, %432 : vector<1x16x16xf32>
    %c53 = arith.constant 53 : index
    %434 = memref.load %arg2[%c53] : memref<147xf32, #tpu.memory_space<smem>>
    %435 = vector.extract_strided_slice %409 {offsets = [0, 0, 0], sizes = [1, 16, 16], strides = [1, 1, 1]} : vector<1x22x16xf32> to vector<1x16x16xf32>
    %436 = vector.broadcast %434 : f32 to vector<1x16x16xf32>
    %437 = arith.mulf %436, %435 : vector<1x16x16xf32>
    %438 = arith.addf %433, %437 : vector<1x16x16xf32>
    %c54 = arith.constant 54 : index
    %439 = memref.load %arg2[%c54] : memref<147xf32, #tpu.memory_space<smem>>
    %440 = vector.extract_strided_slice %411 {offsets = [0, 0, 0], sizes = [1, 16, 16], strides = [1, 1, 1]} : vector<1x22x16xf32> to vector<1x16x16xf32>
    %441 = vector.broadcast %439 : f32 to vector<1x16x16xf32>
    %442 = arith.mulf %441, %440 : vector<1x16x16xf32>
    %443 = arith.addf %438, %442 : vector<1x16x16xf32>
    %c55 = arith.constant 55 : index
    %444 = memref.load %arg2[%c55] : memref<147xf32, #tpu.memory_space<smem>>
    %445 = vector.extract_strided_slice %413 {offsets = [0, 0, 0], sizes = [1, 16, 16], strides = [1, 1, 1]} : vector<1x22x16xf32> to vector<1x16x16xf32>
    %446 = vector.broadcast %444 : f32 to vector<1x16x16xf32>
    %447 = arith.mulf %446, %445 : vector<1x16x16xf32>
    %448 = arith.addf %443, %447 : vector<1x16x16xf32>
    %c56 = arith.constant 56 : index
    %449 = memref.load %arg2[%c56] : memref<147xf32, #tpu.memory_space<smem>>
    %450 = vector.extract_strided_slice %401 {offsets = [0, 1, 0], sizes = [1, 16, 16], strides = [1, 1, 1]} : vector<1x22x16xf32> to vector<1x16x16xf32>
    %451 = vector.broadcast %449 : f32 to vector<1x16x16xf32>
    %452 = arith.mulf %451, %450 : vector<1x16x16xf32>
    %453 = arith.addf %448, %452 : vector<1x16x16xf32>
    %c57 = arith.constant 57 : index
    %454 = memref.load %arg2[%c57] : memref<147xf32, #tpu.memory_space<smem>>
    %455 = vector.extract_strided_slice %403 {offsets = [0, 1, 0], sizes = [1, 16, 16], strides = [1, 1, 1]} : vector<1x22x16xf32> to vector<1x16x16xf32>
    %456 = vector.broadcast %454 : f32 to vector<1x16x16xf32>
    %457 = arith.mulf %456, %455 : vector<1x16x16xf32>
    %458 = arith.addf %453, %457 : vector<1x16x16xf32>
    %c58 = arith.constant 58 : index
    %459 = memref.load %arg2[%c58] : memref<147xf32, #tpu.memory_space<smem>>
    %460 = vector.extract_strided_slice %405 {offsets = [0, 1, 0], sizes = [1, 16, 16], strides = [1, 1, 1]} : vector<1x22x16xf32> to vector<1x16x16xf32>
    %461 = vector.broadcast %459 : f32 to vector<1x16x16xf32>
    %462 = arith.mulf %461, %460 : vector<1x16x16xf32>
    %463 = arith.addf %458, %462 : vector<1x16x16xf32>
    %c59 = arith.constant 59 : index
    %464 = memref.load %arg2[%c59] : memref<147xf32, #tpu.memory_space<smem>>
    %465 = vector.extract_strided_slice %407 {offsets = [0, 1, 0], sizes = [1, 16, 16], strides = [1, 1, 1]} : vector<1x22x16xf32> to vector<1x16x16xf32>
    %466 = vector.broadcast %464 : f32 to vector<1x16x16xf32>
    %467 = arith.mulf %466, %465 : vector<1x16x16xf32>
    %468 = arith.addf %463, %467 : vector<1x16x16xf32>
    %c60 = arith.constant 60 : index
    %469 = memref.load %arg2[%c60] : memref<147xf32, #tpu.memory_space<smem>>
    %470 = vector.extract_strided_slice %409 {offsets = [0, 1, 0], sizes = [1, 16, 16], strides = [1, 1, 1]} : vector<1x22x16xf32> to vector<1x16x16xf32>
    %471 = vector.broadcast %469 : f32 to vector<1x16x16xf32>
    %472 = arith.mulf %471, %470 : vector<1x16x16xf32>
    %473 = arith.addf %468, %472 : vector<1x16x16xf32>
    %c61 = arith.constant 61 : index
    %474 = memref.load %arg2[%c61] : memref<147xf32, #tpu.memory_space<smem>>
    %475 = vector.extract_strided_slice %411 {offsets = [0, 1, 0], sizes = [1, 16, 16], strides = [1, 1, 1]} : vector<1x22x16xf32> to vector<1x16x16xf32>
    %476 = vector.broadcast %474 : f32 to vector<1x16x16xf32>
    %477 = arith.mulf %476, %475 : vector<1x16x16xf32>
    %478 = arith.addf %473, %477 : vector<1x16x16xf32>
    %c62 = arith.constant 62 : index
    %479 = memref.load %arg2[%c62] : memref<147xf32, #tpu.memory_space<smem>>
    %480 = vector.extract_strided_slice %413 {offsets = [0, 1, 0], sizes = [1, 16, 16], strides = [1, 1, 1]} : vector<1x22x16xf32> to vector<1x16x16xf32>
    %481 = vector.broadcast %479 : f32 to vector<1x16x16xf32>
    %482 = arith.mulf %481, %480 : vector<1x16x16xf32>
    %483 = arith.addf %478, %482 : vector<1x16x16xf32>
    %c63 = arith.constant 63 : index
    %484 = memref.load %arg2[%c63] : memref<147xf32, #tpu.memory_space<smem>>
    %485 = vector.extract_strided_slice %401 {offsets = [0, 2, 0], sizes = [1, 16, 16], strides = [1, 1, 1]} : vector<1x22x16xf32> to vector<1x16x16xf32>
    %486 = vector.broadcast %484 : f32 to vector<1x16x16xf32>
    %487 = arith.mulf %486, %485 : vector<1x16x16xf32>
    %488 = arith.addf %483, %487 : vector<1x16x16xf32>
    %c64 = arith.constant 64 : index
    %489 = memref.load %arg2[%c64] : memref<147xf32, #tpu.memory_space<smem>>
    %490 = vector.extract_strided_slice %403 {offsets = [0, 2, 0], sizes = [1, 16, 16], strides = [1, 1, 1]} : vector<1x22x16xf32> to vector<1x16x16xf32>
    %491 = vector.broadcast %489 : f32 to vector<1x16x16xf32>
    %492 = arith.mulf %491, %490 : vector<1x16x16xf32>
    %493 = arith.addf %488, %492 : vector<1x16x16xf32>
    %c65 = arith.constant 65 : index
    %494 = memref.load %arg2[%c65] : memref<147xf32, #tpu.memory_space<smem>>
    %495 = vector.extract_strided_slice %405 {offsets = [0, 2, 0], sizes = [1, 16, 16], strides = [1, 1, 1]} : vector<1x22x16xf32> to vector<1x16x16xf32>
    %496 = vector.broadcast %494 : f32 to vector<1x16x16xf32>
    %497 = arith.mulf %496, %495 : vector<1x16x16xf32>
    %498 = arith.addf %493, %497 : vector<1x16x16xf32>
    %c66 = arith.constant 66 : index
    %499 = memref.load %arg2[%c66] : memref<147xf32, #tpu.memory_space<smem>>
    %500 = vector.extract_strided_slice %407 {offsets = [0, 2, 0], sizes = [1, 16, 16], strides = [1, 1, 1]} : vector<1x22x16xf32> to vector<1x16x16xf32>
    %501 = vector.broadcast %499 : f32 to vector<1x16x16xf32>
    %502 = arith.mulf %501, %500 : vector<1x16x16xf32>
    %503 = arith.addf %498, %502 : vector<1x16x16xf32>
    %c67 = arith.constant 67 : index
    %504 = memref.load %arg2[%c67] : memref<147xf32, #tpu.memory_space<smem>>
    %505 = vector.extract_strided_slice %409 {offsets = [0, 2, 0], sizes = [1, 16, 16], strides = [1, 1, 1]} : vector<1x22x16xf32> to vector<1x16x16xf32>
    %506 = vector.broadcast %504 : f32 to vector<1x16x16xf32>
    %507 = arith.mulf %506, %505 : vector<1x16x16xf32>
    %508 = arith.addf %503, %507 : vector<1x16x16xf32>
    %c68 = arith.constant 68 : index
    %509 = memref.load %arg2[%c68] : memref<147xf32, #tpu.memory_space<smem>>
    %510 = vector.extract_strided_slice %411 {offsets = [0, 2, 0], sizes = [1, 16, 16], strides = [1, 1, 1]} : vector<1x22x16xf32> to vector<1x16x16xf32>
    %511 = vector.broadcast %509 : f32 to vector<1x16x16xf32>
    %512 = arith.mulf %511, %510 : vector<1x16x16xf32>
    %513 = arith.addf %508, %512 : vector<1x16x16xf32>
    %c69 = arith.constant 69 : index
    %514 = memref.load %arg2[%c69] : memref<147xf32, #tpu.memory_space<smem>>
    %515 = vector.extract_strided_slice %413 {offsets = [0, 2, 0], sizes = [1, 16, 16], strides = [1, 1, 1]} : vector<1x22x16xf32> to vector<1x16x16xf32>
    %516 = vector.broadcast %514 : f32 to vector<1x16x16xf32>
    %517 = arith.mulf %516, %515 : vector<1x16x16xf32>
    %518 = arith.addf %513, %517 : vector<1x16x16xf32>
    %c70 = arith.constant 70 : index
    %519 = memref.load %arg2[%c70] : memref<147xf32, #tpu.memory_space<smem>>
    %520 = vector.extract_strided_slice %401 {offsets = [0, 3, 0], sizes = [1, 16, 16], strides = [1, 1, 1]} : vector<1x22x16xf32> to vector<1x16x16xf32>
    %521 = vector.broadcast %519 : f32 to vector<1x16x16xf32>
    %522 = arith.mulf %521, %520 : vector<1x16x16xf32>
    %523 = arith.addf %518, %522 : vector<1x16x16xf32>
    %c71 = arith.constant 71 : index
    %524 = memref.load %arg2[%c71] : memref<147xf32, #tpu.memory_space<smem>>
    %525 = vector.extract_strided_slice %403 {offsets = [0, 3, 0], sizes = [1, 16, 16], strides = [1, 1, 1]} : vector<1x22x16xf32> to vector<1x16x16xf32>
    %526 = vector.broadcast %524 : f32 to vector<1x16x16xf32>
    %527 = arith.mulf %526, %525 : vector<1x16x16xf32>
    %528 = arith.addf %523, %527 : vector<1x16x16xf32>
    %c72 = arith.constant 72 : index
    %529 = memref.load %arg2[%c72] : memref<147xf32, #tpu.memory_space<smem>>
    %530 = vector.extract_strided_slice %405 {offsets = [0, 3, 0], sizes = [1, 16, 16], strides = [1, 1, 1]} : vector<1x22x16xf32> to vector<1x16x16xf32>
    %531 = vector.broadcast %529 : f32 to vector<1x16x16xf32>
    %532 = arith.mulf %531, %530 : vector<1x16x16xf32>
    %533 = arith.addf %528, %532 : vector<1x16x16xf32>
    %c73 = arith.constant 73 : index
    %534 = memref.load %arg2[%c73] : memref<147xf32, #tpu.memory_space<smem>>
    %535 = vector.extract_strided_slice %407 {offsets = [0, 3, 0], sizes = [1, 16, 16], strides = [1, 1, 1]} : vector<1x22x16xf32> to vector<1x16x16xf32>
    %536 = vector.broadcast %534 : f32 to vector<1x16x16xf32>
    %537 = arith.mulf %536, %535 : vector<1x16x16xf32>
    %538 = arith.addf %533, %537 : vector<1x16x16xf32>
    %c74 = arith.constant 74 : index
    %539 = memref.load %arg2[%c74] : memref<147xf32, #tpu.memory_space<smem>>
    %540 = vector.extract_strided_slice %409 {offsets = [0, 3, 0], sizes = [1, 16, 16], strides = [1, 1, 1]} : vector<1x22x16xf32> to vector<1x16x16xf32>
    %541 = vector.broadcast %539 : f32 to vector<1x16x16xf32>
    %542 = arith.mulf %541, %540 : vector<1x16x16xf32>
    %543 = arith.addf %538, %542 : vector<1x16x16xf32>
    %c75 = arith.constant 75 : index
    %544 = memref.load %arg2[%c75] : memref<147xf32, #tpu.memory_space<smem>>
    %545 = vector.extract_strided_slice %411 {offsets = [0, 3, 0], sizes = [1, 16, 16], strides = [1, 1, 1]} : vector<1x22x16xf32> to vector<1x16x16xf32>
    %546 = vector.broadcast %544 : f32 to vector<1x16x16xf32>
    %547 = arith.mulf %546, %545 : vector<1x16x16xf32>
    %548 = arith.addf %543, %547 : vector<1x16x16xf32>
    %c76 = arith.constant 76 : index
    %549 = memref.load %arg2[%c76] : memref<147xf32, #tpu.memory_space<smem>>
    %550 = vector.extract_strided_slice %413 {offsets = [0, 3, 0], sizes = [1, 16, 16], strides = [1, 1, 1]} : vector<1x22x16xf32> to vector<1x16x16xf32>
    %551 = vector.broadcast %549 : f32 to vector<1x16x16xf32>
    %552 = arith.mulf %551, %550 : vector<1x16x16xf32>
    %553 = arith.addf %548, %552 : vector<1x16x16xf32>
    %c77 = arith.constant 77 : index
    %554 = memref.load %arg2[%c77] : memref<147xf32, #tpu.memory_space<smem>>
    %555 = vector.extract_strided_slice %401 {offsets = [0, 4, 0], sizes = [1, 16, 16], strides = [1, 1, 1]} : vector<1x22x16xf32> to vector<1x16x16xf32>
    %556 = vector.broadcast %554 : f32 to vector<1x16x16xf32>
    %557 = arith.mulf %556, %555 : vector<1x16x16xf32>
    %558 = arith.addf %553, %557 : vector<1x16x16xf32>
    %c78 = arith.constant 78 : index
    %559 = memref.load %arg2[%c78] : memref<147xf32, #tpu.memory_space<smem>>
    %560 = vector.extract_strided_slice %403 {offsets = [0, 4, 0], sizes = [1, 16, 16], strides = [1, 1, 1]} : vector<1x22x16xf32> to vector<1x16x16xf32>
    %561 = vector.broadcast %559 : f32 to vector<1x16x16xf32>
    %562 = arith.mulf %561, %560 : vector<1x16x16xf32>
    %563 = arith.addf %558, %562 : vector<1x16x16xf32>
    %c79 = arith.constant 79 : index
    %564 = memref.load %arg2[%c79] : memref<147xf32, #tpu.memory_space<smem>>
    %565 = vector.extract_strided_slice %405 {offsets = [0, 4, 0], sizes = [1, 16, 16], strides = [1, 1, 1]} : vector<1x22x16xf32> to vector<1x16x16xf32>
    %566 = vector.broadcast %564 : f32 to vector<1x16x16xf32>
    %567 = arith.mulf %566, %565 : vector<1x16x16xf32>
    %568 = arith.addf %563, %567 : vector<1x16x16xf32>
    %c80 = arith.constant 80 : index
    %569 = memref.load %arg2[%c80] : memref<147xf32, #tpu.memory_space<smem>>
    %570 = vector.extract_strided_slice %407 {offsets = [0, 4, 0], sizes = [1, 16, 16], strides = [1, 1, 1]} : vector<1x22x16xf32> to vector<1x16x16xf32>
    %571 = vector.broadcast %569 : f32 to vector<1x16x16xf32>
    %572 = arith.mulf %571, %570 : vector<1x16x16xf32>
    %573 = arith.addf %568, %572 : vector<1x16x16xf32>
    %c81 = arith.constant 81 : index
    %574 = memref.load %arg2[%c81] : memref<147xf32, #tpu.memory_space<smem>>
    %575 = vector.extract_strided_slice %409 {offsets = [0, 4, 0], sizes = [1, 16, 16], strides = [1, 1, 1]} : vector<1x22x16xf32> to vector<1x16x16xf32>
    %576 = vector.broadcast %574 : f32 to vector<1x16x16xf32>
    %577 = arith.mulf %576, %575 : vector<1x16x16xf32>
    %578 = arith.addf %573, %577 : vector<1x16x16xf32>
    %c82 = arith.constant 82 : index
    %579 = memref.load %arg2[%c82] : memref<147xf32, #tpu.memory_space<smem>>
    %580 = vector.extract_strided_slice %411 {offsets = [0, 4, 0], sizes = [1, 16, 16], strides = [1, 1, 1]} : vector<1x22x16xf32> to vector<1x16x16xf32>
    %581 = vector.broadcast %579 : f32 to vector<1x16x16xf32>
    %582 = arith.mulf %581, %580 : vector<1x16x16xf32>
    %583 = arith.addf %578, %582 : vector<1x16x16xf32>
    %c83 = arith.constant 83 : index
    %584 = memref.load %arg2[%c83] : memref<147xf32, #tpu.memory_space<smem>>
    %585 = vector.extract_strided_slice %413 {offsets = [0, 4, 0], sizes = [1, 16, 16], strides = [1, 1, 1]} : vector<1x22x16xf32> to vector<1x16x16xf32>
    %586 = vector.broadcast %584 : f32 to vector<1x16x16xf32>
    %587 = arith.mulf %586, %585 : vector<1x16x16xf32>
    %588 = arith.addf %583, %587 : vector<1x16x16xf32>
    %c84 = arith.constant 84 : index
    %589 = memref.load %arg2[%c84] : memref<147xf32, #tpu.memory_space<smem>>
    %590 = vector.extract_strided_slice %401 {offsets = [0, 5, 0], sizes = [1, 16, 16], strides = [1, 1, 1]} : vector<1x22x16xf32> to vector<1x16x16xf32>
    %591 = vector.broadcast %589 : f32 to vector<1x16x16xf32>
    %592 = arith.mulf %591, %590 : vector<1x16x16xf32>
    %593 = arith.addf %588, %592 : vector<1x16x16xf32>
    %c85 = arith.constant 85 : index
    %594 = memref.load %arg2[%c85] : memref<147xf32, #tpu.memory_space<smem>>
    %595 = vector.extract_strided_slice %403 {offsets = [0, 5, 0], sizes = [1, 16, 16], strides = [1, 1, 1]} : vector<1x22x16xf32> to vector<1x16x16xf32>
    %596 = vector.broadcast %594 : f32 to vector<1x16x16xf32>
    %597 = arith.mulf %596, %595 : vector<1x16x16xf32>
    %598 = arith.addf %593, %597 : vector<1x16x16xf32>
    %c86 = arith.constant 86 : index
    %599 = memref.load %arg2[%c86] : memref<147xf32, #tpu.memory_space<smem>>
    %600 = vector.extract_strided_slice %405 {offsets = [0, 5, 0], sizes = [1, 16, 16], strides = [1, 1, 1]} : vector<1x22x16xf32> to vector<1x16x16xf32>
    %601 = vector.broadcast %599 : f32 to vector<1x16x16xf32>
    %602 = arith.mulf %601, %600 : vector<1x16x16xf32>
    %603 = arith.addf %598, %602 : vector<1x16x16xf32>
    %c87 = arith.constant 87 : index
    %604 = memref.load %arg2[%c87] : memref<147xf32, #tpu.memory_space<smem>>
    %605 = vector.extract_strided_slice %407 {offsets = [0, 5, 0], sizes = [1, 16, 16], strides = [1, 1, 1]} : vector<1x22x16xf32> to vector<1x16x16xf32>
    %606 = vector.broadcast %604 : f32 to vector<1x16x16xf32>
    %607 = arith.mulf %606, %605 : vector<1x16x16xf32>
    %608 = arith.addf %603, %607 : vector<1x16x16xf32>
    %c88 = arith.constant 88 : index
    %609 = memref.load %arg2[%c88] : memref<147xf32, #tpu.memory_space<smem>>
    %610 = vector.extract_strided_slice %409 {offsets = [0, 5, 0], sizes = [1, 16, 16], strides = [1, 1, 1]} : vector<1x22x16xf32> to vector<1x16x16xf32>
    %611 = vector.broadcast %609 : f32 to vector<1x16x16xf32>
    %612 = arith.mulf %611, %610 : vector<1x16x16xf32>
    %613 = arith.addf %608, %612 : vector<1x16x16xf32>
    %c89 = arith.constant 89 : index
    %614 = memref.load %arg2[%c89] : memref<147xf32, #tpu.memory_space<smem>>
    %615 = vector.extract_strided_slice %411 {offsets = [0, 5, 0], sizes = [1, 16, 16], strides = [1, 1, 1]} : vector<1x22x16xf32> to vector<1x16x16xf32>
    %616 = vector.broadcast %614 : f32 to vector<1x16x16xf32>
    %617 = arith.mulf %616, %615 : vector<1x16x16xf32>
    %618 = arith.addf %613, %617 : vector<1x16x16xf32>
    %c90 = arith.constant 90 : index
    %619 = memref.load %arg2[%c90] : memref<147xf32, #tpu.memory_space<smem>>
    %620 = vector.extract_strided_slice %413 {offsets = [0, 5, 0], sizes = [1, 16, 16], strides = [1, 1, 1]} : vector<1x22x16xf32> to vector<1x16x16xf32>
    %621 = vector.broadcast %619 : f32 to vector<1x16x16xf32>
    %622 = arith.mulf %621, %620 : vector<1x16x16xf32>
    %623 = arith.addf %618, %622 : vector<1x16x16xf32>
    %c91 = arith.constant 91 : index
    %624 = memref.load %arg2[%c91] : memref<147xf32, #tpu.memory_space<smem>>
    %625 = vector.extract_strided_slice %401 {offsets = [0, 6, 0], sizes = [1, 16, 16], strides = [1, 1, 1]} : vector<1x22x16xf32> to vector<1x16x16xf32>
    %626 = vector.broadcast %624 : f32 to vector<1x16x16xf32>
    %627 = arith.mulf %626, %625 : vector<1x16x16xf32>
    %628 = arith.addf %623, %627 : vector<1x16x16xf32>
    %c92 = arith.constant 92 : index
    %629 = memref.load %arg2[%c92] : memref<147xf32, #tpu.memory_space<smem>>
    %630 = vector.extract_strided_slice %403 {offsets = [0, 6, 0], sizes = [1, 16, 16], strides = [1, 1, 1]} : vector<1x22x16xf32> to vector<1x16x16xf32>
    %631 = vector.broadcast %629 : f32 to vector<1x16x16xf32>
    %632 = arith.mulf %631, %630 : vector<1x16x16xf32>
    %633 = arith.addf %628, %632 : vector<1x16x16xf32>
    %c93 = arith.constant 93 : index
    %634 = memref.load %arg2[%c93] : memref<147xf32, #tpu.memory_space<smem>>
    %635 = vector.extract_strided_slice %405 {offsets = [0, 6, 0], sizes = [1, 16, 16], strides = [1, 1, 1]} : vector<1x22x16xf32> to vector<1x16x16xf32>
    %636 = vector.broadcast %634 : f32 to vector<1x16x16xf32>
    %637 = arith.mulf %636, %635 : vector<1x16x16xf32>
    %638 = arith.addf %633, %637 : vector<1x16x16xf32>
    %c94 = arith.constant 94 : index
    %639 = memref.load %arg2[%c94] : memref<147xf32, #tpu.memory_space<smem>>
    %640 = vector.extract_strided_slice %407 {offsets = [0, 6, 0], sizes = [1, 16, 16], strides = [1, 1, 1]} : vector<1x22x16xf32> to vector<1x16x16xf32>
    %641 = vector.broadcast %639 : f32 to vector<1x16x16xf32>
    %642 = arith.mulf %641, %640 : vector<1x16x16xf32>
    %643 = arith.addf %638, %642 : vector<1x16x16xf32>
    %c95 = arith.constant 95 : index
    %644 = memref.load %arg2[%c95] : memref<147xf32, #tpu.memory_space<smem>>
    %645 = vector.extract_strided_slice %409 {offsets = [0, 6, 0], sizes = [1, 16, 16], strides = [1, 1, 1]} : vector<1x22x16xf32> to vector<1x16x16xf32>
    %646 = vector.broadcast %644 : f32 to vector<1x16x16xf32>
    %647 = arith.mulf %646, %645 : vector<1x16x16xf32>
    %648 = arith.addf %643, %647 : vector<1x16x16xf32>
    %c96 = arith.constant 96 : index
    %649 = memref.load %arg2[%c96] : memref<147xf32, #tpu.memory_space<smem>>
    %650 = vector.extract_strided_slice %411 {offsets = [0, 6, 0], sizes = [1, 16, 16], strides = [1, 1, 1]} : vector<1x22x16xf32> to vector<1x16x16xf32>
    %651 = vector.broadcast %649 : f32 to vector<1x16x16xf32>
    %652 = arith.mulf %651, %650 : vector<1x16x16xf32>
    %653 = arith.addf %648, %652 : vector<1x16x16xf32>
    %c97 = arith.constant 97 : index
    %654 = memref.load %arg2[%c97] : memref<147xf32, #tpu.memory_space<smem>>
    %655 = vector.extract_strided_slice %413 {offsets = [0, 6, 0], sizes = [1, 16, 16], strides = [1, 1, 1]} : vector<1x22x16xf32> to vector<1x16x16xf32>
    %656 = vector.broadcast %654 : f32 to vector<1x16x16xf32>
    %657 = arith.mulf %656, %655 : vector<1x16x16xf32>
    %658 = arith.addf %653, %657 : vector<1x16x16xf32>
    %c2_203 = arith.constant 2 : index
    %c0_204 = arith.constant 0 : index
    %c0_205 = arith.constant 0 : index
    %c0_206 = arith.constant 0 : index
    %659 = vector.load %arg6[%c2_203, %c0_204, %c0_205, %c0_206] : memref<3x1x24x128xf32, #tpu.memory_space<vmem>>, vector<1x1x22x16xf32>
    %660 = vector.shape_cast %659 : vector<1x1x22x16xf32> to vector<1x22x16xf32>
    %c2_207 = arith.constant 2 : index
    %c0_208 = arith.constant 0 : index
    %c0_209 = arith.constant 0 : index
    %c1_210 = arith.constant 1 : index
    %661 = vector.load %arg6[%c2_207, %c0_208, %c0_209, %c1_210] : memref<3x1x24x128xf32, #tpu.memory_space<vmem>>, vector<1x1x22x16xf32>
    %662 = vector.shape_cast %661 : vector<1x1x22x16xf32> to vector<1x22x16xf32>
    %c2_211 = arith.constant 2 : index
    %c0_212 = arith.constant 0 : index
    %c0_213 = arith.constant 0 : index
    %c2_214 = arith.constant 2 : index
    %663 = vector.load %arg6[%c2_211, %c0_212, %c0_213, %c2_214] : memref<3x1x24x128xf32, #tpu.memory_space<vmem>>, vector<1x1x22x16xf32>
    %664 = vector.shape_cast %663 : vector<1x1x22x16xf32> to vector<1x22x16xf32>
    %c2_215 = arith.constant 2 : index
    %c0_216 = arith.constant 0 : index
    %c0_217 = arith.constant 0 : index
    %c3_218 = arith.constant 3 : index
    %665 = vector.load %arg6[%c2_215, %c0_216, %c0_217, %c3_218] : memref<3x1x24x128xf32, #tpu.memory_space<vmem>>, vector<1x1x22x16xf32>
    %666 = vector.shape_cast %665 : vector<1x1x22x16xf32> to vector<1x22x16xf32>
    %c2_219 = arith.constant 2 : index
    %c0_220 = arith.constant 0 : index
    %c0_221 = arith.constant 0 : index
    %c4_222 = arith.constant 4 : index
    %667 = vector.load %arg6[%c2_219, %c0_220, %c0_221, %c4_222] : memref<3x1x24x128xf32, #tpu.memory_space<vmem>>, vector<1x1x22x16xf32>
    %668 = vector.shape_cast %667 : vector<1x1x22x16xf32> to vector<1x22x16xf32>
    %c2_223 = arith.constant 2 : index
    %c0_224 = arith.constant 0 : index
    %c0_225 = arith.constant 0 : index
    %c5_226 = arith.constant 5 : index
    %669 = vector.load %arg6[%c2_223, %c0_224, %c0_225, %c5_226] : memref<3x1x24x128xf32, #tpu.memory_space<vmem>>, vector<1x1x22x16xf32>
    %670 = vector.shape_cast %669 : vector<1x1x22x16xf32> to vector<1x22x16xf32>
    %c2_227 = arith.constant 2 : index
    %c0_228 = arith.constant 0 : index
    %c0_229 = arith.constant 0 : index
    %c6_230 = arith.constant 6 : index
    %671 = vector.load %arg6[%c2_227, %c0_228, %c0_229, %c6_230] : memref<3x1x24x128xf32, #tpu.memory_space<vmem>>, vector<1x1x22x16xf32>
    %672 = vector.shape_cast %671 : vector<1x1x22x16xf32> to vector<1x22x16xf32>
    %c98 = arith.constant 98 : index
    %673 = memref.load %arg2[%c98] : memref<147xf32, #tpu.memory_space<smem>>
    %674 = vector.extract_strided_slice %660 {offsets = [0, 0, 0], sizes = [1, 16, 16], strides = [1, 1, 1]} : vector<1x22x16xf32> to vector<1x16x16xf32>
    %675 = vector.broadcast %673 : f32 to vector<1x16x16xf32>
    %676 = arith.mulf %675, %674 : vector<1x16x16xf32>
    %677 = arith.addf %658, %676 : vector<1x16x16xf32>
    %c99 = arith.constant 99 : index
    %678 = memref.load %arg2[%c99] : memref<147xf32, #tpu.memory_space<smem>>
    %679 = vector.extract_strided_slice %662 {offsets = [0, 0, 0], sizes = [1, 16, 16], strides = [1, 1, 1]} : vector<1x22x16xf32> to vector<1x16x16xf32>
    %680 = vector.broadcast %678 : f32 to vector<1x16x16xf32>
    %681 = arith.mulf %680, %679 : vector<1x16x16xf32>
    %682 = arith.addf %677, %681 : vector<1x16x16xf32>
    %c100 = arith.constant 100 : index
    %683 = memref.load %arg2[%c100] : memref<147xf32, #tpu.memory_space<smem>>
    %684 = vector.extract_strided_slice %664 {offsets = [0, 0, 0], sizes = [1, 16, 16], strides = [1, 1, 1]} : vector<1x22x16xf32> to vector<1x16x16xf32>
    %685 = vector.broadcast %683 : f32 to vector<1x16x16xf32>
    %686 = arith.mulf %685, %684 : vector<1x16x16xf32>
    %687 = arith.addf %682, %686 : vector<1x16x16xf32>
    %c101 = arith.constant 101 : index
    %688 = memref.load %arg2[%c101] : memref<147xf32, #tpu.memory_space<smem>>
    %689 = vector.extract_strided_slice %666 {offsets = [0, 0, 0], sizes = [1, 16, 16], strides = [1, 1, 1]} : vector<1x22x16xf32> to vector<1x16x16xf32>
    %690 = vector.broadcast %688 : f32 to vector<1x16x16xf32>
    %691 = arith.mulf %690, %689 : vector<1x16x16xf32>
    %692 = arith.addf %687, %691 : vector<1x16x16xf32>
    %c102 = arith.constant 102 : index
    %693 = memref.load %arg2[%c102] : memref<147xf32, #tpu.memory_space<smem>>
    %694 = vector.extract_strided_slice %668 {offsets = [0, 0, 0], sizes = [1, 16, 16], strides = [1, 1, 1]} : vector<1x22x16xf32> to vector<1x16x16xf32>
    %695 = vector.broadcast %693 : f32 to vector<1x16x16xf32>
    %696 = arith.mulf %695, %694 : vector<1x16x16xf32>
    %697 = arith.addf %692, %696 : vector<1x16x16xf32>
    %c103 = arith.constant 103 : index
    %698 = memref.load %arg2[%c103] : memref<147xf32, #tpu.memory_space<smem>>
    %699 = vector.extract_strided_slice %670 {offsets = [0, 0, 0], sizes = [1, 16, 16], strides = [1, 1, 1]} : vector<1x22x16xf32> to vector<1x16x16xf32>
    %700 = vector.broadcast %698 : f32 to vector<1x16x16xf32>
    %701 = arith.mulf %700, %699 : vector<1x16x16xf32>
    %702 = arith.addf %697, %701 : vector<1x16x16xf32>
    %c104 = arith.constant 104 : index
    %703 = memref.load %arg2[%c104] : memref<147xf32, #tpu.memory_space<smem>>
    %704 = vector.extract_strided_slice %672 {offsets = [0, 0, 0], sizes = [1, 16, 16], strides = [1, 1, 1]} : vector<1x22x16xf32> to vector<1x16x16xf32>
    %705 = vector.broadcast %703 : f32 to vector<1x16x16xf32>
    %706 = arith.mulf %705, %704 : vector<1x16x16xf32>
    %707 = arith.addf %702, %706 : vector<1x16x16xf32>
    %c105 = arith.constant 105 : index
    %708 = memref.load %arg2[%c105] : memref<147xf32, #tpu.memory_space<smem>>
    %709 = vector.extract_strided_slice %660 {offsets = [0, 1, 0], sizes = [1, 16, 16], strides = [1, 1, 1]} : vector<1x22x16xf32> to vector<1x16x16xf32>
    %710 = vector.broadcast %708 : f32 to vector<1x16x16xf32>
    %711 = arith.mulf %710, %709 : vector<1x16x16xf32>
    %712 = arith.addf %707, %711 : vector<1x16x16xf32>
    %c106 = arith.constant 106 : index
    %713 = memref.load %arg2[%c106] : memref<147xf32, #tpu.memory_space<smem>>
    %714 = vector.extract_strided_slice %662 {offsets = [0, 1, 0], sizes = [1, 16, 16], strides = [1, 1, 1]} : vector<1x22x16xf32> to vector<1x16x16xf32>
    %715 = vector.broadcast %713 : f32 to vector<1x16x16xf32>
    %716 = arith.mulf %715, %714 : vector<1x16x16xf32>
    %717 = arith.addf %712, %716 : vector<1x16x16xf32>
    %c107 = arith.constant 107 : index
    %718 = memref.load %arg2[%c107] : memref<147xf32, #tpu.memory_space<smem>>
    %719 = vector.extract_strided_slice %664 {offsets = [0, 1, 0], sizes = [1, 16, 16], strides = [1, 1, 1]} : vector<1x22x16xf32> to vector<1x16x16xf32>
    %720 = vector.broadcast %718 : f32 to vector<1x16x16xf32>
    %721 = arith.mulf %720, %719 : vector<1x16x16xf32>
    %722 = arith.addf %717, %721 : vector<1x16x16xf32>
    %c108 = arith.constant 108 : index
    %723 = memref.load %arg2[%c108] : memref<147xf32, #tpu.memory_space<smem>>
    %724 = vector.extract_strided_slice %666 {offsets = [0, 1, 0], sizes = [1, 16, 16], strides = [1, 1, 1]} : vector<1x22x16xf32> to vector<1x16x16xf32>
    %725 = vector.broadcast %723 : f32 to vector<1x16x16xf32>
    %726 = arith.mulf %725, %724 : vector<1x16x16xf32>
    %727 = arith.addf %722, %726 : vector<1x16x16xf32>
    %c109 = arith.constant 109 : index
    %728 = memref.load %arg2[%c109] : memref<147xf32, #tpu.memory_space<smem>>
    %729 = vector.extract_strided_slice %668 {offsets = [0, 1, 0], sizes = [1, 16, 16], strides = [1, 1, 1]} : vector<1x22x16xf32> to vector<1x16x16xf32>
    %730 = vector.broadcast %728 : f32 to vector<1x16x16xf32>
    %731 = arith.mulf %730, %729 : vector<1x16x16xf32>
    %732 = arith.addf %727, %731 : vector<1x16x16xf32>
    %c110 = arith.constant 110 : index
    %733 = memref.load %arg2[%c110] : memref<147xf32, #tpu.memory_space<smem>>
    %734 = vector.extract_strided_slice %670 {offsets = [0, 1, 0], sizes = [1, 16, 16], strides = [1, 1, 1]} : vector<1x22x16xf32> to vector<1x16x16xf32>
    %735 = vector.broadcast %733 : f32 to vector<1x16x16xf32>
    %736 = arith.mulf %735, %734 : vector<1x16x16xf32>
    %737 = arith.addf %732, %736 : vector<1x16x16xf32>
    %c111 = arith.constant 111 : index
    %738 = memref.load %arg2[%c111] : memref<147xf32, #tpu.memory_space<smem>>
    %739 = vector.extract_strided_slice %672 {offsets = [0, 1, 0], sizes = [1, 16, 16], strides = [1, 1, 1]} : vector<1x22x16xf32> to vector<1x16x16xf32>
    %740 = vector.broadcast %738 : f32 to vector<1x16x16xf32>
    %741 = arith.mulf %740, %739 : vector<1x16x16xf32>
    %742 = arith.addf %737, %741 : vector<1x16x16xf32>
    %c112 = arith.constant 112 : index
    %743 = memref.load %arg2[%c112] : memref<147xf32, #tpu.memory_space<smem>>
    %744 = vector.extract_strided_slice %660 {offsets = [0, 2, 0], sizes = [1, 16, 16], strides = [1, 1, 1]} : vector<1x22x16xf32> to vector<1x16x16xf32>
    %745 = vector.broadcast %743 : f32 to vector<1x16x16xf32>
    %746 = arith.mulf %745, %744 : vector<1x16x16xf32>
    %747 = arith.addf %742, %746 : vector<1x16x16xf32>
    %c113 = arith.constant 113 : index
    %748 = memref.load %arg2[%c113] : memref<147xf32, #tpu.memory_space<smem>>
    %749 = vector.extract_strided_slice %662 {offsets = [0, 2, 0], sizes = [1, 16, 16], strides = [1, 1, 1]} : vector<1x22x16xf32> to vector<1x16x16xf32>
    %750 = vector.broadcast %748 : f32 to vector<1x16x16xf32>
    %751 = arith.mulf %750, %749 : vector<1x16x16xf32>
    %752 = arith.addf %747, %751 : vector<1x16x16xf32>
    %c114 = arith.constant 114 : index
    %753 = memref.load %arg2[%c114] : memref<147xf32, #tpu.memory_space<smem>>
    %754 = vector.extract_strided_slice %664 {offsets = [0, 2, 0], sizes = [1, 16, 16], strides = [1, 1, 1]} : vector<1x22x16xf32> to vector<1x16x16xf32>
    %755 = vector.broadcast %753 : f32 to vector<1x16x16xf32>
    %756 = arith.mulf %755, %754 : vector<1x16x16xf32>
    %757 = arith.addf %752, %756 : vector<1x16x16xf32>
    %c115 = arith.constant 115 : index
    %758 = memref.load %arg2[%c115] : memref<147xf32, #tpu.memory_space<smem>>
    %759 = vector.extract_strided_slice %666 {offsets = [0, 2, 0], sizes = [1, 16, 16], strides = [1, 1, 1]} : vector<1x22x16xf32> to vector<1x16x16xf32>
    %760 = vector.broadcast %758 : f32 to vector<1x16x16xf32>
    %761 = arith.mulf %760, %759 : vector<1x16x16xf32>
    %762 = arith.addf %757, %761 : vector<1x16x16xf32>
    %c116 = arith.constant 116 : index
    %763 = memref.load %arg2[%c116] : memref<147xf32, #tpu.memory_space<smem>>
    %764 = vector.extract_strided_slice %668 {offsets = [0, 2, 0], sizes = [1, 16, 16], strides = [1, 1, 1]} : vector<1x22x16xf32> to vector<1x16x16xf32>
    %765 = vector.broadcast %763 : f32 to vector<1x16x16xf32>
    %766 = arith.mulf %765, %764 : vector<1x16x16xf32>
    %767 = arith.addf %762, %766 : vector<1x16x16xf32>
    %c117 = arith.constant 117 : index
    %768 = memref.load %arg2[%c117] : memref<147xf32, #tpu.memory_space<smem>>
    %769 = vector.extract_strided_slice %670 {offsets = [0, 2, 0], sizes = [1, 16, 16], strides = [1, 1, 1]} : vector<1x22x16xf32> to vector<1x16x16xf32>
    %770 = vector.broadcast %768 : f32 to vector<1x16x16xf32>
    %771 = arith.mulf %770, %769 : vector<1x16x16xf32>
    %772 = arith.addf %767, %771 : vector<1x16x16xf32>
    %c118 = arith.constant 118 : index
    %773 = memref.load %arg2[%c118] : memref<147xf32, #tpu.memory_space<smem>>
    %774 = vector.extract_strided_slice %672 {offsets = [0, 2, 0], sizes = [1, 16, 16], strides = [1, 1, 1]} : vector<1x22x16xf32> to vector<1x16x16xf32>
    %775 = vector.broadcast %773 : f32 to vector<1x16x16xf32>
    %776 = arith.mulf %775, %774 : vector<1x16x16xf32>
    %777 = arith.addf %772, %776 : vector<1x16x16xf32>
    %c119 = arith.constant 119 : index
    %778 = memref.load %arg2[%c119] : memref<147xf32, #tpu.memory_space<smem>>
    %779 = vector.extract_strided_slice %660 {offsets = [0, 3, 0], sizes = [1, 16, 16], strides = [1, 1, 1]} : vector<1x22x16xf32> to vector<1x16x16xf32>
    %780 = vector.broadcast %778 : f32 to vector<1x16x16xf32>
    %781 = arith.mulf %780, %779 : vector<1x16x16xf32>
    %782 = arith.addf %777, %781 : vector<1x16x16xf32>
    %c120 = arith.constant 120 : index
    %783 = memref.load %arg2[%c120] : memref<147xf32, #tpu.memory_space<smem>>
    %784 = vector.extract_strided_slice %662 {offsets = [0, 3, 0], sizes = [1, 16, 16], strides = [1, 1, 1]} : vector<1x22x16xf32> to vector<1x16x16xf32>
    %785 = vector.broadcast %783 : f32 to vector<1x16x16xf32>
    %786 = arith.mulf %785, %784 : vector<1x16x16xf32>
    %787 = arith.addf %782, %786 : vector<1x16x16xf32>
    %c121 = arith.constant 121 : index
    %788 = memref.load %arg2[%c121] : memref<147xf32, #tpu.memory_space<smem>>
    %789 = vector.extract_strided_slice %664 {offsets = [0, 3, 0], sizes = [1, 16, 16], strides = [1, 1, 1]} : vector<1x22x16xf32> to vector<1x16x16xf32>
    %790 = vector.broadcast %788 : f32 to vector<1x16x16xf32>
    %791 = arith.mulf %790, %789 : vector<1x16x16xf32>
    %792 = arith.addf %787, %791 : vector<1x16x16xf32>
    %c122 = arith.constant 122 : index
    %793 = memref.load %arg2[%c122] : memref<147xf32, #tpu.memory_space<smem>>
    %794 = vector.extract_strided_slice %666 {offsets = [0, 3, 0], sizes = [1, 16, 16], strides = [1, 1, 1]} : vector<1x22x16xf32> to vector<1x16x16xf32>
    %795 = vector.broadcast %793 : f32 to vector<1x16x16xf32>
    %796 = arith.mulf %795, %794 : vector<1x16x16xf32>
    %797 = arith.addf %792, %796 : vector<1x16x16xf32>
    %c123 = arith.constant 123 : index
    %798 = memref.load %arg2[%c123] : memref<147xf32, #tpu.memory_space<smem>>
    %799 = vector.extract_strided_slice %668 {offsets = [0, 3, 0], sizes = [1, 16, 16], strides = [1, 1, 1]} : vector<1x22x16xf32> to vector<1x16x16xf32>
    %800 = vector.broadcast %798 : f32 to vector<1x16x16xf32>
    %801 = arith.mulf %800, %799 : vector<1x16x16xf32>
    %802 = arith.addf %797, %801 : vector<1x16x16xf32>
    %c124 = arith.constant 124 : index
    %803 = memref.load %arg2[%c124] : memref<147xf32, #tpu.memory_space<smem>>
    %804 = vector.extract_strided_slice %670 {offsets = [0, 3, 0], sizes = [1, 16, 16], strides = [1, 1, 1]} : vector<1x22x16xf32> to vector<1x16x16xf32>
    %805 = vector.broadcast %803 : f32 to vector<1x16x16xf32>
    %806 = arith.mulf %805, %804 : vector<1x16x16xf32>
    %807 = arith.addf %802, %806 : vector<1x16x16xf32>
    %c125 = arith.constant 125 : index
    %808 = memref.load %arg2[%c125] : memref<147xf32, #tpu.memory_space<smem>>
    %809 = vector.extract_strided_slice %672 {offsets = [0, 3, 0], sizes = [1, 16, 16], strides = [1, 1, 1]} : vector<1x22x16xf32> to vector<1x16x16xf32>
    %810 = vector.broadcast %808 : f32 to vector<1x16x16xf32>
    %811 = arith.mulf %810, %809 : vector<1x16x16xf32>
    %812 = arith.addf %807, %811 : vector<1x16x16xf32>
    %c126 = arith.constant 126 : index
    %813 = memref.load %arg2[%c126] : memref<147xf32, #tpu.memory_space<smem>>
    %814 = vector.extract_strided_slice %660 {offsets = [0, 4, 0], sizes = [1, 16, 16], strides = [1, 1, 1]} : vector<1x22x16xf32> to vector<1x16x16xf32>
    %815 = vector.broadcast %813 : f32 to vector<1x16x16xf32>
    %816 = arith.mulf %815, %814 : vector<1x16x16xf32>
    %817 = arith.addf %812, %816 : vector<1x16x16xf32>
    %c127 = arith.constant 127 : index
    %818 = memref.load %arg2[%c127] : memref<147xf32, #tpu.memory_space<smem>>
    %819 = vector.extract_strided_slice %662 {offsets = [0, 4, 0], sizes = [1, 16, 16], strides = [1, 1, 1]} : vector<1x22x16xf32> to vector<1x16x16xf32>
    %820 = vector.broadcast %818 : f32 to vector<1x16x16xf32>
    %821 = arith.mulf %820, %819 : vector<1x16x16xf32>
    %822 = arith.addf %817, %821 : vector<1x16x16xf32>
    %c128 = arith.constant 128 : index
    %823 = memref.load %arg2[%c128] : memref<147xf32, #tpu.memory_space<smem>>
    %824 = vector.extract_strided_slice %664 {offsets = [0, 4, 0], sizes = [1, 16, 16], strides = [1, 1, 1]} : vector<1x22x16xf32> to vector<1x16x16xf32>
    %825 = vector.broadcast %823 : f32 to vector<1x16x16xf32>
    %826 = arith.mulf %825, %824 : vector<1x16x16xf32>
    %827 = arith.addf %822, %826 : vector<1x16x16xf32>
    %c129 = arith.constant 129 : index
    %828 = memref.load %arg2[%c129] : memref<147xf32, #tpu.memory_space<smem>>
    %829 = vector.extract_strided_slice %666 {offsets = [0, 4, 0], sizes = [1, 16, 16], strides = [1, 1, 1]} : vector<1x22x16xf32> to vector<1x16x16xf32>
    %830 = vector.broadcast %828 : f32 to vector<1x16x16xf32>
    %831 = arith.mulf %830, %829 : vector<1x16x16xf32>
    %832 = arith.addf %827, %831 : vector<1x16x16xf32>
    %c130 = arith.constant 130 : index
    %833 = memref.load %arg2[%c130] : memref<147xf32, #tpu.memory_space<smem>>
    %834 = vector.extract_strided_slice %668 {offsets = [0, 4, 0], sizes = [1, 16, 16], strides = [1, 1, 1]} : vector<1x22x16xf32> to vector<1x16x16xf32>
    %835 = vector.broadcast %833 : f32 to vector<1x16x16xf32>
    %836 = arith.mulf %835, %834 : vector<1x16x16xf32>
    %837 = arith.addf %832, %836 : vector<1x16x16xf32>
    %c131 = arith.constant 131 : index
    %838 = memref.load %arg2[%c131] : memref<147xf32, #tpu.memory_space<smem>>
    %839 = vector.extract_strided_slice %670 {offsets = [0, 4, 0], sizes = [1, 16, 16], strides = [1, 1, 1]} : vector<1x22x16xf32> to vector<1x16x16xf32>
    %840 = vector.broadcast %838 : f32 to vector<1x16x16xf32>
    %841 = arith.mulf %840, %839 : vector<1x16x16xf32>
    %842 = arith.addf %837, %841 : vector<1x16x16xf32>
    %c132 = arith.constant 132 : index
    %843 = memref.load %arg2[%c132] : memref<147xf32, #tpu.memory_space<smem>>
    %844 = vector.extract_strided_slice %672 {offsets = [0, 4, 0], sizes = [1, 16, 16], strides = [1, 1, 1]} : vector<1x22x16xf32> to vector<1x16x16xf32>
    %845 = vector.broadcast %843 : f32 to vector<1x16x16xf32>
    %846 = arith.mulf %845, %844 : vector<1x16x16xf32>
    %847 = arith.addf %842, %846 : vector<1x16x16xf32>
    %c133 = arith.constant 133 : index
    %848 = memref.load %arg2[%c133] : memref<147xf32, #tpu.memory_space<smem>>
    %849 = vector.extract_strided_slice %660 {offsets = [0, 5, 0], sizes = [1, 16, 16], strides = [1, 1, 1]} : vector<1x22x16xf32> to vector<1x16x16xf32>
    %850 = vector.broadcast %848 : f32 to vector<1x16x16xf32>
    %851 = arith.mulf %850, %849 : vector<1x16x16xf32>
    %852 = arith.addf %847, %851 : vector<1x16x16xf32>
    %c134 = arith.constant 134 : index
    %853 = memref.load %arg2[%c134] : memref<147xf32, #tpu.memory_space<smem>>
    %854 = vector.extract_strided_slice %662 {offsets = [0, 5, 0], sizes = [1, 16, 16], strides = [1, 1, 1]} : vector<1x22x16xf32> to vector<1x16x16xf32>
    %855 = vector.broadcast %853 : f32 to vector<1x16x16xf32>
    %856 = arith.mulf %855, %854 : vector<1x16x16xf32>
    %857 = arith.addf %852, %856 : vector<1x16x16xf32>
    %c135 = arith.constant 135 : index
    %858 = memref.load %arg2[%c135] : memref<147xf32, #tpu.memory_space<smem>>
    %859 = vector.extract_strided_slice %664 {offsets = [0, 5, 0], sizes = [1, 16, 16], strides = [1, 1, 1]} : vector<1x22x16xf32> to vector<1x16x16xf32>
    %860 = vector.broadcast %858 : f32 to vector<1x16x16xf32>
    %861 = arith.mulf %860, %859 : vector<1x16x16xf32>
    %862 = arith.addf %857, %861 : vector<1x16x16xf32>
    %c136 = arith.constant 136 : index
    %863 = memref.load %arg2[%c136] : memref<147xf32, #tpu.memory_space<smem>>
    %864 = vector.extract_strided_slice %666 {offsets = [0, 5, 0], sizes = [1, 16, 16], strides = [1, 1, 1]} : vector<1x22x16xf32> to vector<1x16x16xf32>
    %865 = vector.broadcast %863 : f32 to vector<1x16x16xf32>
    %866 = arith.mulf %865, %864 : vector<1x16x16xf32>
    %867 = arith.addf %862, %866 : vector<1x16x16xf32>
    %c137 = arith.constant 137 : index
    %868 = memref.load %arg2[%c137] : memref<147xf32, #tpu.memory_space<smem>>
    %869 = vector.extract_strided_slice %668 {offsets = [0, 5, 0], sizes = [1, 16, 16], strides = [1, 1, 1]} : vector<1x22x16xf32> to vector<1x16x16xf32>
    %870 = vector.broadcast %868 : f32 to vector<1x16x16xf32>
    %871 = arith.mulf %870, %869 : vector<1x16x16xf32>
    %872 = arith.addf %867, %871 : vector<1x16x16xf32>
    %c138 = arith.constant 138 : index
    %873 = memref.load %arg2[%c138] : memref<147xf32, #tpu.memory_space<smem>>
    %874 = vector.extract_strided_slice %670 {offsets = [0, 5, 0], sizes = [1, 16, 16], strides = [1, 1, 1]} : vector<1x22x16xf32> to vector<1x16x16xf32>
    %875 = vector.broadcast %873 : f32 to vector<1x16x16xf32>
    %876 = arith.mulf %875, %874 : vector<1x16x16xf32>
    %877 = arith.addf %872, %876 : vector<1x16x16xf32>
    %c139 = arith.constant 139 : index
    %878 = memref.load %arg2[%c139] : memref<147xf32, #tpu.memory_space<smem>>
    %879 = vector.extract_strided_slice %672 {offsets = [0, 5, 0], sizes = [1, 16, 16], strides = [1, 1, 1]} : vector<1x22x16xf32> to vector<1x16x16xf32>
    %880 = vector.broadcast %878 : f32 to vector<1x16x16xf32>
    %881 = arith.mulf %880, %879 : vector<1x16x16xf32>
    %882 = arith.addf %877, %881 : vector<1x16x16xf32>
    %c140 = arith.constant 140 : index
    %883 = memref.load %arg2[%c140] : memref<147xf32, #tpu.memory_space<smem>>
    %884 = vector.extract_strided_slice %660 {offsets = [0, 6, 0], sizes = [1, 16, 16], strides = [1, 1, 1]} : vector<1x22x16xf32> to vector<1x16x16xf32>
    %885 = vector.broadcast %883 : f32 to vector<1x16x16xf32>
    %886 = arith.mulf %885, %884 : vector<1x16x16xf32>
    %887 = arith.addf %882, %886 : vector<1x16x16xf32>
    %c141 = arith.constant 141 : index
    %888 = memref.load %arg2[%c141] : memref<147xf32, #tpu.memory_space<smem>>
    %889 = vector.extract_strided_slice %662 {offsets = [0, 6, 0], sizes = [1, 16, 16], strides = [1, 1, 1]} : vector<1x22x16xf32> to vector<1x16x16xf32>
    %890 = vector.broadcast %888 : f32 to vector<1x16x16xf32>
    %891 = arith.mulf %890, %889 : vector<1x16x16xf32>
    %892 = arith.addf %887, %891 : vector<1x16x16xf32>
    %c142 = arith.constant 142 : index
    %893 = memref.load %arg2[%c142] : memref<147xf32, #tpu.memory_space<smem>>
    %894 = vector.extract_strided_slice %664 {offsets = [0, 6, 0], sizes = [1, 16, 16], strides = [1, 1, 1]} : vector<1x22x16xf32> to vector<1x16x16xf32>
    %895 = vector.broadcast %893 : f32 to vector<1x16x16xf32>
    %896 = arith.mulf %895, %894 : vector<1x16x16xf32>
    %897 = arith.addf %892, %896 : vector<1x16x16xf32>
    %c143 = arith.constant 143 : index
    %898 = memref.load %arg2[%c143] : memref<147xf32, #tpu.memory_space<smem>>
    %899 = vector.extract_strided_slice %666 {offsets = [0, 6, 0], sizes = [1, 16, 16], strides = [1, 1, 1]} : vector<1x22x16xf32> to vector<1x16x16xf32>
    %900 = vector.broadcast %898 : f32 to vector<1x16x16xf32>
    %901 = arith.mulf %900, %899 : vector<1x16x16xf32>
    %902 = arith.addf %897, %901 : vector<1x16x16xf32>
    %c144 = arith.constant 144 : index
    %903 = memref.load %arg2[%c144] : memref<147xf32, #tpu.memory_space<smem>>
    %904 = vector.extract_strided_slice %668 {offsets = [0, 6, 0], sizes = [1, 16, 16], strides = [1, 1, 1]} : vector<1x22x16xf32> to vector<1x16x16xf32>
    %905 = vector.broadcast %903 : f32 to vector<1x16x16xf32>
    %906 = arith.mulf %905, %904 : vector<1x16x16xf32>
    %907 = arith.addf %902, %906 : vector<1x16x16xf32>
    %c145 = arith.constant 145 : index
    %908 = memref.load %arg2[%c145] : memref<147xf32, #tpu.memory_space<smem>>
    %909 = vector.extract_strided_slice %670 {offsets = [0, 6, 0], sizes = [1, 16, 16], strides = [1, 1, 1]} : vector<1x22x16xf32> to vector<1x16x16xf32>
    %910 = vector.broadcast %908 : f32 to vector<1x16x16xf32>
    %911 = arith.mulf %910, %909 : vector<1x16x16xf32>
    %912 = arith.addf %907, %911 : vector<1x16x16xf32>
    %c146 = arith.constant 146 : index
    %913 = memref.load %arg2[%c146] : memref<147xf32, #tpu.memory_space<smem>>
    %914 = vector.extract_strided_slice %672 {offsets = [0, 6, 0], sizes = [1, 16, 16], strides = [1, 1, 1]} : vector<1x22x16xf32> to vector<1x16x16xf32>
    %915 = vector.broadcast %913 : f32 to vector<1x16x16xf32>
    %916 = arith.mulf %915, %914 : vector<1x16x16xf32>
    %917 = arith.addf %912, %916 : vector<1x16x16xf32>
    %c0_231 = arith.constant 0 : index
    %918 = memref.load %arg3[%c0_231] : memref<1xf32, #tpu.memory_space<smem>>
    %919 = vector.broadcast %918 : f32 to vector<1x16x16xf32>
    %920 = arith.addf %917, %919 : vector<1x16x16xf32>
    %921 = arith.negf %920 : vector<1x16x16xf32>
    %922 = math.exp %921 : vector<1x16x16xf32>
    %cst_232 = arith.constant 1.000000e+00 : f32
    %923 = vector.broadcast %cst_232 : f32 to vector<1x16x16xf32>
    %924 = arith.addf %923, %922 : vector<1x16x16xf32>
    %925 = arith.divf %923, %924 : vector<1x16x16xf32>
    %926 = vector.extract_strided_slice %925 {offsets = [0, 0, 0], sizes = [1, 1, 16], strides = [1, 1, 1]} : vector<1x16x16xf32> to vector<1x1x16xf32>
    %927 = vector.shape_cast %926 : vector<1x1x16xf32> to vector<1x16xf32>
    %928 = vector.extract_strided_slice %925 {offsets = [0, 1, 0], sizes = [1, 1, 16], strides = [1, 1, 1]} : vector<1x16x16xf32> to vector<1x1x16xf32>
    %929 = vector.shape_cast %928 : vector<1x1x16xf32> to vector<1x16xf32>
    %930 = vector.extract_strided_slice %925 {offsets = [0, 2, 0], sizes = [1, 1, 16], strides = [1, 1, 1]} : vector<1x16x16xf32> to vector<1x1x16xf32>
    %931 = vector.shape_cast %930 : vector<1x1x16xf32> to vector<1x16xf32>
    %932 = vector.extract_strided_slice %925 {offsets = [0, 3, 0], sizes = [1, 1, 16], strides = [1, 1, 1]} : vector<1x16x16xf32> to vector<1x1x16xf32>
    %933 = vector.shape_cast %932 : vector<1x1x16xf32> to vector<1x16xf32>
    %934 = vector.extract_strided_slice %925 {offsets = [0, 4, 0], sizes = [1, 1, 16], strides = [1, 1, 1]} : vector<1x16x16xf32> to vector<1x1x16xf32>
    %935 = vector.shape_cast %934 : vector<1x1x16xf32> to vector<1x16xf32>
    %936 = vector.extract_strided_slice %925 {offsets = [0, 5, 0], sizes = [1, 1, 16], strides = [1, 1, 1]} : vector<1x16x16xf32> to vector<1x1x16xf32>
    %937 = vector.shape_cast %936 : vector<1x1x16xf32> to vector<1x16xf32>
    %938 = vector.extract_strided_slice %925 {offsets = [0, 6, 0], sizes = [1, 1, 16], strides = [1, 1, 1]} : vector<1x16x16xf32> to vector<1x1x16xf32>
    %939 = vector.shape_cast %938 : vector<1x1x16xf32> to vector<1x16xf32>
    %940 = vector.extract_strided_slice %925 {offsets = [0, 7, 0], sizes = [1, 1, 16], strides = [1, 1, 1]} : vector<1x16x16xf32> to vector<1x1x16xf32>
    %941 = vector.shape_cast %940 : vector<1x1x16xf32> to vector<1x16xf32>
    %942 = vector.extract_strided_slice %925 {offsets = [0, 8, 0], sizes = [1, 1, 16], strides = [1, 1, 1]} : vector<1x16x16xf32> to vector<1x1x16xf32>
    %943 = vector.shape_cast %942 : vector<1x1x16xf32> to vector<1x16xf32>
    %944 = vector.extract_strided_slice %925 {offsets = [0, 9, 0], sizes = [1, 1, 16], strides = [1, 1, 1]} : vector<1x16x16xf32> to vector<1x1x16xf32>
    %945 = vector.shape_cast %944 : vector<1x1x16xf32> to vector<1x16xf32>
    %946 = vector.extract_strided_slice %925 {offsets = [0, 10, 0], sizes = [1, 1, 16], strides = [1, 1, 1]} : vector<1x16x16xf32> to vector<1x1x16xf32>
    %947 = vector.shape_cast %946 : vector<1x1x16xf32> to vector<1x16xf32>
    %948 = vector.extract_strided_slice %925 {offsets = [0, 11, 0], sizes = [1, 1, 16], strides = [1, 1, 1]} : vector<1x16x16xf32> to vector<1x1x16xf32>
    %949 = vector.shape_cast %948 : vector<1x1x16xf32> to vector<1x16xf32>
    %950 = vector.extract_strided_slice %925 {offsets = [0, 12, 0], sizes = [1, 1, 16], strides = [1, 1, 1]} : vector<1x16x16xf32> to vector<1x1x16xf32>
    %951 = vector.shape_cast %950 : vector<1x1x16xf32> to vector<1x16xf32>
    %952 = vector.extract_strided_slice %925 {offsets = [0, 13, 0], sizes = [1, 1, 16], strides = [1, 1, 1]} : vector<1x16x16xf32> to vector<1x1x16xf32>
    %953 = vector.shape_cast %952 : vector<1x1x16xf32> to vector<1x16xf32>
    %954 = vector.extract_strided_slice %925 {offsets = [0, 14, 0], sizes = [1, 1, 16], strides = [1, 1, 1]} : vector<1x16x16xf32> to vector<1x1x16xf32>
    %955 = vector.shape_cast %954 : vector<1x1x16xf32> to vector<1x16xf32>
    %956 = vector.extract_strided_slice %925 {offsets = [0, 15, 0], sizes = [1, 1, 16], strides = [1, 1, 1]} : vector<1x16x16xf32> to vector<1x1x16xf32>
    %957 = vector.shape_cast %956 : vector<1x1x16xf32> to vector<1x16xf32>
    %958 = tpu.concatenate %927, %929, %931, %933, %935, %937, %939, %941, %943, %945, %947, %949, %951, %953, %955, %957 in 1 : vector<1x16xf32>, vector<1x16xf32>, vector<1x16xf32>, vector<1x16xf32>, vector<1x16xf32>, vector<1x16xf32>, vector<1x16xf32>, vector<1x16xf32>, vector<1x16xf32>, vector<1x16xf32>, vector<1x16xf32>, vector<1x16xf32>, vector<1x16xf32>, vector<1x16xf32>, vector<1x16xf32>, vector<1x16xf32> -> vector<1x256xf32>
    %959 = vector.shape_cast %958 : vector<1x256xf32> to vector<1x1x256xf32>
    %c0_233 = arith.constant 0 : index
    %c0_234 = arith.constant 0 : index
    %c0_235 = arith.constant 0 : index
    %960 = vector.load %arg4[%c0_233, %c0_234, %c0_235] : memref<1x8x256xf32, #tpu.memory_space<vmem>>, vector<1x8x256xf32>
    %961 = vector.broadcast %959 : vector<1x1x256xf32> to vector<1x8x256xf32>
    %962 = arith.mulf %960, %961 : vector<1x8x256xf32>
    %c0_236 = arith.constant 0 : index
    %c0_237 = arith.constant 0 : index
    %c0_238 = arith.constant 0 : index
    %963 = vector.load %arg5[%c0_236, %c0_237, %c0_238] : memref<1x8x256xf32, #tpu.memory_space<vmem>>, vector<1x8x256xf32>
    tpu.vector_store %arg5[%c0_236, %c0_237, %c0_238], %962 {strides = array<i32>} : memref<1x8x256xf32, #tpu.memory_space<vmem>>, vector<1x8x256xf32>,
    return
  }
  func.func @transform_0(%arg0: i32) -> (i32, i32, i32, i32) {
    %c0_i32 = arith.constant 0 : i32
    %c0_i32_0 = arith.constant 0 : i32
    %c0_i32_1 = arith.constant 0 : i32
    %c0_i32_2 = arith.constant 0 : i32
    return %arg0, %c0_i32, %c0_i32_0, %c0_i32_1 : i32, i32, i32, i32
  }
  func.func @transform_1(%arg0: i32) -> i32 {
    %c0_i32 = arith.constant 0 : i32
    %c0_i32_0 = arith.constant 0 : i32
    return %c0_i32 : i32
  }
  func.func @transform_2(%arg0: i32) -> i32 {
    %c0_i32 = arith.constant 0 : i32
    %c0_i32_0 = arith.constant 0 : i32
    return %c0_i32 : i32
  }
  func.func @transform_3(%arg0: i32) -> (i32, i32, i32) {
    %c0_i32 = arith.constant 0 : i32
    %c0_i32_0 = arith.constant 0 : i32
    %c0_i32_1 = arith.constant 0 : i32
    return %arg0, %c0_i32, %c0_i32_0 : i32, i32, i32
  }
  func.func @transform_4(%arg0: i32) -> (i32, i32, i32) {
    %c0_i32 = arith.constant 0 : i32
    %c0_i32_0 = arith.constant 0 : i32
    %c0_i32_1 = arith.constant 0 : i32
    return %arg0, %c0_i32, %c0_i32_0 : i32, i32, i32
  }
}

</mosaic_0001>

<bundles_post_ra>
// kernel: spatial_gate.1
= control target key start
LH: loop header
LB: loop body
LE: loop exit
PB: predicated region body
PF: predicated region fallthrough
CT: control target
= control target key end

     0   :  { %s7142_s0 = inlined_call_operand.vmem [shape: f32[2,1,16,16], index: 0, kind: input, shape index: {}]   ;;  %s7143_s1 = inlined_call_operand.vmem [shape: f32[147], index: 1, kind: input, shape index: {}]   ;;  %s7144_s2 = inlined_call_operand.<no memory space> [shape: f32[1], index: 2, kind: input, shape index: {}]   ;;  %s7145_s3 = inlined_call_operand.vmem [shape: f32[2,8,256], index: 3, kind: input, shape index: {}, may-alias: {3,4}]   ;;  %s7146_s4 = inlined_call_operand.vmem [shape: f32[2,8,256], index: 4, kind: output, shape index: {}, may-alias: {3,4}]  }
   0x1   :  { %9 = sst [smem:[#allocation3]] %s7144_s2 }
   0x2   :  { %10 = vsyncpa [#allocation5], 0  ;;  %s3771_s17 = smov 0  }
   0x3 LB: > { %s3777_s18 = sadd.s32 4294967295, %s3718_s17   ;;  %p3467_p0 = scmp.ge.s32.totalorder %s3718_s17, 1  ;;  %s3718_s17 = sphi %s3771_s17, %s16_s17  }
   0x4   : > { %p141_p1 = scmp.lt.s32.totalorder %s3718_s17, 3  ;;  %s154_s2 = sshll.u32 %s7143_s1, 4  ;;  %s155_s2 = int_to_ptr.vmem [resolvable:$true] %s154_s2 }
   0x5   : > { %p3639_p3 = scmp.eq.s32.totalorder %s3777_s18, 0  ;;  %s3693_s22 = scalar_lea.vmem %s155_s2, 32 }
   0x6   : > { %p3784_p2 = pnand %p3467_p0, %p141_p1  ;;  %p3694_p6 = scmp.ne.s32.totalorder %s155_s2, %s3693_s22 }
   0x7   : > { %p3701_p10 = scmp.lt.s32.totalorder %s155_s2, %s155_s2  ;;  %p3702_p11 = scmp.lt.s32.totalorder %s3693_s22, %s3693_s22 }
   0x8   : > { %p3635_p4 = pneg %p3784_p2 }
   0x9   : > { %p3703_p12 = por %p3702_p11, %p3701_p10 }
   0xa   : > { %p3636_p5 = pnand %p3639_p3, %p3635_p4 }
   0xc   : > { %p3695_p7 = pneg %p3636_p5 }
   0xe   : > { %p3696_p8 = pnand %p3695_p7, %p3694_p6 }
  0x10   : > { %p3697_p9 = pneg %p3696_p8 }
  0x12   : > { %p3704_p13 = pnand %p3703_p12, %p3697_p9 }
  0x14   : > { %3707 = shalt.err (!%p3704_p13)
}
  0x15   : > { %s3720_s23 = smov [#allocation4]   ;;  %186 = sbr.rel (%p3784_p2) target bundleno = 1018 (0x3fa), region = 36 }
  0x16   : > { %3638 = dma.vmem_to_smem (!%p3636_p5), %s155_s2, 32, %s3720_s23, [#allocation5]  }
  0x1a   : > { %3713 = dma.done.wait (%p3639_p3), [#allocation5], 32  }
  0x1b   : > { %3715 = vsyncadd (%p3639_p3), [#allocation5], 4294967264 }
  0x1c   : > { %192 = sfence }
  0x1d   : > { %p218_p0 = scmp.lt.s32.totalorder %s3777_s18, 1  ;;  %v3721_v0 = vmov 0.0   ;;  %s3722_s28 = smov 115   ;;  %vm274_vm0 = vcmask 147480   ;;  %vm519_vm1 = vcmask 1046528   ;;  %vm415_vm2 = vcmask 154648  }
  0x1e   : > { %233 = vst [vmem:[#allocation2] sm:$0xff] %v3721_v0  ;;  %234 = vst [vmem:[#allocation2 + $0x8] sm:$0xff] %v3721_v0  ;;  %s3723_s29 = smov 3   ;;  %s3724_s30 = smov 99   ;;  %vm663_vm3 = vcmask 1045504   ;;  %vm807_vm4 = vcmask 1044480  }
  0x1f   : > { %235 = vst [vmem:[#allocation2 + $0x10] sm:$0xff] %v3721_v0  ;;  %236 = vst [vmem:[#allocation2 + $0x18] sm:$0xff] %v3721_v0  ;;  %s7257_s18 = smov (!%p218_p0, %s3777_s18), 1  ;;  %s3725_s5 = smov 83   ;;  %vm951_vm5 = vcmask 1043456   ;;  %vm1095_vm6 = vcmask 1042432  }
  0x20   : > { %237 = vst [vmem:[#allocation2 + $0x20] sm:$0xff] %v3721_v0  ;;  %238 = vst [vmem:[#allocation2 + $0x28] sm:$0xff] %v3721_v0  ;;  %s3801_s24 = sshll.u32 %s7257_s18, 4  ;;  %s3726_s6 = smov 67   ;;  %vm1239_vm7 = vcmask 1041408   ;;  %vm3351_vm8 = vcmask 130048  }
  0x21   : > { %239 = vst [vmem:[#allocation2 + $0x30] sm:$0xff] %v3721_v0  ;;  %240 = vst [vmem:[#allocation2 + $0x38] sm:$0xff] %v3721_v0  ;;  %s3807_s27 = scalar_lea.vmem %s7145_s3, %s3801_s24  ;;  %s3727_s7 = smov 51   ;;  %vm3353_vm9 = vcmask 261120   ;;  %vm3355_vm10 = vcmask 392192   ;;  %vm3357_vm11 = vcmask 523264  }
  0x22   : > { %241 = vst [vmem:[#allocation2 + $0x40] sm:$0xff] %v3721_v0  ;;  %v242_v1 = vld [vmem:[%s3807_s27] sm:$0xff]  ;;  %v243_v14 = vld [vmem:[%s3807_s27 + $0x8] sm:$0xff]  ;;  %s3728_s8 = smov 35   ;;  %s3729_s9 = smov 19   ;;  %vm3359_vm12 = vcmask 654336  }
  0x23   : > { %v244_v2 = vrot.slane %v242_v1, 4  ;;  %v250_v15 = vrot.slane %v243_v14, 4  ;;  %s222_s12 = scalar_lea.vmem %s7142_s0, %s3801_s24  ;;  %s3843_s13 = sld [smem:[#allocation4 + $0x1]]  ;;  %vm3361_vm13 = vcmask 785408   ;;  %vm3363_vm14 = vcmask 916480  }
  0x24   : > { %v404_v27 = vld [vmem:[%s222_s12] sm:$0xff]  ;;  %v405_v28 = vld [vmem:[%s222_s12 + $0x8] sm:$0xff]  ;;  %s3847_s14 = sld [smem:[#allocation4 + $0x2]]  ;;  %s3730_s18 = smov 127  }
  0x25   : > { %v245_v3 = vmax.f32 %v242_v1, %v244_v2  ;;  %v257_v4 = vadd.f32 %v244_v2, %v242_v1  ;;  %v263_v16 = vadd.f32 %v250_v15, %v243_v14  ;;  %v251_v18 = vmax.f32 %v243_v14, %v250_v15  ;;  %s3852_s15 = sld [smem:[#allocation4 + $0x3]]  ;;  %s3731_s20 = smov 126  }
  0x26   : > { %s3862_s16 = sld [smem:[#allocation4 + $0x4]]  ;;  %s3732_s21 = smov 125  }
  0x27   : > { %v246_v5 = vrot.slane %v245_v3, 2  ;;  %v258_v6 = vrot.slane %v257_v4, 2  ;;  %v264_v17 = vrot.slane %v263_v16, 2  ;;  %v252_v20 = vrot.slane %v251_v18, 2  ;;  %s3871_s19 = sld [smem:[#allocation4 + $0x5]]  ;;  %s3733_s22 = smov 124  }
  0x28   : > { %s3880_s2 = sld [smem:[#allocation4 + $0x6]]  ;;  %s3734_s23 = smov 123  }
  0x29   : > { %v247_v7 = vmax.f32 %v245_v3, %v246_v5  ;;  %v259_v8 = vadd.f32 %v258_v6, %v257_v4  ;;  %v265_v19 = vadd.f32 %v264_v17, %v263_v16  ;;  %v253_v22 = vmax.f32 %v251_v18, %v252_v20  ;;  %s3735_s25 = smov 122   ;;  %s3485_s26 = sld [smem:[#allocation4 + $0x8]] }
  0x2a   : > { %v428_v39 = vstv %s3843_s13  ;;  %v442_v44 = vstv %s3847_s14  ;;  %s3495_s10 = sld [smem:[#allocation4 + $0x12]] }
  0x2b   : > { %v248_v9 = vrot.slane %v247_v7, 1  ;;  %v260_v10 = vrot.slane %v259_v8, 1  ;;  %v266_v21 = vrot.slane %v265_v19, 1  ;;  %v254_v24 = vrot.slane %v253_v22, 1  ;;  %s3496_s11 = sld [smem:[#allocation4 + $0x13]] }
  0x2c   : > { %v456_v48 = vstv %s3852_s15  ;;  %v470_v52 = vstv %s3862_s16  ;;  %s3497_s12 = sld [smem:[#allocation4 + $0x14]] }
  0x2d   : > { %v249_v11 = vmax.f32 %v247_v7, %v248_v9  ;;  %v261_v12 = vadd.f32 %v260_v10, %v259_v8  ;;  %v267_v23 = vadd.f32 %v266_v21, %v265_v19  ;;  %v255_v26 = vmax.f32 %v253_v22, %v254_v24  ;;  %s3499_s13 = sld [smem:[#allocation4 + $0x16]] }
  0x2e   : > { %v484_v56 = vstv %s3871_s19  ;;  %v498_v60 = vstv %s3880_s2  ;;  %s3500_s14 = sld [smem:[#allocation4 + $0x17]] }
  0x2f   : > { %282 = vrot.lane.b32.xlu1 %v249_v11, %s3722_s28  ;;  %271 = vrot.lane.b32.xlu0 %v249_v11, %s3723_s29  ;;  %v268_v13 = vmul.f32 0.125, %v261_v12  ;;  %v269_v25 = vmul.f32 0.125, %v267_v23  ;;  %v3907_v5 = vstv %s3485_s26  ;;  %s3501_s15 = sld [smem:[#allocation4 + $0x18]] }
  0x30   : > { %s3502_s16 = sld [smem:[#allocation4 + $0x19]] }
  0x31   : > { %s3503_s19 = sld [smem:[#allocation4 + $0x1a]] }
  0x32   : > { %s3504_s2 = sld [smem:[#allocation4 + $0x1b]] }
  0x33   : > { %286 = vrot.lane.b32.xlu1 %v268_v13, %s3722_s28  ;;  %290 = vrot.lane.b32.xlu0 %v249_v11, %s3724_s30  ;;  %s3506_s26 = sld [smem:[#allocation4 + $0x1d]] }
  0x37   : > { %294 = vrot.lane.b32.xlu1 %v268_v13, %s3724_s30  ;;  %298 = vrot.lane.b32.xlu0 %v249_v11, %s3725_s5 }
  0x3b   : > { %302 = vrot.lane.b32.xlu1 %v268_v13, %s3725_s5  ;;  %306 = vrot.lane.b32.xlu0 %v249_v11, %s3726_s6 }
  0x3f   : > { %310 = vrot.lane.b32.xlu1 %v268_v13, %s3726_s6  ;;  %314 = vrot.lane.b32.xlu0 %v249_v11, %s3727_s7 }
  0x43   : > { %318 = vrot.lane.b32.xlu1 %v268_v13, %s3727_s7  ;;  %277 = vrot.lane.b32.xlu0 %v268_v13, %s3723_s29 }
  0x47   : > { %326 = vrot.lane.b32.xlu1 %v268_v13, %s3728_s8  ;;  %322 = vrot.lane.b32.xlu0 %v249_v11, %s3728_s8 }
  0x4b   : > { %334 = vrot.lane.b32.xlu1 %v268_v13, %s3729_s9  ;;  %330 = vrot.lane.b32.xlu0 %v249_v11, %s3729_s9 }
  0x4f   : > { %344 = vrot.lane.b32.xlu1 %v269_v25, %s3723_s29  ;;  %339 = vrot.lane.b32.xlu0 %v255_v26, %s3723_s29 }
  0x53   : > { %352 = vrot.lane.b32.xlu1 %v269_v25, %s3722_s28  ;;  %348 = vrot.lane.b32.xlu0 %v255_v26, %s3722_s28  ;;  %s3486_s28 = sld [smem:[#allocation4 + $0x9]] }
  0x57   : > { %360 = vrot.lane.b32.xlu1 %v269_v25, %s3724_s30  ;;  %356 = vrot.lane.b32.xlu0 %v255_v26, %s3724_s30  ;;  %s3488_s30 = sld [smem:[#allocation4 + $0xb]] }
  0x59   : > { %v3915_v10 = vstv %s3486_s28  ;;  %s3507_s28 = sld [smem:[#allocation4 + $0x1e]] }
  0x5b   : > { %368 = vrot.lane.b32.xlu1 %v269_v25, %s3725_s5  ;;  %364 = vrot.lane.b32.xlu0 %v255_v26, %s3725_s5  ;;  %s3489_s5 = sld [smem:[#allocation4 + $0xc]] }
  0x5f   : > { %376 = vrot.lane.b32.xlu1 %v269_v25, %s3726_s6  ;;  %372 = vrot.lane.b32.xlu0 %v255_v26, %s3726_s6  ;;  %s3490_s6 = sld [smem:[#allocation4 + $0xd]] }
  0x63   : > { %380 = vrot.lane.b32.xlu0 %v255_v26, %s3727_s7  ;;  %384 = vrot.lane.b32.xlu1 %v269_v25, %s3727_s7  ;;  %s3492_s7 = sld [smem:[#allocation4 + $0xf]] }
  0x67   : > { %388 = vrot.lane.b32.xlu0 %v255_v26, %s3728_s8  ;;  %392 = vrot.lane.b32.xlu1 %v269_v25, %s3728_s8  ;;  %s3493_s8 = sld [smem:[#allocation4 + $0x10]] }
  0x6b   : > { %396 = vrot.lane.b32.xlu0 %v255_v26, %s3729_s9  ;;  %400 = vrot.lane.b32.xlu1 %v269_v25, %s3729_s9  ;;  %s3494_s9 = sld [smem:[#allocation4 + $0x11]] }
  0x6f   : > { %408 = vrot.lane.b32.xlu0 %v404_v27, %s3723_s29  ;;  %410 = vrot.lane.b32.xlu1 %v405_v28, %s3723_s29  ;;  %s3487_s29 = sld [smem:[#allocation4 + $0xa]]  ;;  %v3953_v27 = vstv %s3488_s30 }
  0x70   : > { %s3509_s30 = sld [smem:[#allocation4 + $0x20]] }
  0x75   : > { %v3934_v19 = vstv %s3487_s29  ;;  %s3508_s29 = sld [smem:[#allocation4 + $0x1f]] }
  0xa1   : > { %v283_v29 = vpop.permute.xlu1 %282  ;;  %v272_v30 = vpop.permute.xlu0 %271 }
  0xa2   : > { %285 = vst.msk [vmem:[#allocation2 + $0x4] sm:$0x1] %vm274_vm0, %v283_v29  ;;  %275 = vst.msk [vmem:[#allocation2 + $0x3] sm:$0x1] %vm274_vm0, %v272_v30 }
  0xa5   : > { %v287_v31 = vpop.permute.xlu1 %286  ;;  %v291_v32 = vpop.permute.xlu0 %290 }
  0xa6   : > { %289 = vst.msk [vmem:[#allocation2 + $0x1c] sm:$0x1] %vm274_vm0, %v287_v31  ;;  %293 = vst.msk [vmem:[#allocation2 + $0x5] sm:$0x1] %vm274_vm0, %v291_v32 }
  0xa9   : > { %v295_v33 = vpop.permute.xlu1 %294  ;;  %v299_v34 = vpop.permute.xlu0 %298 }
  0xaa   : > { %297 = vst.msk [vmem:[#allocation2 + $0x1d] sm:$0x1] %vm274_vm0, %v295_v33  ;;  %301 = vst.msk [vmem:[#allocation2 + $0x6] sm:$0x1] %vm274_vm0, %v299_v34 }
  0xad   : > { %v303_v35 = vpop.permute.xlu1 %302  ;;  %v307_v36 = vpop.permute.xlu0 %306 }
  0xae   : > { %305 = vst.msk [vmem:[#allocation2 + $0x1e] sm:$0x1] %vm274_vm0, %v303_v35  ;;  %309 = vst.msk [vmem:[#allocation2 + $0x7] sm:$0x1] %vm274_vm0, %v307_v36  ;;  %v3970_v36 = vstv %s3489_s5  ;;  %s3510_s5 = sld [smem:[#allocation4 + $0x21]] }
  0xb1   : > { %v311_v37 = vpop.permute.xlu1 %310  ;;  %v315_v38 = vpop.permute.xlu0 %314 }
  0xb2   : > { %313 = vst.msk [vmem:[#allocation2 + $0x1f] sm:$0x1] %vm274_vm0, %v311_v37  ;;  %317 = vst.msk [vmem:[#allocation2 + $0x8] sm:$0x1] %vm274_vm0, %v315_v38 }
  0xb5   : > { %v3854_v40 = vld [vmem:[#allocation2] sm:$0xff]  ;;  %v319_v41 = vpop.permute.xlu1 %318  ;;  %v278_v42 = vpop.permute.xlu0 %277 }
  0xb6   : > { %321 = vst.msk [vmem:[#allocation2 + $0x20] sm:$0x1] %vm274_vm0, %v319_v41  ;;  %281 = vst.msk [vmem:[#allocation2 + $0x1b] sm:$0x1] %vm274_vm0, %v278_v42  ;;  %v429_v43 = vmul.f32 %v428_v39, %v3854_v40  ;;  %v443_v47 = vmul.f32 %v442_v44, %v3854_v40  ;;  %v457_v51 = vmul.f32 %v456_v48, %v3854_v40 }
  0xb7   : > { %v471_v55 = vmul.f32 %v470_v52, %v3854_v40  ;;  %v485_v59 = vmul.f32 %v484_v56, %v3854_v40  ;;  %v499_v63 = vmul.f32 %v498_v60, %v3854_v40  ;;  %v531_v7 = vmul.f32 %v3907_v5, %v3854_v40 }
  0xb8   : > { %433 = vrot.lane.b32.xlu0 %v429_v43, %s3730_s18  ;;  %v552_v17 = vmul.f32 %v3915_v10, %v3854_v40  ;;  %v573_v26 = vmul.f32 %v3934_v19, %v3854_v40  ;;  %v594_v35 = vmul.f32 %v3953_v27, %v3854_v40 }
  0xb9   : > { %v327_v45 = vpop.permute.xlu1 %326  ;;  %v323_v46 = vpop.permute.xlu0 %322  ;;  %v537_v15 = vrot.slane %v531_v7, 1  ;;  %v4046_v7 = vstv %s3494_s9  ;;  %s3515_s9 = sld [smem:[#allocation4 + $0x26]] }
  0xba   : > { %329 = vst.msk [vmem:[#allocation2 + $0x21] sm:$0x1] %vm274_vm0, %v327_v45  ;;  %325 = vst.msk [vmem:[#allocation2 + $0x9] sm:$0x1] %vm274_vm0, %v323_v46  ;;  %v558_v25 = vrot.slane %v552_v17, 1  ;;  %v579_v34 = vrot.slane %v573_v26, 1  ;;  %v3989_v45 = vstv %s3490_s6  ;;  %v717_v17 = vmul.f32 %v4046_v7, %v3854_v40 }
  0xbb   : > { %v600_v43 = vrot.slane %v594_v35, 1  ;;  %s3511_s6 = sld [smem:[#allocation4 + $0x22]] }
  0xbc   : > { %447 = vrot.lane.b32.xlu0 %v443_v47, %s3731_s20 }
  0xbd   : > { %v335_v49 = vpop.permute.xlu1 %334  ;;  %v331_v50 = vpop.permute.xlu0 %330 }
  0xbe   : > { %337 = vst.msk [vmem:[#allocation2 + $0x22] sm:$0x1] %vm274_vm0, %v335_v49  ;;  %333 = vst.msk [vmem:[#allocation2 + $0xa] sm:$0x1] %vm274_vm0, %v331_v50 }
  0xc0   : > { %461 = vrot.lane.b32.xlu0 %v457_v51, %s3732_s21 }
  0xc1   : > { %v345_v53 = vpop.permute.xlu1 %344  ;;  %v340_v54 = vpop.permute.xlu0 %339 }
  0xc2   : > { %347 = vst.msk [vmem:[#allocation2 + $0x23] sm:$0x1] %vm274_vm0, %v345_v53  ;;  %342 = vst.msk [vmem:[#allocation2 + $0xb] sm:$0x1] %vm274_vm0, %v340_v54  ;;  %v4008_v53 = vstv %s3492_s7  ;;  %s3513_s7 = sld [smem:[#allocation4 + $0x24]] }
  0xc4   : > { %475 = vrot.lane.b32.xlu0 %v471_v55, %s3733_s22 }
  0xc5   : > { %v353_v57 = vpop.permute.xlu1 %352  ;;  %v349_v58 = vpop.permute.xlu0 %348 }
  0xc6   : > { %355 = vst.msk [vmem:[#allocation2 + $0x24] sm:$0x1] %vm274_vm0, %v353_v57  ;;  %351 = vst.msk [vmem:[#allocation2 + $0xc] sm:$0x1] %vm274_vm0, %v349_v58 }
  0xc8   : > { %489 = vrot.lane.b32.xlu0 %v485_v59, %s3734_s23 }
  0xc9   : > { %v361_v61 = vpop.permute.xlu1 %360  ;;  %v357_v62 = vpop.permute.xlu0 %356 }
  0xca   : > { %363 = vst.msk [vmem:[#allocation2 + $0x25] sm:$0x1] %vm274_vm0, %v361_v61  ;;  %359 = vst.msk [vmem:[#allocation2 + $0xd] sm:$0x1] %vm274_vm0, %v357_v62  ;;  %v675_v62 = vmul.f32 %v4008_v53, %v3854_v40 }
  0xcc   : > { %503 = vrot.lane.b32.xlu0 %v499_v63, %s3735_s25  ;;  %v4027_v63 = vstv %s3493_s8  ;;  %s3514_s8 = sld [smem:[#allocation4 + $0x25]] }
  0xcd   : > { %v369_v0 = vpop.permute.xlu1 %368  ;;  %v365_v1 = vpop.permute.xlu0 %364 }
  0xce   : > { %371 = vst.msk [vmem:[#allocation2 + $0x26] sm:$0x1] %vm274_vm0, %v369_v0  ;;  %367 = vst.msk [vmem:[#allocation2 + $0xe] sm:$0x1] %vm274_vm0, %v365_v1 }
  0xd1   : > { %v377_v2 = vpop.permute.xlu1 %376  ;;  %v373_v3 = vpop.permute.xlu0 %372 }
  0xd2   : > { %379 = vst.msk [vmem:[#allocation2 + $0x27] sm:$0x1] %vm274_vm0, %v377_v2  ;;  %375 = vst.msk [vmem:[#allocation2 + $0xf] sm:$0x1] %vm274_vm0, %v373_v3 }
  0xd5   : > { %v381_v4 = vpop.permute.xlu0 %380  ;;  %v385_v6 = vpop.permute.xlu1 %384 }
  0xd6   : > { %383 = vst.msk [vmem:[#allocation2 + $0x10] sm:$0x1] %vm274_vm0, %v381_v4  ;;  %387 = vst.msk [vmem:[#allocation2 + $0x28] sm:$0x1] %vm274_vm0, %v385_v6  ;;  %v696_v6 = vmul.f32 %v4027_v63, %v3854_v40 }
  0xd9   : > { %v3913_v8 = vld [vmem:[#allocation2 + $0x8] sm:$0xff]  ;;  %v389_v9 = vpop.permute.xlu0 %388  ;;  %v393_v11 = vpop.permute.xlu1 %392 }
  0xda   : > { %391 = vst.msk [vmem:[#allocation2 + $0x11] sm:$0x1] %vm274_vm0, %v389_v9  ;;  %v430_v12 = vmul.f32 %v428_v39, %v3913_v8  ;;  %v3923_v13 = vmul.f32 %v3907_v5, %v3913_v8  ;;  %v3927_v14 = vmul.f32 %v3915_v10, %v3913_v8  ;;  %395 = vst.msk [vmem:[#allocation2 + $0x29] sm:$0x1] %vm274_vm0, %v393_v11 }
  0xdb   : > { %v444_v22 = vmul.f32 %v442_v44, %v3913_v8  ;;  %v3946_v24 = vmul.f32 %v3934_v19, %v3913_v8  ;;  %v458_v31 = vmul.f32 %v456_v48, %v3913_v8  ;;  %v3964_v33 = vmul.f32 %v3953_v27, %v3913_v8 }
  0xdc   : > { %435 = vrot.lane.b32.xlu1 %v430_v12, %s3730_s18  ;;  %v538_v16 = vrot.slane %v3923_v13, 1  ;;  %v559_v23 = vrot.slane %v3927_v14, 1  ;;  %v472_v38 = vmul.f32 %v470_v52, %v3913_v8  ;;  %v3981_v41 = vmul.f32 %v3970_v36, %v3913_v8 }
  0xdd   : > { %v397_v18 = vpop.permute.xlu0 %396  ;;  %v401_v20 = vpop.permute.xlu1 %400  ;;  %v580_v32 = vrot.slane %v3946_v24, 1  ;;  %v601_v39 = vrot.slane %v3964_v33, 1  ;;  %v615_v44 = vmul.f32 %v3970_v36, %v3854_v40  ;;  %v486_v47 = vmul.f32 %v484_v56, %v3913_v8 }
  0xde   : > { %399 = vst.msk [vmem:[#allocation2 + $0x12] sm:$0x1] %vm274_vm0, %v397_v18  ;;  %v539_v21 = vsel %vm519_vm1, %v537_v15, %v538_v16  ;;  %403 = vst.msk [vmem:[#allocation2 + $0x2a] sm:$0x1] %vm274_vm0, %v401_v20  ;;  %v560_v30 = vsel %vm519_vm1, %v558_v25, %v559_v23  ;;  %v622_v48 = vrot.slane %v3981_v41, 1  ;;  %v4000_v49 = vmul.f32 %v3989_v45, %v3913_v8 }
  0xdf   : > { %542 = vrot.lane.b32.xlu0 %v539_v21, %s3730_s18  ;;  %v581_v37 = vsel %vm519_vm1, %v579_v34, %v580_v32  ;;  %v602_v46 = vsel %vm519_vm1, %v600_v43, %v601_v39  ;;  %v621_v51 = vrot.slane %v615_v44, 1  ;;  %v636_v52 = vmul.f32 %v3989_v45, %v3854_v40 }
  0xe0   : > { %449 = vrot.lane.b32.xlu1 %v444_v22, %s3731_s20  ;;  %v500_v55 = vmul.f32 %v498_v60, %v3913_v8  ;;  %v643_v56 = vrot.slane %v4000_v49, 1  ;;  %v4019_v57 = vmul.f32 %v4008_v53, %v3913_v8  ;;  %v4035_v1 = vmul.f32 %v4027_v63, %v3913_v8 }
  0xe1   : > { %v409_v28 = vpop.permute.xlu0 %408  ;;  %v411_v29 = vpop.permute.xlu1 %410  ;;  %v623_v54 = vsel %vm519_vm1, %v621_v51, %v622_v48  ;;  %v642_v61 = vrot.slane %v636_v52, 1  ;;  %v4054_v11 = vmul.f32 %v4046_v7, %v3913_v8  ;;  %v4065_v18 = vstv %s3495_s10  ;;  %s3516_s10 = sld [smem:[#allocation4 + $0x27]] }
  0xe2   : > { %416 = vst.msk [vmem:[#allocation2 + $0x33] sm:$0xff] %vm415_vm2, %v409_v28  ;;  %417 = vst.msk [vmem:[#allocation2 + $0x3b] sm:$0xff] %vm415_vm2, %v411_v29  ;;  %v682_v0 = vrot.slane %v4019_v57, 2  ;;  %v4073_v20 = vmul.f32 %v4065_v18, %v3913_v8  ;;  %v723_v25 = vrot.slane %v717_v17, 2  ;;  %v738_v26 = vmul.f32 %v4065_v18, %v3854_v40 }
  0xe3   : > { %563 = vrot.lane.b32.xlu0 %v560_v30, %s3731_s20  ;;  %v644_v60 = vsel %vm519_vm1, %v642_v61, %v643_v56  ;;  %v724_v14 = vrot.slane %v4054_v11, 2 }
  0xe4   : > { %463 = vrot.lane.b32.xlu1 %v458_v31, %s3732_s21  ;;  %v745_v24 = vrot.slane %v4073_v20, 2  ;;  %v744_v34 = vrot.slane %v738_v26, 2 }
  0xe5   : > { %v3984_v42 = vld [vmem:[#allocation2 + $0x10] sm:$0x3f]  ;;  %v725_v28 = vsel %vm663_vm3, %v723_v25, %v724_v14 }
  0xe6   : > { %v533_v50 = vmul.f32 %v3907_v5, %v3984_v42  ;;  %v554_v59 = vmul.f32 %v3915_v10, %v3984_v42  ;;  %v575_v4 = vmul.f32 %v3934_v19, %v3984_v42  ;;  %v681_v5 = vrot.slane %v675_v62, 2 }
  0xe7   : > { %584 = vrot.lane.b32.xlu0 %v581_v37, %s3732_s21  ;;  %v703_v10 = vrot.slane %v4035_v1, 2  ;;  %v596_v15 = vmul.f32 %v3953_v27, %v3984_v42  ;;  %v4084_v27 = vstv %s3496_s11  ;;  %v746_v37 = vsel %vm663_vm3, %v744_v34, %v745_v24  ;;  %s3517_s11 = sld [smem:[#allocation4 + $0x28]] }
  0xe8   : > { %477 = vrot.lane.b32.xlu1 %v472_v38, %s3733_s22  ;;  %v540_v58 = vrot.slane %v533_v50, 1  ;;  %v561_v3 = vrot.slane %v554_v59, 1  ;;  %v683_v9 = vsel %vm663_vm3, %v681_v5, %v682_v0  ;;  %v582_v13 = vrot.slane %v575_v4, 1 }
  0xe9   : > { %v603_v22 = vrot.slane %v596_v15, 1  ;;  %v4092_v29 = vmul.f32 %v4084_v27, %v3913_v8  ;;  %v759_v35 = vmul.f32 %v4084_v27, %v3854_v40  ;;  %v677_v44 = vmul.f32 %v4008_v53, %v3984_v42 }
  0xea   : > { %v541_v2 = vsel %vm519_vm1, %v538_v16, %v540_v58  ;;  %v562_v12 = vsel %vm519_vm1, %v559_v23, %v561_v3  ;;  %v702_v16 = vrot.slane %v696_v6, 2  ;;  %v583_v21 = vsel %vm519_vm1, %v580_v32, %v582_v13 }
  0xeb   : > { %605 = vrot.lane.b32.xlu0 %v602_v46, %s3733_s22  ;;  %v617_v23 = vmul.f32 %v3970_v36, %v3984_v42  ;;  %v604_v30 = vsel %vm519_vm1, %v601_v39, %v603_v22  ;;  %v638_v32 = vmul.f32 %v3989_v45, %v3984_v42  ;;  %v4103_v36 = vstv %s3497_s12  ;;  %s3518_s12 = sld [smem:[#allocation4 + $0x29]] }
  0xec   : > { %491 = vrot.lane.b32.xlu1 %v486_v47, %s3734_s23  ;;  %v704_v19 = vsel %vm663_vm3, %v702_v16, %v703_v10  ;;  %v766_v33 = vrot.slane %v4092_v29, 2  ;;  %v4111_v38 = vmul.f32 %v4103_v36, %v3913_v8  ;;  %v765_v45 = vrot.slane %v759_v35, 2 }
  0xed   : > { %v624_v31 = vrot.slane %v617_v23, 1  ;;  %v645_v43 = vrot.slane %v638_v32, 1  ;;  %v780_v46 = vmul.f32 %v4103_v36, %v3854_v40  ;;  %v4122_v47 = vstv %s3499_s13  ;;  %s3520_s13 = sld [smem:[#allocation4 + $0x2b]] }
  0xee   : > { %v767_v50 = vsel %vm663_vm3, %v765_v45, %v766_v33  ;;  %v787_v41 = vrot.slane %v4111_v38, 2  ;;  %v684_v52 = vrot.slane %v677_v44, 2  ;;  %v698_v53 = vmul.f32 %v4027_v63, %v3984_v42 }
  0xef   : > { %626 = vrot.lane.b32.xlu0 %v623_v54, %s3734_s23  ;;  %v625_v39 = vsel %vm519_vm1, %v622_v48, %v624_v31  ;;  %v4130_v48 = vmul.f32 %v4122_v47, %v3913_v8  ;;  %v646_v51 = vsel %vm519_vm1, %v643_v56, %v645_v43  ;;  %v786_v54 = vrot.slane %v780_v46, 2 }
  0xf0   : > { %505 = vrot.lane.b32.xlu1 %v500_v55, %s3735_s25  ;;  %v819_v55 = vmul.f32 %v4122_v47, %v3854_v40  ;;  %v4141_v58 = vstv %s3500_s14  ;;  %v685_v61 = vsel %vm663_vm3, %v682_v0, %v684_v52  ;;  %v705_v62 = vrot.slane %v698_v53, 2  ;;  %s3521_s14 = sld [smem:[#allocation4 + $0x2c]] }
  0xf1   : > { %v788_v59 = vsel %vm663_vm3, %v786_v54, %v787_v41  ;;  %v826_v49 = vrot.slane %v4130_v48, 3  ;;  %v4149_v56 = vmul.f32 %v4141_v58, %v3913_v8  ;;  %v719_v63 = vmul.f32 %v4046_v7, %v3984_v42 }
  0xf2   : > { %v4160_v3 = vstv %s3501_s15  ;;  %v706_v5 = vsel %vm663_vm3, %v703_v10, %v705_v62  ;;  %v740_v7 = vmul.f32 %v4065_v18, %v3984_v42  ;;  %v4179_v13 = vstv %s3502_s16  ;;  %s3522_s15 = sld [smem:[#allocation4 + $0x2d]] }
  0xf3   : > { %647 = vrot.lane.b32.xlu0 %v644_v60, %s3735_s25  ;;  %v825_v60 = vrot.slane %v819_v55, 3  ;;  %v847_v0 = vrot.slane %v4149_v56, 3  ;;  %v4168_v4 = vmul.f32 %v4160_v3, %v3913_v8  ;;  %v726_v6 = vrot.slane %v719_v63, 2  ;;  %s3523_s16 = sld [smem:[#allocation4 + $0x2e]] }
  0xf4   : > { %544 = vrot.lane.b32.xlu1 %v541_v2, %s3730_s18  ;;  %v840_v2 = vmul.f32 %v4141_v58, %v3854_v40  ;;  %v4187_v10 = vmul.f32 %v4179_v13, %v3913_v8  ;;  %v747_v17 = vrot.slane %v740_v7, 2  ;;  %v761_v18 = vmul.f32 %v4084_v27, %v3984_v42 }
  0xf5   : > { %v827_v57 = vsel %vm807_vm4, %v825_v60, %v826_v49  ;;  %v868_v1 = vrot.slane %v4168_v4, 3  ;;  %v727_v16 = vsel %vm663_vm3, %v724_v14, %v726_v6  ;;  %v4198_v22 = vstv %s3503_s19  ;;  %s3524_s19 = sld [smem:[#allocation4 + $0x2f]] }
  0xf6   : > { %v889_v11 = vrot.slane %v4187_v10, 3  ;;  %v4206_v14 = vmul.f32 %v4198_v22, %v3913_v8  ;;  %v748_v25 = vsel %vm663_vm3, %v745_v24, %v747_v17  ;;  %v768_v26 = vrot.slane %v761_v18, 2 }
  0xf7   : > { %686 = vrot.lane.b32.xlu0 %v683_v9, %s3730_s18  ;;  %v846_v9 = vrot.slane %v840_v2, 3  ;;  %v782_v27 = vmul.f32 %v4103_v36, %v3984_v42  ;;  %v4217_v31 = vstv %s3504_s2  ;;  %v821_v36 = vmul.f32 %v4122_v47, %v3984_v42  ;;  %s3525_s2 = sld [smem:[#allocation4 + $0x30]] }
  0xf8   : > { %565 = vrot.lane.b32.xlu1 %v562_v12, %s3731_s20  ;;  %v861_v12 = vmul.f32 %v4160_v3, %v3854_v40  ;;  %v910_v20 = vrot.slane %v4206_v14, 3  ;;  %v4225_v24 = vmul.f32 %v4217_v31, %v3913_v8  ;;  %v769_v34 = vsel %vm663_vm3, %v766_v33, %v768_v26 }
  0xf9   : > { %v848_v15 = vsel %vm807_vm4, %v846_v9, %v847_v0  ;;  %v789_v35 = vrot.slane %v782_v27, 2  ;;  %v4236_v43 = vstv %s3506_s26  ;;  %v828_v46 = vrot.slane %v821_v36, 3  ;;  %s4603_s26 = sld [smem:[#allocation4 + $0x32]] }
  0xfa   : > { %v931_v29 = vrot.slane %v4225_v24, 3  ;;  %v4244_v33 = vmul.f32 %v4236_v43, %v3913_v8  ;;  %v842_v47 = vmul.f32 %v4141_v58, %v3984_v42  ;;  %v4255_v52 = vstv %s3507_s28  ;;  %s4624_s28 = sld [smem:[#allocation4 + $0x33]] }
  0xfb   : > { %707 = vrot.lane.b32.xlu0 %v704_v19, %s3731_s20  ;;  %v867_v19 = vrot.slane %v861_v12, 3  ;;  %v790_v45 = vsel %vm663_vm3, %v787_v41, %v789_v35  ;;  %v4263_v41 = vmul.f32 %v4255_v52, %v3913_v8  ;;  %v829_v54 = vsel %vm807_vm4, %v826_v49, %v828_v46 }
  0xfc   : > { %586 = vrot.lane.b32.xlu1 %v583_v21, %s3732_s21  ;;  %v882_v21 = vmul.f32 %v4179_v13, %v3854_v40  ;;  %v970_v38 = vrot.slane %v4244_v33, 4  ;;  %v849_v55 = vrot.slane %v842_v47, 3  ;;  %v863_v58 = vmul.f32 %v4160_v3, %v3984_v42 }
  0xfd   : > { %v869_v23 = vsel %vm807_vm4, %v867_v19, %v868_v1  ;;  %v4274_v62 = vstv %s3508_s29  ;;  %v991_v49 = vrot.slane %v4263_v41, 4  ;;  %v884_v3 = vmul.f32 %v4179_v13, %v3984_v42  ;;  %s4643_s29 = sld [smem:[#allocation4 + $0x34]] }
  0xfe   : > { %v4282_v63 = vmul.f32 %v4274_v62, %v3913_v8  ;;  %v850_v60 = vsel %vm807_vm4, %v847_v0, %v849_v55  ;;  %v870_v2 = vrot.slane %v863_v58, 3  ;;  %v4293_v6 = vstv %s3509_s30  ;;  %s4660_s30 = sld [smem:[#allocation4 + $0x35]] }
  0xff   : > { %728 = vrot.lane.b32.xlu0 %v725_v28, %s3732_s21  ;;  %v888_v28 = vrot.slane %v882_v21, 3  ;;  %v4301_v0 = vmul.f32 %v4293_v6, %v3913_v8  ;;  %v891_v12 = vrot.slane %v884_v3, 3  ;;  %v905_v13 = vmul.f32 %v4198_v22, %v3984_v42 }
 0x100   : > { %607 = vrot.lane.b32.xlu1 %v604_v30, %s3733_s22  ;;  %v903_v30 = vmul.f32 %v4198_v22, %v3854_v40  ;;  %v1012_v56 = vrot.slane %v4282_v63, 4  ;;  %v871_v9 = vsel %vm807_vm4, %v868_v1, %v870_v2  ;;  %v4312_v17 = vstv %s3510_s5  ;;  %s4677_s5 = sld [smem:[#allocation4 + $0x36]] }
 0x101   : > { %v890_v32 = vsel %vm807_vm4, %v888_v28, %v889_v11  ;;  %v1033_v4 = vrot.slane %v4301_v0, 4  ;;  %v4320_v1 = vmul.f32 %v4312_v17, %v3913_v8  ;;  %v892_v21 = vsel %vm807_vm4, %v889_v11, %v891_v12 }
 0x102   : > { %v912_v22 = vrot.slane %v905_v13, 3  ;;  %v1047_v26 = vmul.f32 %v4312_v17, %v3854_v40  ;;  %v4333_v27 = vstv %s3511_s6  ;;  %v1007_v55 = vmul.f32 %v4274_v62, %v3984_v42  ;;  %s3534_s6 = sld [smem:[#allocation4 + $0x39]] }
 0x103   : > { %749 = vrot.lane.b32.xlu0 %v746_v37, %s3733_s22  ;;  %v909_v37 = vrot.slane %v903_v30, 3  ;;  %v1054_v10 = vrot.slane %v4320_v1, 4  ;;  %v4341_v11 = vmul.f32 %v4333_v27, %v3913_v8  ;;  %v1068_v35 = vmul.f32 %v4333_v27, %v3854_v40 }
 0x104   : > { %628 = vrot.lane.b32.xlu1 %v625_v39, %s3734_s23  ;;  %v924_v39 = vmul.f32 %v4217_v31, %v3854_v40  ;;  %v913_v30 = vsel %vm807_vm4, %v910_v20, %v912_v22  ;;  %v1028_v2 = vmul.f32 %v4293_v6, %v3984_v42  ;;  %v1049_v13 = vmul.f32 %v4312_v17, %v3984_v42 }
 0x105   : > { %v911_v44 = vsel %vm807_vm4, %v909_v37, %v910_v20  ;;  %v4354_v37 = vstv %s3513_s7  ;;  %v1075_v20 = vrot.slane %v4341_v11, 4  ;;  %v1074_v46 = vrot.slane %v1068_v35, 4  ;;  %s4694_s7 = sld [smem:[#allocation4 + $0x37]] }
 0x106   : > { %v1107_v47 = vmul.f32 %v4354_v37, %v3854_v40  ;;  %v1035_v12 = vrot.slane %v1028_v2, 4 }
 0x107   : > { %770 = vrot.lane.b32.xlu0 %v767_v50, %s3734_s23  ;;  %v930_v50 = vrot.slane %v924_v39, 3  ;;  %v4362_v39 = vmul.f32 %v4354_v37, %v3913_v8 }
 0x108   : > { %649 = vrot.lane.b32.xlu1 %v646_v51, %s3735_s25  ;;  %v963_v51 = vmul.f32 %v4236_v43, %v3854_v40  ;;  %v1113_v58 = vrot.slane %v1107_v47, 5  ;;  %v1036_v22 = vsel %vm951_vm5, %v1033_v4, %v1035_v12 }
 0x109   : > { %v932_v53 = vsel %vm807_vm4, %v930_v50, %v931_v29  ;;  %v4373_v50 = vstv %s3514_s8  ;;  %v1114_v24 = vrot.slane %v4362_v39, 5  ;;  %s3535_s8 = sld [smem:[#allocation4 + $0x3a]] }
 0x10b   : > { %791 = vrot.lane.b32.xlu0 %v788_v59, %s3735_s25  ;;  %v969_v59 = vrot.slane %v963_v51, 4  ;;  %v1076_v51 = vsel %vm951_vm5, %v1074_v46, %v1075_v20  ;;  %v1115_v33 = vsel %vm1095_vm6, %v1113_v58, %v1114_v24  ;;  %v4499_v58 = vstv %s3521_s14  ;;  %s3541_s14 = sld [smem:[#allocation4 + $0x40]] }
 0x10c   : > { %688 = vrot.lane.b32.xlu1 %v685_v61, %s3730_s18  ;;  %v984_v61 = vmul.f32 %v4255_v52, %v3854_v40 }
 0x10d   : > { %v971_v48 = vsel %vm951_vm5, %v969_v59, %v970_v38  ;;  %v1128_v59 = vmul.f32 %v4373_v50, %v3854_v40 }
 0x10f   : > { %830 = vrot.lane.b32.xlu0 %v827_v57, %s3730_s18  ;;  %v990_v57 = vrot.slane %v984_v61, 4  ;;  %v4394_v61 = vstv %s3515_s9  ;;  %v1134_v3 = vrot.slane %v1128_v59, 5  ;;  %s3536_s9 = sld [smem:[#allocation4 + $0x3b]] }
 0x110   : > { %709 = vrot.lane.b32.xlu1 %v706_v5, %s3731_s20  ;;  %v1005_v5 = vmul.f32 %v4274_v62, %v3854_v40 }
 0x111   : > { %v992_v7 = vsel %vm951_vm5, %v990_v57, %v991_v49  ;;  %v1149_v57 = vmul.f32 %v4394_v61, %v3854_v40 }
 0x113   : > { %851 = vrot.lane.b32.xlu0 %v848_v15, %s3731_s20  ;;  %v1011_v15 = vrot.slane %v1005_v5, 4 }
 0x114   : > { %730 = vrot.lane.b32.xlu1 %v727_v16, %s3732_s21  ;;  %v1026_v16 = vmul.f32 %v4293_v6, %v3854_v40 }
 0x115   : > { %v1013_v18 = vsel %vm951_vm5, %v1011_v15, %v1012_v56  ;;  %v1155_v15 = vrot.slane %v1149_v57, 5 }
 0x117   : > { %872 = vrot.lane.b32.xlu0 %v869_v23, %s3732_s21  ;;  %v926_v23 = vmul.f32 %v4217_v31, %v3984_v42 }
 0x118   : > { %751 = vrot.lane.b32.xlu1 %v748_v25, %s3733_s22  ;;  %v1032_v25 = vrot.slane %v1026_v16, 4 }
 0x119   : > { %v933_v31 = vrot.slane %v926_v23, 3  ;;  %v1056_v23 = vrot.slane %v1049_v13, 4 }
 0x11a   : > { %v1034_v28 = vsel %vm951_vm5, %v1032_v25, %v1033_v4  ;;  %v1070_v25 = vmul.f32 %v4333_v27, %v3984_v42 }
 0x11b   : > { %893 = vrot.lane.b32.xlu0 %v890_v32, %s3733_s22  ;;  %v965_v32 = vmul.f32 %v4236_v43, %v3984_v42  ;;  %v934_v43 = vsel %vm807_vm4, %v931_v29, %v933_v31  ;;  %v4381_v29 = vmul.f32 %v4373_v50, %v3913_v8  ;;  %v1057_v27 = vsel %vm951_vm5, %v1054_v10, %v1056_v23 }
 0x11c   : > { %772 = vrot.lane.b32.xlu1 %v769_v34, %s3734_s23  ;;  %v1053_v34 = vrot.slane %v1047_v26, 4  ;;  %v4545_v23 = vstv %s3523_s16  ;;  %s4837_s16 = sld [smem:[#allocation4 + $0x41]] }
 0x11e   : > { %v1055_v14 = vsel %vm951_vm5, %v1053_v34, %v1054_v10  ;;  %v1109_v34 = vmul.f32 %v4354_v37, %v3984_v42 }
 0x11f   : > { %914 = vrot.lane.b32.xlu0 %v911_v44, %s3734_s23  ;;  %v972_v44 = vrot.slane %v965_v32, 4  ;;  %v1077_v32 = vrot.slane %v1070_v25, 4 }
 0x120   : > { %793 = vrot.lane.b32.xlu1 %v790_v45, %s3735_s25  ;;  %v986_v45 = vmul.f32 %v4255_v52, %v3984_v42  ;;  %v1116_v47 = vrot.slane %v1109_v34, 5 }
 0x121   : > { %v1078_v46 = vsel %vm951_vm5, %v1075_v20, %v1077_v32  ;;  %v1314_v32 = vmul.f32 %v4545_v23, %v3854_v40 }
 0x123   : > { %935 = vrot.lane.b32.xlu0 %v932_v53, %s3735_s25  ;;  %v973_v53 = vsel %vm951_vm5, %v970_v38, %v972_v44  ;;  %v1135_v38 = vrot.slane %v4381_v29, 5  ;;  %v4476_v44 = vstv %s3520_s13  ;;  %s3539_s13 = sld [smem:[#allocation4 + $0x3e]] }
 0x124   : > { %832 = vrot.lane.b32.xlu1 %v829_v54, %s3730_s18  ;;  %v993_v54 = vrot.slane %v986_v45, 4  ;;  %v4486_v37 = vmul.f32 %v4476_v44, %v3913_v8 }
 0x125   : > { %v1136_v41 = vsel %vm1095_vm6, %v1134_v3, %v1135_v38  ;;  %v1272_v3 = vmul.f32 %v4499_v58, %v3854_v40 }
 0x126   : > { %v994_v62 = vsel %vm951_vm5, %v991_v49, %v993_v54  ;;  %v1251_v54 = vmul.f32 %v4476_v44, %v3854_v40  ;;  %v1258_v20 = vrot.slane %v4486_v37, 6 }
 0x127   : > { %974 = vrot.lane.b32.xlu0 %v971_v48, %s3730_s18  ;;  %v4402_v48 = vmul.f32 %v4394_v61, %v3913_v8 }
 0x128   : > { %853 = vrot.lane.b32.xlu1 %v850_v60, %s3731_s20  ;;  %v1014_v60 = vrot.slane %v1007_v55, 4  ;;  %v1257_v2 = vrot.slane %v1251_v54, 6 }
 0x129   : > { %v1156_v49 = vrot.slane %v4402_v48, 5 }
 0x12a   : > { %v4322_v19 = vpop.permute.xlu0 %433  ;;  %v1259_v39 = vsel %vm1239_vm7, %v1257_v2, %v1258_v20 }
 0x12b   : > { %995 = vrot.lane.b32.xlu0 %v992_v7, %s3731_s20  ;;  %v4415_v7 = vstv %s3516_s10  ;;  %s3537_s10 = sld [smem:[#allocation4 + $0x3c]] }
 0x12c   : > { %874 = vrot.lane.b32.xlu1 %v871_v9, %s3732_s21  ;;  %v4423_v6 = vmul.f32 %v4415_v7, %v3913_v8  ;;  %v1015_v9 = vsel %vm951_vm5, %v1012_v56, %v1014_v60  ;;  %v1170_v16 = vmul.f32 %v4415_v7, %v3854_v40  ;;  %v1151_v60 = vmul.f32 %v4394_v61, %v3984_v42 }
 0x12e   : > { %v4352_v36 = vpop.permute.xlu0 %447  ;;  %v1177_v63 = vrot.slane %v4423_v6, 5  ;;  %v1176_v26 = vrot.slane %v1170_v16, 5  ;;  %v1158_v13 = vrot.slane %v1151_v60, 5  ;;  %v1278_v16 = vrot.slane %v1272_v3, 6  ;;  %v4612_v3 = vld [vmem:[#allocation2] sm:$0xff] }
 0x12f   : > { %1016 = vrot.lane.b32.xlu0 %v1013_v18, %s3732_s21  ;;  %v4434_v18 = vstv %s3517_s11  ;;  %v1253_v60 = vmul.f32 %v4476_v44, %v3984_v42  ;;  %s4757_s11 = sld [smem:[#allocation4]] }
 0x130   : > { %895 = vrot.lane.b32.xlu1 %v892_v21, %s3733_s22  ;;  %v1157_v21 = vsel %vm1095_vm6, %v1155_v15, %v1156_v49  ;;  %v4442_v56 = vmul.f32 %v4434_v18, %v3913_v8  ;;  %v1178_v31 = vsel %vm1095_vm6, %v1176_v26, %v1177_v63  ;;  %v1172_v15 = vmul.f32 %v4415_v7, %v3984_v42 }
 0x131   : > { %v4555_v7 = vmul.f32 %v4545_v23, %v3913_v8  ;;  %v1159_v26 = vsel %vm1095_vm6, %v1156_v49, %v1158_v13  ;;  %v1260_v13 = vrot.slane %v1253_v60, 6  ;;  %v1427_v60 = vstv %s4660_s30  ;;  %s4996_s30 = sld [smem:[#allocation4 + $0x47]] }
 0x132   : > { %v4383_v52 = vpop.permute.xlu0 %461  ;;  %v1198_v0 = vrot.slane %v4442_v56, 5 }
 0x133   : > { %1037 = vrot.lane.b32.xlu0 %v1034_v28, %s3733_s22  ;;  %v1191_v28 = vmul.f32 %v4434_v18, %v3854_v40  ;;  %v1321_v49 = vrot.slane %v4555_v7, 6  ;;  %v4711_v7 = vld [vmem:[#allocation2 + $0x20] sm:$0xff] }
 0x134   : > { %916 = vrot.lane.b32.xlu1 %v913_v30, %s3734_s23  ;;  %v4455_v30 = vstv %s3518_s12  ;;  %s3538_s12 = sld [smem:[#allocation4 + $0x3d]] }
 0x135   : > { %v4463_v4 = vmul.f32 %v4455_v30, %v3913_v8  ;;  %v1197_v35 = vrot.slane %v1191_v28, 5  ;;  %v1179_v28 = vrot.slane %v1172_v15, 5  ;;  %v1274_v15 = vmul.f32 %v4499_v58, %v3984_v42 }
 0x136   : > { %v4413_v5 = vpop.permute.xlu0 %475 }
 0x137   : > { %1058 = vrot.lane.b32.xlu0 %v1055_v14, %s3734_s23  ;;  %v1212_v14 = vmul.f32 %v4455_v30, %v3854_v40  ;;  %v1199_v1 = vsel %vm1095_vm6, %v1197_v35, %v1198_v0  ;;  %v1219_v10 = vrot.slane %v4463_v4, 5  ;;  %v4568_v35 = vstv %s3524_s19  ;;  %s4866_s19 = sld [smem:[#allocation4 + $0x42]] }
 0x138   : > { %937 = vrot.lane.b32.xlu1 %v934_v43, %s3735_s25 }
 0x13a   : > { %v4444_v17 = vpop.permute.xlu0 %489 }
 0x13b   : > { %1079 = vrot.lane.b32.xlu0 %v1076_v51, %s3735_s25  ;;  %v1130_v51 = vmul.f32 %v4373_v50, %v3984_v42  ;;  %v4509_v50 = vmul.f32 %v4499_v58, %v3913_v8  ;;  %v1261_v58 = vsel %vm1239_vm7, %v1258_v20, %v1260_v13 }
 0x13c   : > { %976 = vrot.lane.b32.xlu1 %v973_v53, %s3730_s18  ;;  %v1218_v53 = vrot.slane %v1212_v14, 5 }
 0x13e   : > { %v4474_v43 = vpop.permute.xlu0 %503  ;;  %v1220_v11 = vsel %vm1095_vm6, %v1218_v53, %v1219_v10  ;;  %v1335_v53 = vmul.f32 %v4568_v35, %v3854_v40 }
 0x13f   : > { %1118 = vrot.lane.b32.xlu0 %v1115_v33, %s3730_s18  ;;  %v1117_v33 = vsel %vm1095_vm6, %v1114_v24, %v1116_v47  ;;  %v1279_v24 = vrot.slane %v4509_v50, 6  ;;  %v1214_v47 = vmul.f32 %v4455_v30, %v3984_v42 }
 0x140   : > { %997 = vrot.lane.b32.xlu1 %v994_v62, %s3731_s20  ;;  %v1137_v62 = vrot.slane %v1130_v51, 5  ;;  %v1320_v51 = vrot.slane %v1314_v32, 6  ;;  %v1341_v2 = vrot.slane %v1335_v53, 6  ;;  %v1413_v53 = vstv %s4643_s29  ;;  %s4963_s29 = sld [smem:[#allocation4 + $0x45]] }
 0x141   : > { %v1280_v29 = vsel %vm1239_vm7, %v1278_v16, %v1279_v24 }
 0x142   : > { %v1138_v12 = vsel %vm1095_vm6, %v1135_v38, %v1137_v62  ;;  %v1322_v6 = vsel %vm1239_vm7, %v1320_v51, %v1321_v49  ;;  %v1221_v62 = vrot.slane %v1214_v47, 5 }
 0x143   : > { %1139 = vrot.lane.b32.xlu0 %v1136_v41, %s3731_s20  ;;  %v4522_v41 = vstv %s3522_s15  ;;  %s4825_s15 = sld [smem:[#allocation4 + $0x7]] }
 0x144   : > { %1018 = vrot.lane.b32.xlu1 %v1015_v9, %s3732_s21  ;;  %v4532_v61 = vmul.f32 %v4522_v41, %v3913_v8  ;;  %v1222_v44 = vsel %vm1095_vm6, %v1219_v10, %v1221_v62  ;;  %v1385_v10 = vstv %s4603_s26  ;;  %s4922_s26 = sld [smem:[#allocation4 + $0xe]] }
 0x146   : > { %v1300_v38 = vrot.slane %v4532_v61, 6 }
 0x147   : > { %1160 = vrot.lane.b32.xlu0 %v1157_v21, %s3732_s21  ;;  %v1293_v21 = vmul.f32 %v4522_v41, %v3854_v40 }
 0x148   : > { %1039 = vrot.lane.b32.xlu1 %v1036_v22, %s3733_s22 }
 0x14b   : > { %1181 = vrot.lane.b32.xlu0 %v1178_v31, %s3733_s22  ;;  %v1193_v31 = vmul.f32 %v4434_v18, %v3984_v42  ;;  %v4578_v18 = vmul.f32 %v4568_v35, %v3913_v8 }
 0x14c   : > { %1060 = vrot.lane.b32.xlu1 %v1057_v27, %s3734_s23  ;;  %v1299_v27 = vrot.slane %v1293_v21, 6 }
 0x14e   : > { %v4478_v45 = vpop.permute.xlu1 %435  ;;  %v1301_v48 = vsel %vm1239_vm7, %v1299_v27, %v1300_v38 }
 0x14f   : > { %1202 = vrot.lane.b32.xlu0 %v1199_v1, %s3734_s23  ;;  %v1180_v1 = vsel %vm1095_vm6, %v1177_v63, %v1179_v28  ;;  %v1342_v63 = vrot.slane %v4578_v18, 6  ;;  %v1281_v28 = vrot.slane %v1274_v15, 6  ;;  %v4723_v15 = vstv %s3534_s6  ;;  %s5067_s6 = sld [smem:[#allocation4 + $0x49]] }
 0x150   : > { %1081 = vrot.lane.b32.xlu1 %v1078_v46, %s3735_s25  ;;  %v1200_v46 = vrot.slane %v1193_v31, 5  ;;  %v1295_v31 = vmul.f32 %v4522_v41, %v3984_v42  ;;  %v1316_v41 = vmul.f32 %v4545_v23, %v3984_v42  ;;  %v1337_v23 = vmul.f32 %v4568_v35, %v3984_v42 }
 0x151   : > { %v4497_v55 = vpop.permute.xlu0 %542  ;;  %v1343_v56 = vsel %vm1239_vm7, %v1341_v2, %v1342_v63  ;;  %v1282_v37 = vsel %vm1239_vm7, %v1279_v24, %v1281_v28  ;;  %v4730_v18 = vmul.f32 %v4723_v15, %v4711_v7 }
 0x152   : > { %v4501_v59 = vpop.permute.xlu1 %449  ;;  %v1201_v40 = vsel %vm1095_vm6, %v1198_v0, %v1200_v46  ;;  %v1302_v20 = vrot.slane %v1295_v31, 6  ;;  %v1323_v24 = vrot.slane %v1316_v41, 6 }
 0x153   : > { %1223 = vrot.lane.b32.xlu0 %v1220_v11, %s3735_s25  ;;  %v4591_v11 = vstv %s3525_s2  ;;  %s4900_s2 = sld [smem:[#allocation4 + $0x43]] }
 0x154   : > { %1120 = vrot.lane.b32.xlu1 %v1117_v33, %s3730_s18  ;;  %v4601_v30 = vmul.f32 %v4591_v11, %v3913_v8  ;;  %v1356_v8 = vmul.f32 %v4612_v3, %v4591_v11  ;;  %v1303_v50 = vsel %vm1239_vm7, %v1300_v38, %v1302_v20  ;;  %v1324_v61 = vsel %vm1239_vm7, %v1321_v49, %v1323_v24 }
 0x155   : > { %v4520_v57 = vpop.permute.xlu0 %563  ;;  %v1344_v38 = vrot.slane %v1337_v23, 6  ;;  %v1358_v35 = vmul.f32 %v4591_v11, %v3984_v42  ;;  %v4764_v24 = vstv %s3536_s9  ;;  %s5130_s9 = sld [smem:[#allocation4 + $0x4b]] }
 0x156   : > { %v4524_v9 = vpop.permute.xlu1 %463  ;;  %v1363_v0 = vrot.slane %v4601_v30, 6  ;;  %v1362_v16 = vrot.slane %v1356_v8, 6  ;;  %v1387_v30 = vmul.f32 %v1385_v10, %v4711_v7 }
 0x157   : > { %1262 = vrot.lane.b32.xlu0 %v1259_v39, %s3730_s18  ;;  %v1345_v42 = vsel %vm1239_vm7, %v1342_v63, %v1344_v38  ;;  %v1365_v49 = vrot.slane %v1358_v35, 6  ;;  %v4777_v38 = vmul.f32 %v4764_v24, %v4711_v7 }
 0x158   : > { %1141 = vrot.lane.b32.xlu1 %v1138_v12, %s3731_s20  ;;  %v1364_v4 = vsel %vm1239_vm7, %v1362_v16, %v1363_v0 }
 0x159   : > { %v4543_v22 = vpop.permute.xlu0 %584  ;;  %v1366_v63 = vsel %vm1239_vm7, %v1363_v0, %v1365_v49  ;;  %v7148_v0 = vrot.slane %v4730_v18, 1  ;;  %v4785_v49 = vstv %s3537_s10  ;;  %s5166_s10 = sld [smem:[#allocation4 + $0x4c]] }
 0x15a   : > { %v4547_v25 = vpop.permute.xlu1 %477 }
 0x15b   : > { %1283 = vrot.lane.b32.xlu0 %v1280_v29, %s3731_s20  ;;  %v4635_v29 = vld [vmem:[#allocation2 + $0x18] sm:$0xff] }
 0x15c   : > { %1162 = vrot.lane.b32.xlu1 %v1159_v26, %s3732_s21  ;;  %v1386_v32 = vmul.f32 %v1385_v10, %v4635_v29  ;;  %v1428_v8 = vmul.f32 %v1427_v60, %v4635_v29 }
 0x15d   : > { %v4566_v34 = vpop.permute.xlu0 %605 }
 0x15e   : > { %v4570_v14 = vpop.permute.xlu1 %491 }
 0x15f   : > { %1304 = vrot.lane.b32.xlu0 %v1301_v48, %s3732_s21 }
 0x160   : > { %1183 = vrot.lane.b32.xlu1 %v1180_v1, %s3733_s22  ;;  %v1399_v1 = vstv %s4624_s28  ;;  %s4933_s28 = sld [smem:[#allocation4 + $0x44]] }
 0x161   : > { %v4589_v54 = vpop.permute.xlu0 %626  ;;  %v1400_v47 = vmul.f32 %v1399_v1, %v4635_v29 }
 0x162   : > { %v4593_v33 = vpop.permute.xlu1 %505 }
 0x163   : > { %1325 = vrot.lane.b32.xlu0 %v1322_v6, %s3733_s22 }
 0x164   : > { %1204 = vrot.lane.b32.xlu1 %v1201_v40, %s3734_s23  ;;  %v1414_v40 = vmul.f32 %v1413_v53, %v4635_v29 }
 0x165   : > { %v4616_v39 = vpop.permute.xlu0 %647 }
 0x166   : > { %v4618_v12 = vpop.permute.xlu1 %544 }
 0x167   : > { %1346 = vrot.lane.b32.xlu0 %v1343_v56, %s3734_s23 }
 0x168   : > { %1225 = vrot.lane.b32.xlu1 %v1222_v44, %s3735_s25  ;;  %v1441_v44 = vstv %s4677_s5  ;;  %s5032_s5 = sld [smem:[#allocation4 + $0x48]] }
 0x169   : > { %v4633_v21 = vpop.permute.xlu0 %686  ;;  %v1442_v13 = vmul.f32 %v1441_v44, %v4635_v29 }
 0x16a   : > { %v4637_v26 = vpop.permute.xlu1 %565 }
 0x16b   : > { %1367 = vrot.lane.b32.xlu0 %v1364_v4, %s3735_s25  ;;  %v7150_v4 = vstv %s4694_s7 }
 0x16c   : > { %1264 = vrot.lane.b32.xlu1 %v1261_v58, %s3730_s18  ;;  %v1487_v58 = vmul.f32 %v4723_v15, %v4635_v29  ;;  %v1456_v31 = vmul.f32 %v7150_v4, %v4635_v29  ;;  %v4835_v4 = vstv %s3539_s13  ;;  %s5233_s13 = sld [smem:[#allocation4 + $0x4f]] }
 0x16d   : > { %v4652_v27 = vpop.permute.xlu0 %707 }
 0x16e   : > { %v4657_v48 = vpop.permute.xlu1 %586  ;;  %v1493_v41 = vrot.slane %v1487_v58, 1  ;;  %v7149_v58 = vrot.slane %v4777_v38, 1 }
 0x16f   : > { %1390 = vrot.lane.b32.xlu0 %v1386_v32, %s3730_s18  ;;  %v4744_v32 = vstv %s3535_s8  ;;  %s5101_s8 = sld [smem:[#allocation4 + $0x4a]] }
 0x170   : > { %1285 = vrot.lane.b32.xlu1 %v1282_v37, %s3731_s20  ;;  %v4754_v20 = vmul.f32 %v4744_v32, %v4711_v7  ;;  %v1495_v23 = vsel %vm519_vm1, %v1493_v41, %v7148_v0  ;;  %v1550_v41 = vmul.f32 %v4785_v49, %v4635_v29 }
 0x171   : > { %v4669_v46 = vpop.permute.xlu0 %728 }
 0x172   : > { %v4674_v51 = vpop.permute.xlu1 %607  ;;  %v1556_v0 = vrot.slane %v1550_v41, 1  ;;  %v1443_v41 = vmul.f32 %v1441_v44, %v4711_v7  ;;  %v1592_v44 = vmul.f32 %v4835_v4, %v4635_v29 }
 0x173   : > { %1404 = vrot.lane.b32.xlu0 %v1400_v47, %s3731_s20  ;;  %v1508_v47 = vmul.f32 %v4744_v32, %v4635_v29 }
 0x174   : > { %1306 = vrot.lane.b32.xlu1 %v1303_v50, %s3732_s21 }
 0x175   : > { %v4686_v6 = vpop.permute.xlu0 %749  ;;  %v1514_v35 = vrot.slane %v1508_v47, 1  ;;  %v7151_v47 = vstv %s4757_s11 }
 0x176   : > { %v4691_v62 = vpop.permute.xlu1 %628 }
 0x177   : > { %1418 = vrot.lane.b32.xlu0 %v1414_v40, %s3732_s21  ;;  %v1401_v40 = vmul.f32 %v1399_v1, %v4711_v7 }
 0x178   : > { %1327 = vrot.lane.b32.xlu1 %v1324_v61, %s3733_s22  ;;  %v7147_v61 = vrot.slane %v4754_v20, 1 }
 0x179   : > { %v4703_v2 = vpop.permute.xlu0 %770 }
 0x17a   : > { %v4708_v56 = vpop.permute.xlu1 %649 }
 0x17b   : > { %1432 = vrot.lane.b32.xlu0 %v1428_v8, %s3733_s22  ;;  %v1529_v8 = vmul.f32 %v4764_v24, %v4635_v29 }
 0x17c   : > { %1348 = vrot.lane.b32.xlu1 %v1345_v42, %s3734_s23 }
 0x17d   : > { %v4718_v11 = vpop.permute.xlu0 %791 }
 0x17e   : > { %v4725_v16 = vpop.permute.xlu1 %688 }
 0x17f   : > { %1446 = vrot.lane.b32.xlu0 %v1442_v13, %s3734_s23  ;;  %v1516_v13 = vsel %vm519_vm1, %v1514_v35, %v7147_v61  ;;  %v4823_v61 = vld [vmem:[#allocation2 + $0x28] sm:$0x3f] }
 0x180   : > { %1369 = vrot.lane.b32.xlu1 %v1366_v63, %s3735_s25  ;;  %v1415_v63 = vmul.f32 %v1413_v53, %v4711_v7 }
 0x181   : > { %v4739_v28 = vpop.permute.xlu0 %830 }
 0x182   : > { %v4746_v37 = vpop.permute.xlu1 %709 }
 0x183   : > { %7165 = vst [vmem:[#allocation7_spill] sm:$0xff] %v4746_v37  ;;  %1460 = vrot.lane.b32.xlu0 %v1456_v31, %s3735_s25  ;;  %v4798_v31 = vmul.f32 %v4785_v49, %v4711_v7  ;;  %v1531_v37 = vmul.f32 %v4764_v24, %v4823_v61 }
 0x184   : > { %1392 = vrot.lane.b32.xlu1 %v1387_v30, %s3730_s18  ;;  %v1535_v30 = vrot.slane %v1529_v8, 1  ;;  %v1429_v8 = vmul.f32 %v1427_v60, %v4711_v7  ;;  %v423_v60 = vmul.f32 %v4612_v3, %v7151_v47  ;;  %v4850_v47 = vmul.f32 %v4835_v4, %v4711_v7 }
 0x185   : > { %v4762_v50 = vpop.permute.xlu0 %851 }
 0x186   : > { %v4766_v10 = vpop.permute.xlu1 %730  ;;  %v1537_v35 = vsel %vm519_vm1, %v1535_v30, %v7149_v58 }
 0x187   : > { %7166 = vst [vmem:[#allocation8_spill] sm:$0xff] %v4766_v10  ;;  %1498 = vrot.lane.b32.xlu0 %v1495_v23, %s3730_s18  ;;  %v4864_v10 = vstv %s3541_s14  ;;  %s5263_s14 = sld [smem:[#allocation4 + $0x50]] }
 0x188   : > { %1406 = vrot.lane.b32.xlu1 %v1401_v40, %s3731_s20  ;;  %v4807_v40 = vstv %s3538_s12  ;;  %s5222_s12 = sld [smem:[#allocation4 + $0x1c]] }
 0x189   : > { %v4783_v42 = vpop.permute.xlu0 %872  ;;  %v1571_v30 = vmul.f32 %v4807_v40, %v4635_v29 }
 0x18a   : > { %7167 = vst [vmem:[#allocation9_spill] sm:$0xff] %v4783_v42  ;;  %v4787_v1 = vpop.permute.xlu1 %751 }
 0x18b   : > { %7168 = vst [vmem:[#allocation10_spill] sm:$0xff] %v4787_v1  ;;  %1519 = vrot.lane.b32.xlu0 %v1516_v13, %s3731_s20  ;;  %v7152_v13 = vrot.slane %v4798_v31, 1  ;;  %v1489_v1 = vmul.f32 %v4723_v15, %v4823_v61 }
 0x18c   : > { %1420 = vrot.lane.b32.xlu1 %v1415_v63, %s3732_s21  ;;  %v4820_v63 = vmul.f32 %v4807_v40, %v4711_v7 }
 0x18d   : > { %v4805_v23 = vpop.permute.xlu0 %893 }
 0x18e   : > { %7169 = vst [vmem:[#allocation11_spill] sm:$0xff] %v4805_v23  ;;  %v4809_v53 = vpop.permute.xlu1 %772 }
 0x18f   : > { %7170 = vst [vmem:[#allocation12_spill] sm:$0xff] %v4809_v53  ;;  %1540 = vrot.lane.b32.xlu0 %v1537_v35, %s3732_s21  ;;  %v7174_v53 = vstv %s4694_s7  ;;  %s5087_s7 = sld [smem:[#allocation4 + $0x15]] }
 0x190   : > { %1434 = vrot.lane.b32.xlu1 %v1429_v8, %s3733_s22  ;;  %v1558_v8 = vsel %vm519_vm1, %v1556_v0, %v7152_v13  ;;  %v1577_v0 = vrot.slane %v1571_v30, 1 }
 0x191   : > { %v4833_v58 = vpop.permute.xlu0 %914 }
 0x192   : > { %7171 = vst [vmem:[#allocation13_spill] sm:$0xff] %v4833_v58  ;;  %v4839_v35 = vpop.permute.xlu1 %793  ;;  %v1457_v58 = vmul.f32 %v7174_v53, %v4711_v7  ;;  %v1496_v53 = vrot.slane %v1489_v1, 1 }
 0x193   : > { %7172 = vst [vmem:[#allocation14_spill] sm:$0xff] %v4839_v35  ;;  %1561 = vrot.lane.b32.xlu0 %v1558_v8, %s3733_s22  ;;  %v439_v35 = vadd.f32 %v4322_v19, %v423_v60  ;;  %v7176_v60 = vrot.slane %v4820_v63, 1 }
 0x194   : > { %1448 = vrot.lane.b32.xlu1 %v1443_v41, %s3734_s23  ;;  %v4877_v41 = vmul.f32 %v4864_v10, %v4711_v7 }
 0x195   : > { %v4859_v13 = vpop.permute.xlu0 %935  ;;  %v453_v15 = vadd.f32 %v4352_v36, %v439_v35  ;;  %v1579_v30 = vsel %vm519_vm1, %v1577_v0, %v7176_v60  ;;  %v4884_v35 = vstv %s4825_s15  ;;  %v1630_v0 = vmul.f32 %v4864_v10, %v4635_v29  ;;  %v4889_v60 = vld [vmem:[#allocation2 + $0x8] sm:$0xff]  ;;  %s5296_s15 = sld [smem:[#allocation4 + $0x51]] }
 0x196   : > { %7173 = vst [vmem:[#allocation15_spill] sm:$0xff] %v4859_v13  ;;  %v4869_v19 = vpop.permute.xlu1 %832  ;;  %v1510_v13 = vmul.f32 %v4744_v32, %v4823_v61  ;;  %v4893_v8 = vmul.f32 %v4889_v60, %v4884_v35 }
 0x197   : > { %7175 = vst [vmem:[#allocation16_spill] sm:$0xff] %v4869_v19  ;;  %1582 = vrot.lane.b32.xlu0 %v1579_v30, %s3734_s23  ;;  %v467_v36 = vadd.f32 %v4383_v52, %v453_v15  ;;  %v1598_v19 = vrot.slane %v1592_v44, 1  ;;  %v4898_v30 = vstv %s4837_s16  ;;  %s5332_s16 = sld [smem:[#allocation4 + $0x52]] }
 0x198   : > { %1462 = vrot.lane.b32.xlu1 %v1457_v58, %s3735_s25  ;;  %v7179_v58 = vrot.slane %v4850_v47, 1  ;;  %v4911_v23 = vmul.f32 %v4898_v30, %v4711_v7  ;;  %v1651_v15 = vmul.f32 %v4898_v30, %v4635_v29 }
 0x199   : > { %v4895_v1 = vpop.permute.xlu0 %974  ;;  %v481_v52 = vadd.f32 %v4413_v5, %v467_v36  ;;  %v7180_v5 = vrot.slane %v4730_v18, 1  ;;  %v4931_v18 = vstv %s4866_s19  ;;  %s5365_s19 = sld [smem:[#allocation4 + $0x53]] }
 0x19a   : > { %7177 = vst [vmem:[#allocation17_spill] sm:$0xff] %v4895_v1  ;;  %v4903_v32 = vpop.permute.xlu1 %853  ;;  %v1600_v44 = vsel %vm519_vm1, %v1598_v19, %v7179_v58  ;;  %v513_v1 = vmul.f32 %v4612_v3, %v4884_v35  ;;  %v1636_v58 = vrot.slane %v1630_v0, 2  ;;  %v7184_v0 = vrot.slane %v4893_v8, 1 }
 0x19b   : > { %7178 = vst [vmem:[#allocation18_spill] sm:$0xff] %v4903_v32  ;;  %1603 = vrot.lane.b32.xlu0 %v1600_v44, %s3735_s25  ;;  %v1497_v36 = vsel %vm519_vm1, %v7180_v5, %v1496_v53  ;;  %v1517_v32 = vrot.slane %v1510_v13, 1  ;;  %v495_v19 = vadd.f32 %v4444_v17, %v481_v52  ;;  %v7182_v13 = vrot.slane %v4877_v41, 2 }
 0x19c   : > { %1500 = vrot.lane.b32.xlu1 %v1497_v36, %s3730_s18  ;;  %v4944_v52 = vmul.f32 %v4931_v18, %v4711_v7  ;;  %v520_v5 = vrot.slane %v513_v1, 1  ;;  %v7183_v36 = vrot.slane %v4754_v20, 1  ;;  %v4961_v20 = vstv %s4900_s2  ;;  %s5385_s2 = sld [smem:[#allocation4 + $0x23]] }
 0x19d   : > { %v4928_v42 = vpop.permute.xlu0 %995  ;;  %v509_v24 = vadd.f32 %v4474_v43, %v495_v19  ;;  %v1638_v53 = vsel %vm663_vm3, %v1636_v58, %v7182_v13  ;;  %v1538_v43 = vrot.slane %v1531_v37, 1  ;;  %v1552_v19 = vmul.f32 %v4785_v49, %v4823_v61 }
 0x19e   : > { %v4936_v17 = vpop.permute.xlu1 %874  ;;  %v1518_v44 = vsel %vm519_vm1, %v7183_v36, %v1517_v32  ;;  %v1657_v58 = vrot.slane %v1651_v15, 2  ;;  %v1672_v13 = vmul.f32 %v4931_v18, %v4635_v29  ;;  %v522_v1 = vsel %vm519_vm1, %v520_v5, %v7184_v0 }
 0x19f   : > { %7181 = vst [vmem:[#allocation19_spill] sm:$0xff] %v4936_v17  ;;  %1641 = vrot.lane.b32.xlu0 %v1638_v53, %s3730_s18  ;;  %v527_v37 = vadd.f32 %v522_v1, %v509_v24  ;;  %v7186_v32 = vrot.slane %v4911_v23, 2  ;;  %v4973_v53 = vmul.f32 %v4961_v20, %v4711_v7  ;;  %v7187_v0 = vrot.slane %v4777_v38, 1 }
 0x1a0   : > { %1521 = vrot.lane.b32.xlu1 %v1518_v44, %s3731_s20  ;;  %v1559_v24 = vrot.slane %v1552_v19, 1  ;;  %v1573_v36 = vmul.f32 %v4807_v40, %v4823_v61  ;;  %v7188_v44 = vstv %s4757_s11  ;;  %v7190_v19 = vrot.slane %v4944_v52, 2  ;;  %s5201_s11 = sld [smem:[#allocation4 + $0x4e]] }
 0x1a1   : > { %v4958_v17 = vpop.permute.xlu0 %1016  ;;  %v1659_v15 = vsel %vm663_vm3, %v1657_v58, %v7186_v32  ;;  %v1539_v5 = vsel %vm519_vm1, %v7187_v0, %v1538_v43  ;;  %v548_v1 = vadd.f32 %v4497_v55, %v527_v37  ;;  %v1678_v58 = vrot.slane %v1672_v13, 2 }
 0x1a2   : > { %v4965_v49 = vpop.permute.xlu1 %895  ;;  %v1693_v32 = vmul.f32 %v4961_v20, %v4635_v29  ;;  %v4994_v43 = vstv %s4933_s28  ;;  %s5428_s28 = sld [smem:[#allocation4 + $0x56]] }
 0x1a3   : > { %7185 = vst [vmem:[#allocation20_spill] sm:$0xff] %v4965_v49  ;;  %1662 = vrot.lane.b32.xlu0 %v1659_v15, %s3731_s20  ;;  %v424_v49 = vmul.f32 %v4889_v60, %v7188_v44  ;;  %v4989_v15 = vstv %s4922_s26  ;;  %v569_v40 = vadd.f32 %v4520_v57, %v548_v1  ;;  %v1680_v13 = vsel %vm663_vm3, %v1678_v58, %v7190_v19  ;;  %s5399_s26 = sld [smem:[#allocation4 + $0x55]] }
 0x1a4   : > { %1542 = vrot.lane.b32.xlu1 %v1539_v5, %s3732_s21  ;;  %v5007_v44 = vmul.f32 %v4994_v43, %v4711_v7  ;;  %v7191_v5 = vrot.slane %v4798_v31, 1  ;;  %v1580_v1 = vrot.slane %v1573_v36, 1  ;;  %v1699_v19 = vrot.slane %v1693_v32, 2 }
 0x1a5   : > { %v4991_v38 = vpop.permute.xlu0 %1037  ;;  %v440_v0 = vadd.f32 %v4478_v45, %v424_v49  ;;  %v590_v58 = vadd.f32 %v4543_v22, %v569_v40  ;;  %v1714_v37 = vmul.f32 %v4994_v43, %v4635_v29  ;;  %v657_v49 = vmul.f32 %v4612_v3, %v4989_v15 }
 0x1a6   : > { %v4999_v55 = vpop.permute.xlu1 %916  ;;  %v1560_v57 = vsel %vm519_vm1, %v7191_v5, %v1559_v24  ;;  %v5025_v31 = vmul.f32 %v4889_v60, %v4989_v15  ;;  %v7192_v32 = vrot.slane %v4973_v53, 2  ;;  %v7193_v5 = vrot.slane %v4820_v63, 1 }
 0x1a7   : > { %7189 = vst [vmem:[#allocation21_spill] sm:$0xff] %v4999_v55  ;;  %1683 = vrot.lane.b32.xlu0 %v1680_v13, %s3732_s21  ;;  %v1594_v55 = vmul.f32 %v4835_v4, %v4823_v61  ;;  %v454_v45 = vadd.f32 %v4501_v59, %v440_v0  ;;  %v5030_v4 = vstv %s4963_s29  ;;  %v611_v22 = vadd.f32 %v4566_v34, %v590_v58  ;;  %s5464_s29 = sld [smem:[#allocation4 + $0x57]] }
 0x1a8   : > { %1563 = vrot.lane.b32.xlu1 %v1560_v57, %s3733_s22  ;;  %v1701_v59 = vsel %vm663_vm3, %v1699_v19, %v7192_v32  ;;  %v5043_v13 = vmul.f32 %v5030_v4, %v4711_v7  ;;  %v1581_v34 = vsel %vm519_vm1, %v7193_v5, %v1580_v1  ;;  %v1632_v58 = vmul.f32 %v4864_v10, %v4823_v61  ;;  %v5053_v32 = vld [vmem:[#allocation2 + $0x10] sm:$0x3f] }
 0x1a9   : > { %v5027_v24 = vpop.permute.xlu0 %1058  ;;  %v468_v0 = vadd.f32 %v4524_v9, %v454_v45  ;;  %v1601_v57 = vrot.slane %v1594_v55, 1  ;;  %v632_v19 = vadd.f32 %v4589_v54, %v611_v22  ;;  %v515_v40 = vmul.f32 %v5053_v32, %v4884_v35 }
 0x1aa   : > { %v5035_v36 = vpop.permute.xlu1 %937  ;;  %v1720_v9 = vrot.slane %v1714_v37, 2  ;;  %v1735_v45 = vmul.f32 %v5030_v4, %v4635_v29  ;;  %v664_v1 = vrot.slane %v657_v49, 2  ;;  %v7153_v55 = vrot.slane %v5025_v31, 2 }
 0x1ab   : > { %1704 = vrot.lane.b32.xlu0 %v1701_v59, %s3733_s22  ;;  %v482_v63 = vadd.f32 %v4547_v25, %v468_v0  ;;  %v5065_v10 = vstv %s4996_s30  ;;  %v653_v54 = vadd.f32 %v4616_v39, %v632_v19  ;;  %v7194_v37 = vrot.slane %v5007_v44, 2  ;;  %s5499_s30 = sld [smem:[#allocation4 + $0x58]] }
 0x1ac   : > { %1584 = vrot.lane.b32.xlu1 %v1581_v34, %s3734_s23  ;;  %v5078_v49 = vmul.f32 %v5065_v10, %v4711_v7  ;;  %v7195_v5 = vrot.slane %v4850_v47, 1  ;;  %v1639_v34 = vrot.slane %v1632_v58, 2  ;;  %v1653_v19 = vmul.f32 %v4898_v30, %v4823_v61 }
 0x1ad   : > { %v5062_v59 = vpop.permute.xlu0 %1079  ;;  %v1722_v22 = vsel %vm663_vm3, %v1720_v9, %v7194_v37  ;;  %v496_v0 = vadd.f32 %v4570_v14, %v482_v63  ;;  %v523_v9 = vrot.slane %v515_v40, 1  ;;  %v1741_v37 = vrot.slane %v1735_v45, 2 }
 0x1ae   : > { %v5070_v35 = vpop.permute.xlu1 %976  ;;  %v1602_v39 = vsel %vm519_vm1, %v7195_v5, %v1601_v57  ;;  %v1773_v25 = vmul.f32 %v5065_v10, %v4635_v29  ;;  %v666_v47 = vsel %vm663_vm3, %v664_v1, %v7153_v55  ;;  %v5099_v58 = vstv %s5032_s5  ;;  %s5520_s5 = sld [smem:[#allocation4 + $0x2a]] }
 0x1af   : > { %1725 = vrot.lane.b32.xlu0 %v1722_v22, %s3734_s23  ;;  %v510_v14 = vadd.f32 %v4593_v33, %v496_v0  ;;  %v671_v30 = vadd.f32 %v666_v47, %v653_v54  ;;  %v7196_v45 = vrot.slane %v5043_v13, 2  ;;  %v1780_v33 = vrot.slane %v5078_v49, 3 }
 0x1b0   : > { %1605 = vrot.lane.b32.xlu1 %v1602_v39, %s3735_s25  ;;  %v5111_v22 = vmul.f32 %v5099_v58, %v4711_v7  ;;  %v7197_v1 = vrot.slane %v4877_v41, 2  ;;  %v1660_v5 = vrot.slane %v1653_v19, 2  ;;  %v1674_v54 = vmul.f32 %v4931_v18, %v4823_v61 }
 0x1b1   : > { %v5096_v57 = vpop.permute.xlu0 %1118  ;;  %v1743_v63 = vsel %vm663_vm3, %v1741_v37, %v7196_v45  ;;  %v7198_v39 = vrot.slane %v4893_v8, 1  ;;  %v1779_v47 = vrot.slane %v1773_v25, 3  ;;  %v1794_v45 = vmul.f32 %v5099_v58, %v4635_v29 }
 0x1b2   : > { %v5103_v40 = vpop.permute.xlu1 %997  ;;  %v1640_v0 = vsel %vm663_vm3, %v7197_v1, %v1639_v34  ;;  %v5128_v41 = vstv %s5067_s6  ;;  %v692_v18 = vadd.f32 %v4633_v21, %v671_v30  ;;  %v7154_v25 = vrot.slane %v5111_v22, 3  ;;  %s5531_s6 = sld [smem:[#allocation4 + $0x59]] }
 0x1b3   : > { %1746 = vrot.lane.b32.xlu0 %v1743_v63, %s3735_s25  ;;  %v524_v37 = vsel %vm519_vm1, %v7198_v39, %v523_v9  ;;  %v1781_v8 = vsel %vm807_vm4, %v1779_v47, %v1780_v33  ;;  %v5141_v19 = vmul.f32 %v5128_v41, %v4711_v7  ;;  %v7199_v9 = vrot.slane %v4911_v23, 2 }
 0x1b4   : > { %1643 = vrot.lane.b32.xlu1 %v1640_v0, %s3730_s18  ;;  %v528_v63 = vadd.f32 %v524_v37, %v510_v14  ;;  %v1681_v21 = vrot.slane %v1674_v54, 2  ;;  %v1695_v30 = vmul.f32 %v4961_v20, %v4823_v61  ;;  %v713_v1 = vadd.f32 %v4652_v27, %v692_v18 }
 0x1b5   : > { %v5125_v55 = vpop.permute.xlu0 %1139  ;;  %v1661_v14 = vsel %vm663_vm3, %v7199_v9, %v1660_v5  ;;  %v5151_v0 = vstv %s5087_s7  ;;  %v1800_v39 = vrot.slane %v1794_v45, 3  ;;  %v1815_v37 = vmul.f32 %v5128_v41, %v4635_v29  ;;  %s5563_s7 = sld [smem:[#allocation4 + $0x5a]] }
 0x1b6   : > { %v5133_v34 = vpop.permute.xlu1 %1018  ;;  %v549_v47 = vadd.f32 %v4618_v12, %v528_v63  ;;  %v5159_v23 = vmul.f32 %v4889_v60, %v5151_v0  ;;  %v5164_v54 = vstv %s5101_s8  ;;  %v734_v27 = vadd.f32 %v4669_v46, %v713_v1  ;;  %s5596_s8 = sld [smem:[#allocation4 + $0x5c]] }
 0x1b7   : > { %1784 = vrot.lane.b32.xlu0 %v1781_v8, %s3730_s18  ;;  %v1802_v45 = vsel %vm807_vm4, %v1800_v39, %v7154_v25  ;;  %v7155_v12 = vrot.slane %v5141_v19, 3  ;;  %v5177_v63 = vmul.f32 %v5164_v54, %v4711_v7  ;;  %v7200_v8 = vrot.slane %v4944_v52, 2 }
 0x1b8   : > { %1664 = vrot.lane.b32.xlu1 %v1661_v14, %s3731_s20  ;;  %v570_v18 = vadd.f32 %v4637_v26, %v549_v47  ;;  %v1702_v9 = vrot.slane %v1695_v30, 2  ;;  %v1716_v14 = vmul.f32 %v4994_v43, %v4823_v61  ;;  %v755_v1 = vadd.f32 %v4686_v6, %v734_v27 }
 0x1b9   : > { %v5161_v5 = vpop.permute.xlu0 %1160  ;;  %v1682_v46 = vsel %vm663_vm3, %v7200_v8, %v1681_v21  ;;  %v801_v39 = vmul.f32 %v4612_v3, %v5151_v0  ;;  %v1821_v25 = vrot.slane %v1815_v37, 3  ;;  %v1836_v26 = vmul.f32 %v5164_v54, %v4635_v29 }
 0x1ba   : > { %v5169_v20 = vpop.permute.xlu1 %1039  ;;  %v591_v47 = vadd.f32 %v4657_v48, %v570_v18  ;;  %v659_v52 = vmul.f32 %v5053_v32, %v4989_v15  ;;  %v7156_v21 = vrot.slane %v5159_v23, 3  ;;  %v5199_v43 = vstv %s5130_s9  ;;  %s5631_s9 = sld [smem:[#allocation4 + $0x5d]] }
 0x1bb   : > { %1805 = vrot.lane.b32.xlu0 %v1802_v45, %s3731_s20  ;;  %v776_v6 = vadd.f32 %v4703_v2, %v755_v1  ;;  %v1823_v37 = vsel %vm807_vm4, %v1821_v25, %v7155_v12  ;;  %v7160_v48 = vrot.slane %v5177_v63, 3  ;;  %v5212_v15 = vmul.f32 %v5199_v43, %v4711_v7 }
 0x1bc   : > { %1685 = vrot.lane.b32.xlu1 %v1682_v46, %s3732_s21  ;;  %v612_v45 = vadd.f32 %v4674_v51, %v591_v47  ;;  %v7201_v18 = vrot.slane %v4973_v53, 2  ;;  %v1723_v8 = vrot.slane %v1716_v14, 2  ;;  %v1737_v46 = vmul.f32 %v5030_v4, %v4823_v61 }
 0x1bd   : > { %v5196_v30 = vpop.permute.xlu0 %1181  ;;  %v808_v25 = vrot.slane %v801_v39, 3  ;;  %v797_v1 = vadd.f32 %v4718_v11, %v776_v6  ;;  %v1842_v12 = vrot.slane %v1836_v26, 3  ;;  %v1857_v51 = vmul.f32 %v5199_v43, %v4635_v29 }
 0x1be   : > { %v5204_v27 = vpop.permute.xlu1 %1060  ;;  %v1703_v2 = vsel %vm663_vm3, %v7201_v18, %v1702_v9  ;;  %v633_v47 = vadd.f32 %v4691_v62, %v612_v45  ;;  %v667_v53 = vrot.slane %v659_v52, 2  ;;  %v5231_v9 = vstv %s5166_s10  ;;  %s5666_s10 = sld [smem:[#allocation4 + $0x5e]] }
 0x1bf   : > { %1826 = vrot.lane.b32.xlu0 %v1823_v37, %s3732_s21  ;;  %v810_v11 = vsel %vm807_vm4, %v808_v25, %v7156_v21  ;;  %v1844_v14 = vsel %vm807_vm4, %v1842_v12, %v7160_v48  ;;  %v7158_v62 = vrot.slane %v5212_v15, 3  ;;  %v5246_v39 = vmul.f32 %v5231_v9, %v4711_v7 }
 0x1c0   : > { %1706 = vrot.lane.b32.xlu1 %v1703_v2, %s3733_s22  ;;  %v654_v26 = vadd.f32 %v4708_v56, %v633_v47  ;;  %v7202_v52 = vrot.slane %v5007_v44, 2  ;;  %v1744_v45 = vrot.slane %v1737_v46, 2  ;;  %v1775_v18 = vmul.f32 %v5065_v10, %v4823_v61 }
 0x1c1   : > { %v5228_v37 = vpop.permute.xlu0 %1202  ;;  %v815_v2 = vadd.f32 %v810_v11, %v797_v1  ;;  %v1863_v12 = vrot.slane %v1857_v51, 3  ;;  %v1878_v25 = vmul.f32 %v5231_v9, %v4635_v29  ;;  %v5261_v56 = vstv %s5201_s11  ;;  %s5698_s11 = sld [smem:[#allocation4 + $0x5f]] }
 0x1c2   : > { %v5238_v4 = vpop.permute.xlu1 %1081  ;;  %v1724_v6 = vsel %vm663_vm3, %v7202_v52, %v1723_v8  ;;  %v7203_v44 = vrot.slane %v5025_v31, 2  ;;  %v7157_v1 = vrot.slane %v5246_v39, 3  ;;  %v5276_v51 = vmul.f32 %v5261_v56, %v4711_v7 }
 0x1c3   : > { %1847 = vrot.lane.b32.xlu0 %v1844_v14, %s3733_s22  ;;  %v1865_v46 = vsel %vm807_vm4, %v1863_v12, %v7158_v62  ;;  %v7204_v31 = vrot.slane %v5043_v13, 2  ;;  %v1782_v11 = vrot.slane %v1775_v18, 3  ;;  %v1796_v14 = vmul.f32 %v5099_v58, %v4823_v61 }
 0x1c4   : > { %1727 = vrot.lane.b32.xlu1 %v1724_v6, %s3734_s23  ;;  %v668_v8 = vsel %vm663_vm3, %v7203_v44, %v667_v53  ;;  %v836_v52 = vadd.f32 %v4739_v28, %v815_v2  ;;  %v1884_v6 = vrot.slane %v1878_v25, 3  ;;  %v1916_v12 = vmul.f32 %v5261_v56, %v4635_v29 }
 0x1c5   : > { %v5258_v21 = vpop.permute.xlu0 %1223  ;;  %v672_v47 = vadd.f32 %v668_v8, %v654_v26  ;;  %v1745_v53 = vsel %vm663_vm3, %v7204_v31, %v1744_v45  ;;  %v5289_v44 = vstv %s5222_s12  ;;  %v5294_v8 = vstv %s5233_s13  ;;  %v7205_v31 = vld [vmem:[#allocation9_spill] sm:$0xff]  ;;  %s5719_s12 = sld [smem:[#allocation4 + $0x31]] }
 0x1c6   : > { %v5268_v10 = vpop.permute.xlu1 %1120  ;;  %v857_v13 = vadd.f32 %v4762_v50, %v836_v52  ;;  %v1886_v28 = vsel %vm807_vm4, %v1884_v6, %v7157_v1  ;;  %v7159_v58 = vrot.slane %v5276_v51, 4  ;;  %v5307_v18 = vmul.f32 %v5294_v8, %v4711_v7  ;;  %v7206_v1 = vld [vmem:[#allocation7_spill] sm:$0xff]  ;;  %s5729_s13 = sld [smem:[#allocation4 + $0x60]] }
 0x1c7   : > { %1868 = vrot.lane.b32.xlu0 %v1865_v46, %s3734_s23  ;;  %v693_v2 = vadd.f32 %v4725_v16, %v672_v47  ;;  %v1783_v50 = vsel %vm807_vm4, %v1780_v33, %v1782_v11  ;;  %v1803_v25 = vrot.slane %v1796_v14, 3  ;;  %v1817_v46 = vmul.f32 %v5128_v41, %v4823_v61  ;;  %v7207_v11 = vld [vmem:[#allocation11_spill] sm:$0xff] }
 0x1c8   : > { %1748 = vrot.lane.b32.xlu1 %v1745_v53, %s3735_s25  ;;  %v878_v53 = vadd.f32 %v7205_v31, %v857_v13  ;;  %v1922_v52 = vrot.slane %v1916_v12, 4  ;;  %v1937_v6 = vmul.f32 %v5294_v8, %v4635_v29  ;;  %v945_v47 = vmul.f32 %v4612_v3, %v5289_v44 }
 0x1c9   : > { %v5291_v26 = vpop.permute.xlu0 %1262  ;;  %v714_v16 = vadd.f32 %v7206_v1, %v693_v2  ;;  %v5325_v49 = vmul.f32 %v4889_v60, %v5289_v44  ;;  %v5330_v41 = vstv %s5263_s14  ;;  %v7208_v2 = vld [vmem:[#allocation8_spill] sm:$0xff]  ;;  %v7209_v31 = vrot.slane %v5111_v22, 3  ;;  %s5760_s14 = sld [smem:[#allocation4 + $0x61]] }
 0x1ca   : > { %v5299_v45 = vpop.permute.xlu1 %1141  ;;  %v899_v14 = vadd.f32 %v7207_v11, %v878_v53  ;;  %v1924_v1 = vsel %vm951_vm5, %v1922_v52, %v7159_v58  ;;  %v1824_v11 = vrot.slane %v1817_v46, 3  ;;  %v1838_v62 = vmul.f32 %v5164_v54, %v4823_v61  ;;  %v7210_v52 = vld [vmem:[#allocation13_spill] sm:$0xff]  ;;  %v7212_v54 = vld [vmem:[#allocation15_spill] sm:$0xff] }
 0x1cb   : > { %1889 = vrot.lane.b32.xlu0 %v1886_v28, %s3735_s25  ;;  %v5343_v28 = vmul.f32 %v5330_v41, %v4711_v7  ;;  %v1804_v53 = vsel %vm807_vm4, %v7209_v31, %v1803_v25  ;;  %v803_v48 = vmul.f32 %v5053_v32, %v5151_v0  ;;  %v1943_v13 = vrot.slane %v1937_v6, 4 }
 0x1cc   : > { %1786 = vrot.lane.b32.xlu1 %v1783_v50, %s3730_s18  ;;  %v735_v50 = vadd.f32 %v7208_v2, %v714_v16  ;;  %v920_v58 = vadd.f32 %v7210_v52, %v899_v14  ;;  %v1958_v16 = vmul.f32 %v5330_v41, %v4635_v29  ;;  %v952_v22 = vrot.slane %v945_v47, 4  ;;  %v7215_v52 = vld [vmem:[#allocation12_spill] sm:$0xff] }
 0x1cd   : > { %v5327_v33 = vpop.permute.xlu0 %1283  ;;  %v5363_v31 = vstv %s5296_s15  ;;  %v7214_v6 = vrot.slane %v5307_v18, 4  ;;  %v7216_v25 = vrot.slane %v5141_v19, 3  ;;  %s5819_s15 = sld [smem:[#allocation4 + $0x38]] }
 0x1ce   : > { %v5335_v12 = vpop.permute.xlu1 %1162  ;;  %v941_v14 = vadd.f32 %v7212_v54, %v920_v58  ;;  %v5376_v47 = vmul.f32 %v5363_v31, %v4711_v7  ;;  %v1845_v54 = vrot.slane %v1838_v62, 3  ;;  %v5397_v62 = vstv %s5332_s16  ;;  %s5836_s16 = sld [smem:[#allocation4 + $0x63]] }
 0x1cf   : > { %1927 = vrot.lane.b32.xlu0 %v1924_v1, %s3730_s18  ;;  %v7211_v1 = vld [vmem:[#allocation10_spill] sm:$0xff]  ;;  %v1825_v58 = vsel %vm807_vm4, %v7216_v25, %v1824_v11 }
 0x1d0   : > { %1807 = vrot.lane.b32.xlu1 %v1804_v53, %s3731_s20  ;;  %v756_v2 = vadd.f32 %v7211_v1, %v735_v50  ;;  %v1945_v53 = vsel %vm951_vm5, %v1943_v13, %v7214_v6  ;;  %v811_v13 = vrot.slane %v803_v48, 3  ;;  %v1964_v6 = vrot.slane %v1958_v16, 4 }
 0x1d1   : > { %v5360_v46 = vpop.permute.xlu0 %1304  ;;  %v1979_v50 = vmul.f32 %v5363_v31, %v4635_v29  ;;  %v7220_v16 = vrot.slane %v5343_v28, 4 }
 0x1d2   : > { %v5368_v0 = vpop.permute.xlu1 %1183  ;;  %v777_v1 = vadd.f32 %v7215_v52, %v756_v2  ;;  %v7217_v2 = vld [vmem:[#allocation14_spill] sm:$0xff] }
 0x1d3   : > { %7213 = vst [vmem:[#allocation9_spill] sm:$0xff] %v5368_v0  ;;  %1948 = vrot.lane.b32.xlu0 %v1945_v53, %s3731_s20  ;;  %v1859_v0 = vmul.f32 %v5199_v43, %v4823_v61  ;;  %v7218_v53 = vrot.slane %v5325_v49, 4  ;;  %v1966_v25 = vsel %vm951_vm5, %v1964_v6, %v7220_v16  ;;  %v1985_v16 = vrot.slane %v1979_v50, 4 }
 0x1d4   : > { %1828 = vrot.lane.b32.xlu1 %v1825_v58, %s3732_s21  ;;  %v798_v52 = vadd.f32 %v7217_v2, %v777_v1  ;;  %v5409_v58 = vmul.f32 %v5397_v62, %v4711_v7  ;;  %v2000_v1 = vmul.f32 %v5397_v62, %v4635_v29 }
 0x1d5   : > { %v954_v19 = vsel %vm951_vm5, %v952_v22, %v7218_v53  ;;  %v5394_v11 = vpop.permute.xlu0 %1325  ;;  %v7221_v22 = vrot.slane %v5177_v63, 3  ;;  %v1866_v53 = vrot.slane %v1859_v0, 3  ;;  %v5426_v63 = vstv %s5365_s19  ;;  %v7223_v0 = vld [vmem:[#allocation17_spill] sm:$0xff]  ;;  %s5859_s19 = sld [smem:[#allocation4 + $0x64]] }
 0x1d6   : > { %v959_v43 = vadd.f32 %v954_v19, %v941_v14  ;;  %v5401_v48 = vpop.permute.xlu1 %1204  ;;  %v1880_v14 = vmul.f32 %v5231_v9, %v4823_v61  ;;  %v7222_v19 = vrot.slane %v5159_v23, 3  ;;  %v7225_v23 = vrot.slane %v5376_v47, 4 }
 0x1d7   : > { %7219 = vst [vmem:[#allocation7_spill] sm:$0xff] %v5401_v48  ;;  %1969 = vrot.lane.b32.xlu0 %v1966_v25, %s3732_s21  ;;  %v1846_v2 = vsel %vm807_vm4, %v7221_v22, %v1845_v54  ;;  %v7226_v22 = vrot.slane %v5212_v15, 3 }
 0x1d8   : > { %v812_v6 = vsel %vm807_vm4, %v7222_v19, %v811_v13  ;;  %1849 = vrot.lane.b32.xlu1 %v1846_v2, %s3733_s22  ;;  %v980_v9 = vadd.f32 %v7223_v0, %v959_v43  ;;  %v1987_v50 = vsel %vm951_vm5, %v1985_v16, %v7225_v23  ;;  %v1887_v43 = vrot.slane %v1880_v14, 3  ;;  %v7227_v13 = vld [vmem:[#allocation16_spill] sm:$0xff] }
 0x1d9   : > { %v816_v25 = vadd.f32 %v812_v6, %v798_v52  ;;  %v5423_v48 = vpop.permute.xlu0 %1346  ;;  %v5439_v52 = vmul.f32 %v5426_v63, %v4711_v7  ;;  %v1867_v2 = vsel %vm807_vm4, %v7226_v22, %v1866_v53  ;;  %v1918_v19 = vmul.f32 %v5261_v56, %v4823_v61  ;;  %v7230_v22 = vld [vmem:[#allocation18_spill] sm:$0xff] }
 0x1da   : > { %v5431_v54 = vpop.permute.xlu1 %1225  ;;  %v1001_v6 = vadd.f32 %v4928_v42, %v980_v9  ;;  %v5449_v0 = vstv %s5385_s2  ;;  %v2006_v16 = vrot.slane %v2000_v1, 4  ;;  %v2021_v23 = vmul.f32 %v5426_v63, %v4635_v29  ;;  %s5883_s2 = sld [smem:[#allocation4 + $0x65]] }
 0x1db   : > { %7224 = vst [vmem:[#allocation11_spill] sm:$0xff] %v5431_v54  ;;  %1990 = vrot.lane.b32.xlu0 %v1987_v50, %s3733_s22  ;;  %v837_v50 = vadd.f32 %v7227_v13, %v816_v25  ;;  %v5457_v15 = vmul.f32 %v4889_v60, %v5449_v0  ;;  %v5462_v14 = vstv %s5399_s26  ;;  %v7229_v1 = vrot.slane %v5409_v58, 4  ;;  %s5910_s26 = sld [smem:[#allocation4 + $0x66]] }
 0x1dc   : > { %1870 = vrot.lane.b32.xlu1 %v1867_v2, %s3734_s23  ;;  %v1022_v42 = vadd.f32 %v4958_v17, %v1001_v6  ;;  %v5475_v13 = vmul.f32 %v5462_v14, %v4711_v7  ;;  %v7231_v54 = vrot.slane %v5246_v39, 3  ;;  %v1925_v6 = vrot.slane %v1918_v19, 4 }
 0x1dd   : > { %v5459_v53 = vpop.permute.xlu0 %1367  ;;  %v2008_v9 = vsel %vm951_vm5, %v2006_v16, %v7229_v1  ;;  %v858_v2 = vadd.f32 %v7230_v22, %v837_v50  ;;  %v1089_v1 = vmul.f32 %v4612_v3, %v5449_v0  ;;  %v2027_v25 = vrot.slane %v2021_v23, 4 }
 0x1de   : > { %v5467_v56 = vpop.permute.xlu1 %1264  ;;  %v1888_v17 = vsel %vm807_vm4, %v7231_v54, %v1887_v43  ;;  %v1043_v16 = vadd.f32 %v4991_v38, %v1022_v42  ;;  %v2059_v50 = vmul.f32 %v5462_v14, %v4635_v29  ;;  %v947_v39 = vmul.f32 %v5053_v32, %v5289_v44 }
 0x1df   : > { %7228 = vst [vmem:[#allocation8_spill] sm:$0xff] %v5467_v56  ;;  %2011 = vrot.lane.b32.xlu0 %v2008_v9, %s3734_s23  ;;  %v1939_v56 = vmul.f32 %v5294_v8, %v4823_v61  ;;  %v7232_v9 = vld [vmem:[#allocation19_spill] sm:$0xff]  ;;  %v5497_v8 = vstv %s5428_s28  ;;  %v7234_v19 = vrot.slane %v5439_v52, 4  ;;  %v1960_v54 = vmul.f32 %v5330_v41, %v4823_v61  ;;  %s5932_s28 = sld [smem:[#allocation4 + $0x67]] }
 0x1e0   : > { %1891 = vrot.lane.b32.xlu1 %v1888_v17, %s3735_s25  ;;  %v879_v22 = vadd.f32 %v7232_v9, %v858_v2  ;;  %v1064_v3 = vadd.f32 %v5027_v24, %v1043_v16  ;;  %v5510_v44 = vmul.f32 %v5497_v8, %v4711_v7  ;;  %v7235_v2 = vld [vmem:[#allocation20_spill] sm:$0xff]  ;;  %v7236_v9 = vrot.slane %v5276_v51, 4 }
 0x1e1   : > { %v5494_v43 = vpop.permute.xlu0 %1390  ;;  %v2029_v23 = vsel %vm951_vm5, %v2027_v25, %v7234_v19  ;;  %v1946_v16 = vrot.slane %v1939_v56, 4  ;;  %v1096_v25 = vrot.slane %v1089_v1, 5  ;;  %v2065_v42 = vrot.slane %v2059_v50, 5 }
 0x1e2   : > { %v5502_v38 = vpop.permute.xlu1 %1285  ;;  %v900_v17 = vadd.f32 %v7235_v2, %v879_v22  ;;  %v1926_v24 = vsel %vm951_vm5, %v7236_v9, %v1925_v6  ;;  %v1085_v19 = vadd.f32 %v5062_v59, %v1064_v3  ;;  %v2080_v22 = vmul.f32 %v5497_v8, %v4635_v29 }
 0x1e3   : > { %7233 = vst [vmem:[#allocation13_spill] sm:$0xff] %v5502_v38  ;;  %2032 = vrot.lane.b32.xlu0 %v2029_v23, %s3735_s25  ;;  %v7237_v23 = vld [vmem:[#allocation21_spill] sm:$0xff]  ;;  %v955_v51 = vrot.slane %v947_v39, 4  ;;  %v5529_v56 = vstv %s5464_s29  ;;  %v7238_v41 = vrot.slane %v5457_v15, 5  ;;  %v7239_v1 = vrot.slane %v5475_v13, 5  ;;  %s3583_s29 = sld [smem:[#allocation4 + $0x6a]] }
 0x1e4   : > { %1929 = vrot.lane.b32.xlu1 %v1926_v24, %s3730_s18  ;;  %v921_v2 = vadd.f32 %v7237_v23, %v900_v17  ;;  %v7161_v50 = vrot.slane %v5510_v44, 5  ;;  %v5544_v39 = vmul.f32 %v5529_v56, %v4711_v7  ;;  %v7240_v17 = vrot.slane %v5307_v18, 4 }
 0x1e5   : > { %v5526_v38 = vpop.permute.xlu0 %1404  ;;  %v1098_v59 = vsel %vm1095_vm6, %v1096_v25, %v7238_v41  ;;  %v2067_v29 = vsel %vm1095_vm6, %v2065_v42, %v7239_v1  ;;  %v1967_v24 = vrot.slane %v1960_v54, 4  ;;  %v1981_v25 = vmul.f32 %v5363_v31, %v4823_v61  ;;  %v5554_v41 = vld [vmem:[#allocation2 + $0x18] sm:$0xff] }
 0x1e6   : > { %v5536_v6 = vpop.permute.xlu1 %1306  ;;  %v942_v3 = vadd.f32 %v5035_v36, %v921_v2  ;;  %v1947_v9 = vsel %vm951_vm5, %v7240_v17, %v1946_v16  ;;  %v1103_v23 = vadd.f32 %v1098_v59, %v1085_v19  ;;  %v2086_v42 = vrot.slane %v2080_v22, 5 }
 0x1e7   : > { %2070 = vrot.lane.b32.xlu0 %v2067_v29, %s3730_s18  ;;  %v2101_v1 = vmul.f32 %v5554_v41, %v5529_v56  ;;  %v5561_v2 = vstv %s5499_s30  ;;  %v7241_v18 = vrot.slane %v5325_v49, 4  ;;  %v2108_v19 = vrot.slane %v5544_v39, 5  ;;  %s5941_s30 = sld [smem:[#allocation4 + $0x3f]] }
 0x1e8   : > { %1950 = vrot.lane.b32.xlu1 %v1947_v9, %s3731_s20  ;;  %v2088_v16 = vsel %vm1095_vm6, %v2086_v42, %v7161_v50  ;;  %v5576_v22 = vmul.f32 %v5561_v2, %v4711_v7  ;;  %v7242_v49 = vrot.slane %v5343_v28, 4  ;;  %v1988_v29 = vrot.slane %v1981_v25, 4 }
 0x1e9   : > { %v5558_v36 = vpop.permute.xlu0 %1418  ;;  %v956_v31 = vsel %vm951_vm5, %v7241_v18, %v955_v51  ;;  %v2002_v17 = vmul.f32 %v5397_v62, %v4823_v61  ;;  %v1124_v9 = vadd.f32 %v5096_v57, %v1103_v23  ;;  %v2107_v42 = vrot.slane %v2101_v1, 5 }
 0x1ea   : > { %v5568_v54 = vpop.permute.xlu1 %1327  ;;  %v960_v59 = vadd.f32 %v956_v31, %v942_v3  ;;  %v1968_v51 = vsel %vm951_vm5, %v7242_v49, %v1967_v24  ;;  %v2122_v18 = vmul.f32 %v5554_v41, %v5561_v2  ;;  %v5589_v50 = vstv %s5520_s5  ;;  %s5953_s5 = sld [smem:[#allocation4 + $0x68]] }
 0x1eb   : > { %2091 = vrot.lane.b32.xlu0 %v2088_v16, %s3731_s20  ;;  %v5594_v31 = vstv %s5531_s6  ;;  %v1145_v28 = vadd.f32 %v5125_v55, %v1124_v9  ;;  %v2109_v57 = vsel %vm1095_vm6, %v2107_v42, %v2108_v19  ;;  %v2129_v62 = vrot.slane %v5576_v22, 5  ;;  %s3584_s6 = sld [smem:[#allocation4 + $0x6b]] }
 0x1ec   : > { %1971 = vrot.lane.b32.xlu1 %v1968_v51, %s3732_s21  ;;  %v5607_v25 = vmul.f32 %v5594_v31, %v4711_v7  ;;  %v981_v23 = vadd.f32 %v5070_v35, %v960_v59  ;;  %v7243_v1 = vrot.slane %v5376_v47, 4  ;;  %v2009_v16 = vrot.slane %v2002_v17, 4  ;;  %v3684_v59 = vld [vmem:[#allocation2] sm:$0xff] }
 0x1ed   : > { %v5591_v3 = vpop.permute.xlu0 %1432  ;;  %v2023_v49 = vmul.f32 %v5426_v63, %v4823_v61  ;;  %v1166_v51 = vadd.f32 %v5161_v5, %v1145_v28  ;;  %v2128_v9 = vrot.slane %v2122_v18, 5  ;;  %v2143_v7 = vmul.f32 %v5554_v41, %v5594_v31  ;;  %v5640_v28 = vld [vmem:[#allocation2 + $0x20] sm:$0xff] }
 0x1ee   : > { %v5599_v24 = vpop.permute.xlu1 %1348  ;;  %v1989_v55 = vsel %vm951_vm5, %v7243_v1, %v1988_v29  ;;  %v1002_v35 = vadd.f32 %v5103_v40, %v981_v23  ;;  %v1233_v42 = vmul.f32 %v3684_v59, %v5589_v50  ;;  %v5624_v47 = vmul.f32 %v4889_v60, %v5589_v50 }
 0x1ef   : > { %2112 = vrot.lane.b32.xlu0 %v2109_v57, %s3732_s21  ;;  %v5629_v63 = vstv %s5563_s7  ;;  %v1187_v5 = vadd.f32 %v5196_v30, %v1166_v51  ;;  %v2130_v40 = vsel %vm1095_vm6, %v2128_v9, %v2129_v62  ;;  %v7162_v18 = vrot.slane %v5607_v25, 5  ;;  %s5977_s7 = sld [smem:[#allocation4 + $0x6c]] }
 0x1f0   : > { %1992 = vrot.lane.b32.xlu1 %v1989_v55, %s3733_s22  ;;  %v5644_v60 = vmul.f32 %v5640_v28, %v5629_v63  ;;  %v1023_v57 = vadd.f32 %v5133_v34, %v1002_v35  ;;  %v7244_v30 = vrot.slane %v5409_v58, 4  ;;  %v2030_v1 = vrot.slane %v2023_v49, 4 }
 0x1f1   : > { %v5626_v29 = vpop.permute.xlu0 %1446  ;;  %v2061_v55 = vmul.f32 %v5462_v14, %v4823_v61  ;;  %v1208_v51 = vadd.f32 %v5228_v37, %v1187_v5  ;;  %v1091_v9 = vmul.f32 %v5053_v32, %v5449_v0  ;;  %v2149_v59 = vrot.slane %v2143_v7, 5 }
 0x1f2   : > { %v5634_v17 = vpop.permute.xlu1 %1369  ;;  %v2010_v23 = vsel %vm951_vm5, %v7244_v30, %v2009_v16  ;;  %v2164_v34 = vmul.f32 %v5554_v41, %v5629_v63  ;;  %v1044_v35 = vadd.f32 %v5169_v20, %v1023_v57  ;;  %v1240_v58 = vrot.slane %v1233_v42, 6 }
 0x1f3   : > { %2133 = vrot.lane.b32.xlu0 %v2130_v40, %s3733_s22  ;;  %v1241_v16 = vrot.slane %v5624_v47, 6  ;;  %v5664_v40 = vstv %s5596_s8  ;;  %v1229_v37 = vadd.f32 %v5258_v21, %v1208_v51  ;;  %v2151_v14 = vsel %vm1095_vm6, %v2149_v59, %v7162_v18  ;;  %s6010_s8 = sld [smem:[#allocation4 + $0x6d]] }
 0x1f4   : > { %2013 = vrot.lane.b32.xlu1 %v2010_v23, %s3734_s23  ;;  %v2171_v20 = vrot.slane %v5644_v60, 5  ;;  %v5677_v7 = vmul.f32 %v5640_v28, %v5664_v40  ;;  %v1065_v42 = vadd.f32 %v5204_v27, %v1044_v35  ;;  %v7245_v5 = vrot.slane %v5439_v52, 4 }
 0x1f5   : > { %v5661_v49 = vpop.permute.xlu0 %1460  ;;  %v2068_v57 = vrot.slane %v2061_v55, 5  ;;  %v2082_v30 = vmul.f32 %v5497_v8, %v4823_v61  ;;  %v1099_v23 = vrot.slane %v1091_v9, 5  ;;  %v2170_v51 = vrot.slane %v2164_v34, 5 }
 0x1f6   : > { %v5669_v0 = vpop.permute.xlu1 %1392  ;;  %v2031_v21 = vsel %vm951_vm5, %v7245_v5, %v2030_v1  ;;  %v2202_v59 = vmul.f32 %v5554_v41, %v5664_v40  ;;  %v1086_v18 = vadd.f32 %v5238_v4, %v1065_v42  ;;  %v1242_v27 = vsel %vm1239_vm7, %v1240_v58, %v1241_v16 }
 0x1f7   : > { %2154 = vrot.lane.b32.xlu0 %v2151_v14, %s3734_s23  ;;  %v5696_v1 = vstv %s5631_s9  ;;  %v1247_v8 = vadd.f32 %v1242_v27, %v1229_v37  ;;  %v2172_v9 = vsel %vm1095_vm6, %v2170_v51, %v2171_v20  ;;  %v2209_v4 = vrot.slane %v5677_v7, 6  ;;  %s6049_s9 = sld [smem:[#allocation4 + $0x6e]] }
 0x1f8   : > { %2034 = vrot.lane.b32.xlu1 %v2031_v21, %s3735_s25  ;;  %v5708_v34 = vmul.f32 %v5640_v28, %v5696_v1  ;;  %v7246_v35 = vrot.slane %v5475_v13, 5  ;;  %v2089_v37 = vrot.slane %v2082_v30, 5  ;;  %v2103_v14 = vmul.f32 %v5529_v56, %v4823_v61 }
 0x1f9   : > { %v5693_v52 = vpop.permute.xlu0 %1498  ;;  %v7247_v42 = vrot.slane %v5457_v15, 5  ;;  %v2208_v21 = vrot.slane %v2202_v59, 6  ;;  %v2223_v51 = vmul.f32 %v5554_v41, %v5696_v1  ;;  %v1268_v61 = vadd.f32 %v5291_v26, %v1247_v8  ;;  %v5746_v8 = vld [vmem:[#allocation2 + $0x28] sm:$0x3f] }
 0x1fa   : > { %v5700_v55 = vpop.permute.xlu1 %1406  ;;  %v2069_v58 = vsel %vm1095_vm6, %v7246_v35, %v2068_v57  ;;  %v5727_v57 = vstv %s5666_s10  ;;  %v2230_v30 = vrot.slane %v5708_v34, 6  ;;  %v2110_v26 = vrot.slane %v2103_v14, 5  ;;  %s6077_s10 = sld [smem:[#allocation4 + $0x6f]] }
 0x1fb   : > { %2175 = vrot.lane.b32.xlu0 %v2172_v9, %s3735_s25  ;;  %v1100_v5 = vsel %vm1095_vm6, %v7247_v42, %v1099_v23  ;;  %v2210_v56 = vsel %vm1239_vm7, %v2208_v21, %v2209_v4  ;;  %v7248_v23 = vrot.slane %v5510_v44, 5  ;;  %v2124_v9 = vmul.f32 %v5746_v8, %v5561_v2 }
 0x1fc   : > { %2072 = vrot.lane.b32.xlu1 %v2069_v58, %s3730_s18  ;;  %v1104_v27 = vadd.f32 %v1100_v5, %v1086_v18  ;;  %v5740_v18 = vmul.f32 %v5640_v28, %v5727_v57  ;;  %v1289_v35 = vadd.f32 %v5327_v33, %v1268_v61  ;;  %v2229_v58 = vrot.slane %v2223_v51, 6 }
 0x1fd   : > { %v5724_v13 = vpop.permute.xlu0 %1519  ;;  %v2090_v59 = vsel %vm1095_vm6, %v7248_v23, %v2089_v37  ;;  %v2244_v42 = vmul.f32 %v5554_v41, %v5727_v57  ;;  %v5758_v44 = vstv %s5698_s11  ;;  %v2145_v61 = vmul.f32 %v5746_v8, %v5594_v31  ;;  %s6083_s11 = sld [smem:[#allocation4 + $0x46]] }
 0x1fe   : > { %v5732_v15 = vpop.permute.xlu1 %1420  ;;  %v1125_v5 = vadd.f32 %v5268_v10, %v1104_v27  ;;  %v1310_v37 = vadd.f32 %v5360_v46, %v1289_v35  ;;  %v2231_v33 = vsel %vm1239_vm7, %v2229_v58, %v2230_v30  ;;  %v2251_v14 = vrot.slane %v5740_v18, 6 }
 0x1ff   : > { %2213 = vrot.lane.b32.xlu0 %v2210_v56, %s3730_s18  ;;  %v5771_v10 = vmul.f32 %v5640_v28, %v5758_v44  ;;  %v2111_v46 = vsel %vm1095_vm6, %v2108_v19, %v2110_v26  ;;  %v2131_v27 = vrot.slane %v2124_v9, 5  ;;  %v2250_v23 = vrot.slane %v2244_v42, 6 }
 0x200   : > { %2093 = vrot.lane.b32.xlu1 %v2090_v59, %s3731_s20  ;;  %v1146_v51 = vadd.f32 %v5299_v45, %v1125_v5  ;;  %v1331_v56 = vadd.f32 %v5394_v11, %v1310_v37  ;;  %v2265_v59 = vmul.f32 %v5554_v41, %v5758_v44  ;;  %v1235_v35 = vmul.f32 %v5053_v32, %v5589_v50  ;;  %v7249_v50 = vld [vmem:[#allocation9_spill] sm:$0xff] }
 0x201   : > { %v5755_v21 = vpop.permute.xlu0 %1540  ;;  %v1379_v39 = vstv %s5719_s12  ;;  %v5791_v19 = vstv %s5729_s13  ;;  %v2252_v26 = vsel %vm1239_vm7, %v2250_v23, %v2251_v14  ;;  %v2152_v42 = vrot.slane %v2145_v61, 5  ;;  %s6111_s12 = sld [smem:[#allocation4 + $0x71]] }
 0x202   : > { %v5763_v2 = vpop.permute.xlu1 %1434  ;;  %v1167_v45 = vadd.f32 %v5335_v12, %v1146_v51  ;;  %v1352_v31 = vadd.f32 %v5423_v48, %v1331_v56  ;;  %v7163_v12 = vrot.slane %v5771_v10, 6  ;;  %v5802_v32 = vmul.f32 %v5640_v28, %v5791_v19  ;;  %s6125_s13 = sld [smem:[#allocation4 + $0x72]] }
 0x203   : > { %2234 = vrot.lane.b32.xlu0 %v2231_v33, %s3731_s20  ;;  %v2132_v48 = vsel %vm1095_vm6, %v2129_v62, %v2131_v27  ;;  %v2166_v5 = vmul.f32 %v5746_v8, %v5629_v63  ;;  %v2271_v33 = vrot.slane %v2265_v59, 6  ;;  %v2286_v51 = vmul.f32 %v5554_v41, %v5791_v19 }
 0x204   : > { %2114 = vrot.lane.b32.xlu1 %v2111_v46, %s3732_s21  ;;  %v1188_v9 = vadd.f32 %v7249_v50, %v1167_v45  ;;  %v1373_v37 = vadd.f32 %v5459_v53, %v1352_v31  ;;  %v7250_v46 = vld [vmem:[#allocation7_spill] sm:$0xff]  ;;  %v1380_v23 = vmul.f32 %v5554_v41, %v1379_v39  ;;  %v5824_v62 = vstv %s5760_s14  ;;  %s6170_s14 = sld [smem:[#allocation4 + $0x73]] }
 0x205   : > { %v5788_v58 = vpop.permute.xlu0 %1561  ;;  %v1243_v63 = vrot.slane %v1235_v35, 6  ;;  %v2273_v53 = vsel %vm1239_vm7, %v2271_v33, %v7163_v12  ;;  %v2293_v61 = vrot.slane %v5802_v32, 6  ;;  %v5834_v59 = vmul.f32 %v5640_v28, %v5824_v62  ;;  %v7251_v45 = vld [vmem:[#allocation11_spill] sm:$0xff] }
 0x206   : > { %v5794_v11 = vpop.permute.xlu1 %1448  ;;  %v1209_v56 = vadd.f32 %v7250_v46, %v1188_v9  ;;  %v7252_v35 = vrot.slane %v5607_v25, 5  ;;  %v2173_v50 = vrot.slane %v2166_v5, 5  ;;  %v2204_v9 = vmul.f32 %v5746_v8, %v5664_v40 }
 0x207   : > { %2255 = vrot.lane.b32.xlu0 %v2252_v26, %s3732_s21  ;;  %v2292_v33 = vrot.slane %v2286_v51, 6  ;;  %v2307_v46 = vmul.f32 %v5554_v41, %v5824_v62  ;;  %v2406_v32 = vstv %s5953_s5  ;;  %s6409_s5 = sld [smem:[#allocation4 + $0x7b]] }
 0x208   : > { %2135 = vrot.lane.b32.xlu1 %v2132_v48, %s3733_s22  ;;  %v1230_v31 = vadd.f32 %v7251_v45, %v1209_v56  ;;  %v2153_v26 = vsel %vm1095_vm6, %v7252_v35, %v2152_v42  ;;  %v1382_v48 = vadd.f32 %v1380_v23, %v1373_v37  ;;  %v1244_v56 = vsel %vm1239_vm7, %v1241_v16, %v1243_v63 }
 0x209   : > { %v5821_v22 = vpop.permute.xlu0 %1582  ;;  %v2294_v40 = vsel %vm1239_vm7, %v2292_v33, %v2293_v61  ;;  %v2314_v42 = vrot.slane %v5834_v59, 6  ;;  %v2174_v47 = vsel %vm1095_vm6, %v2171_v20, %v2173_v50  ;;  %v2211_v16 = vrot.slane %v2204_v9, 6 }
 0x20a   : > { %v5826_v27 = vpop.permute.xlu1 %1462  ;;  %v1248_v5 = vadd.f32 %v1244_v56, %v1230_v31  ;;  %v2225_v37 = vmul.f32 %v5746_v8, %v5696_v1  ;;  %v1396_v51 = vadd.f32 %v5494_v43, %v1382_v48  ;;  %v2313_v23 = vrot.slane %v2307_v46, 6  ;;  %v7253_v43 = vld [vmem:[#allocation8_spill] sm:$0xff]  ;;  %v7254_v48 = vld [vmem:[#allocation13_spill] sm:$0xff] }
 0x20b   : > { %2276 = vrot.lane.b32.xlu0 %v2273_v53, %s3733_s22  ;;  %v5871_v53 = vld [vmem:[#allocation2 + $0x30] sm:$0xff]  ;;  %v5875_v31 = vstv %s5819_s15  ;;  %v2336_v1 = vstv %s5836_s16  ;;  %v2246_v50 = vmul.f32 %v5746_v8, %v5727_v57  ;;  %s6186_s15 = sld [smem:[#allocation4 + $0x4d]] }
 0x20c   : > { %2156 = vrot.lane.b32.xlu1 %v2153_v26, %s3734_s23  ;;  %v1410_v45 = vadd.f32 %v5526_v38, %v1396_v51  ;;  %v2315_v20 = vsel %vm1239_vm7, %v2313_v23, %v2314_v42  ;;  %v1269_v35 = vadd.f32 %v7253_v43, %v1248_v5  ;;  %v2212_v38 = vsel %vm1239_vm7, %v2209_v4, %v2211_v16  ;;  %s6214_s16 = sld [smem:[#allocation4 + $0x74]] }
 0x20d   : > { %v5848_v12 = vpop.permute.xlu0 %1603  ;;  %v2232_v26 = vrot.slane %v2225_v37, 6  ;;  %v5897_v46 = vmul.f32 %v5640_v28, %v5875_v31  ;;  %v2337_v7 = vmul.f32 %v2336_v1, %v5871_v53  ;;  %v1470_v57 = vmul.f32 %v5554_v41, %v5875_v31 }
 0x20e   : > { %v5853_v25 = vpop.permute.xlu1 %1500  ;;  %v1424_v9 = vadd.f32 %v5558_v36, %v1410_v45  ;;  %v1290_v33 = vadd.f32 %v7254_v48, %v1269_v35  ;;  %v2253_v16 = vrot.slane %v2246_v50, 6  ;;  %v2288_v35 = vmul.f32 %v5746_v8, %v5791_v19 }
 0x20f   : > { %2297 = vrot.lane.b32.xlu0 %v2294_v40, %s3734_s23  ;;  %v2350_v40 = vstv %s5859_s19  ;;  %v1477_v23 = vrot.slane %v5897_v46, 1  ;;  %v1476_v34 = vrot.slane %v1470_v57, 1  ;;  %v7255_v50 = vrot.slane %v5771_v10, 6  ;;  %s6238_s19 = sld [smem:[#allocation4 + $0x75]] }
 0x210   : > { %2177 = vrot.lane.b32.xlu1 %v2174_v47, %s3735_s25  ;;  %v1438_v4 = vadd.f32 %v5591_v3, %v1424_v9  ;;  %v1311_v5 = vadd.f32 %v5536_v6, %v1290_v33  ;;  %v2233_v47 = vsel %vm1239_vm7, %v2230_v30, %v2232_v26  ;;  %v2267_v3 = vmul.f32 %v5746_v8, %v5758_v44 }
 0x211   : > { %v5869_v63 = vpop.permute.xlu0 %1641  ;;  %v2351_v6 = vmul.f32 %v2350_v40, %v5871_v53  ;;  %v2364_v44 = vstv %s5883_s2  ;;  %v2378_v26 = vstv %s5910_s26  ;;  %v2295_v48 = vrot.slane %v2288_v35, 6  ;;  %s6268_s2 = sld [smem:[#allocation4 + $0x76]] }
 0x212   : > { %v5877_v60 = vpop.permute.xlu1 %1521  ;;  %v1452_v37 = vadd.f32 %v5626_v29, %v1438_v4  ;;  %v1332_v51 = vadd.f32 %v5568_v54, %v1311_v5  ;;  %v2254_v54 = vsel %vm1239_vm7, %v2251_v14, %v2253_v16  ;;  %v2274_v43 = vrot.slane %v2267_v3, 6  ;;  %s6306_s26 = sld [smem:[#allocation4 + $0x78]] }
 0x213   : > { %2318 = vrot.lane.b32.xlu0 %v2315_v20, %s3735_s25  ;;  %v2365_v14 = vmul.f32 %v2364_v44, %v5871_v53  ;;  %v2309_v33 = vmul.f32 %v5746_v8, %v5824_v62  ;;  %v2392_v5 = vstv %s5932_s28  ;;  %v2296_v62 = vsel %vm1239_vm7, %v2293_v61, %v2295_v48  ;;  %s6346_s28 = sld [smem:[#allocation4 + $0x79]] }
 0x214   : > { %2215 = vrot.lane.b32.xlu1 %v2212_v38, %s3730_s18  ;;  %v1466_v30 = vadd.f32 %v5661_v49, %v1452_v37  ;;  %v1353_v29 = vadd.f32 %v5599_v24, %v1332_v51  ;;  %v1478_v24 = vsel %vm519_vm1, %v1476_v34, %v1477_v23  ;;  %v2275_v9 = vsel %vm1239_vm7, %v7255_v50, %v2274_v43 }
 0x215   : > { %v5899_v56 = vpop.permute.xlu0 %1662  ;;  %v2316_v16 = vrot.slane %v2309_v33, 6  ;;  %v5985_v3 = vstv %s3583_s29  ;;  %v5991_v51 = vstv %s5941_s30  ;;  %v2393_v34 = vmul.f32 %v2392_v5, %v5871_v53  ;;  %s6350_s29 = sld [smem:[#allocation4 + $0x54]] }
 0x216   : > { %v5907_v36 = vpop.permute.xlu1 %1542  ;;  %v1374_v49 = vadd.f32 %v5634_v17, %v1353_v29  ;;  %v1483_v19 = vadd.f32 %v1478_v24, %v1466_v30  ;;  %v1381_v17 = vmul.f32 %v5640_v28, %v1379_v39  ;;  %v2379_v39 = vmul.f32 %v2378_v26, %v5871_v53  ;;  %s6373_s30 = sld [smem:[#allocation4 + $0x7a]] }
 0x217   : > { %2341 = vrot.lane.b32.xlu0 %v2337_v7, %s3730_s18  ;;  %v6008_v29 = vstv %s3584_s6  ;;  %v6015_v43 = vmul.f32 %v5640_v28, %v5991_v51  ;;  %v1613_v24 = vmul.f32 %v5554_v41, %v5991_v51  ;;  %v2407_v59 = vmul.f32 %v2406_v32, %v5871_v53  ;;  %s6422_s6 = sld [smem:[#allocation4 + $0x7c]] }
 0x218   : > { %2236 = vrot.lane.b32.xlu1 %v2233_v47, %s3731_s20  ;;  %v1383_v7 = vadd.f32 %v1381_v17, %v1374_v49  ;;  %v1504_v57 = vadd.f32 %v5693_v52, %v1483_v19  ;;  %v5979_v47 = vld [vmem:[#allocation2 + $0x38] sm:$0xff]  ;;  %v1472_v49 = vmul.f32 %v5746_v8, %v5875_v31  ;;  %v6047_v50 = vstv %s5977_s7  ;;  %s6472_s7 = sld [smem:[#allocation4 + $0x7d]] }
 0x219   : > { %v5923_v45 = vpop.permute.xlu0 %1683  ;;  %v1620_v48 = vrot.slane %v6015_v43, 2  ;;  %v2366_v46 = vmul.f32 %v2364_v44, %v5979_v47 }
 0x21a   : > { %v5929_v20 = vpop.permute.xlu1 %1563  ;;  %v1525_v37 = vadd.f32 %v5724_v13, %v1504_v57  ;;  %v1397_v52 = vadd.f32 %v5669_v0, %v1383_v7  ;;  %v2438_v13 = vmul.f32 %v5985_v3, %v5871_v53  ;;  %v6006_v0 = vmul.f32 %v5985_v3, %v5979_v47 }
 0x21b   : > { %2355 = vrot.lane.b32.xlu0 %v2351_v6, %s3731_s20  ;;  %v1479_v33 = vrot.slane %v1472_v49, 1  ;;  %v1619_v7 = vrot.slane %v1613_v24, 2 }
 0x21c   : > { %2257 = vrot.lane.b32.xlu1 %v2254_v54, %s3732_s21  ;;  %v1546_v61 = vadd.f32 %v5755_v21, %v1525_v37  ;;  %v1411_v54 = vadd.f32 %v5700_v55, %v1397_v52  ;;  %v2317_v21 = vsel %vm1239_vm7, %v2314_v42, %v2316_v16  ;;  %v2338_v55 = vmul.f32 %v2336_v1, %v5979_v47 }
 0x21d   : > { %v5948_v18 = vpop.permute.xlu0 %1704  ;;  %v6040_v42 = vmul.f32 %v6008_v29, %v5979_v47  ;;  %v2444_v1 = vrot.slane %v2438_v13, 1  ;;  %v6066_v16 = vmul.f32 %v6047_v50, %v5979_v47 }
 0x21e   : > { %v5955_v38 = vpop.permute.xlu1 %1584  ;;  %v1567_v35 = vadd.f32 %v5788_v58, %v1546_v61  ;;  %v2459_v58 = vmul.f32 %v6008_v29, %v5871_v53  ;;  %v1621_v61 = vsel %vm663_vm3, %v1619_v7, %v1620_v48 }
 0x21f   : > { %2369 = vrot.lane.b32.xlu0 %v2365_v14, %s3732_s21  ;;  %v1425_v14 = vadd.f32 %v5732_v15, %v1411_v54  ;;  %v2445_v15 = vrot.slane %v6006_v0, 1  ;;  %v1480_v54 = vsel %vm519_vm1, %v1477_v23, %v1479_v33 }
 0x220   : > { %2278 = vrot.lane.b32.xlu1 %v2275_v9, %s3733_s22  ;;  %v1588_v31 = vadd.f32 %v5821_v22, %v1567_v35  ;;  %v2465_v52 = vrot.slane %v2459_v58, 1 }
 0x221   : > { %v5968_v4 = vpop.permute.xlu0 %1725  ;;  %v1439_v9 = vadd.f32 %v5763_v2, %v1425_v14  ;;  %v2480_v2 = vmul.f32 %v6047_v50, %v5871_v53  ;;  %v6108_v14 = vstv %s6049_s9  ;;  %s6512_s9 = sld [smem:[#allocation4 + $0x7f]] }
 0x222   : > { %v5974_v10 = vpop.permute.xlu1 %1605  ;;  %v1609_v22 = vadd.f32 %v5848_v12, %v1588_v31  ;;  %v2446_v12 = vsel %vm519_vm1, %v2444_v1, %v2445_v15  ;;  %v2380_v1 = vmul.f32 %v2378_v26, %v5979_v47  ;;  %v2522_v33 = vmul.f32 %v6108_v14, %v5871_v53 }
 0x223   : > { %2383 = vrot.lane.b32.xlu0 %v2379_v39, %s3733_s22  ;;  %v1453_v39 = vadd.f32 %v5794_v11, %v1439_v9  ;;  %v2466_v11 = vrot.slane %v6040_v42, 1  ;;  %v2486_v35 = vrot.slane %v2480_v2, 1  ;;  %v6140_v2 = vstv %s6083_s11  ;;  %s6562_s11 = sld [smem:[#allocation4 + $0x81]] }
 0x224   : > { %2299 = vrot.lane.b32.xlu1 %v2296_v62, %s3734_s23  ;;  %v2352_v62 = vmul.f32 %v2350_v40, %v5979_v47  ;;  %v1626_v13 = vadd.f32 %v1621_v61, %v1609_v22 }
 0x225   : > { %v5993_v6 = vpop.permute.xlu0 %1746  ;;  %v1467_v40 = vadd.f32 %v5826_v27, %v1453_v39  ;;  %v2487_v27 = vrot.slane %v6066_v16, 1  ;;  %v6133_v39 = vmul.f32 %v6108_v14, %v5979_v47 }
 0x226   : > { %v6000_v30 = vpop.permute.xlu1 %1643  ;;  %v1647_v58 = vadd.f32 %v5869_v63, %v1626_v13 }
 0x227   : > { %2397 = vrot.lane.b32.xlu0 %v2393_v34, %s3734_s23  ;;  %v6075_v34 = vstv %s6010_s8  ;;  %v2488_v44 = vsel %vm519_vm1, %v2486_v35, %v2487_v27  ;;  %s6503_s8 = sld [smem:[#allocation4 + $0x5b]] }
 0x228   : > { %2320 = vrot.lane.b32.xlu1 %v2317_v21, %s3735_s25  ;;  %v2501_v49 = vmul.f32 %v6075_v34, %v5871_v53  ;;  %v6105_v23 = vmul.f32 %v6075_v34, %v5979_v47  ;;  %v1668_v63 = vadd.f32 %v5899_v56, %v1647_v58 }
 0x229   : > { %v6031_v19 = vpop.permute.xlu0 %1784 }
 0x22a   : > { %v6043_v17 = vpop.permute.xlu1 %1664  ;;  %v2507_v9 = vrot.slane %v2501_v49, 1  ;;  %v2508_v22 = vrot.slane %v6105_v23, 1  ;;  %v1689_v56 = vadd.f32 %v5923_v45, %v1668_v63  ;;  %v2528_v49 = vrot.slane %v2522_v33, 1 }
 0x22b   : > { %2411 = vrot.lane.b32.xlu0 %v2407_v59, %s3735_s25  ;;  %v1484_v59 = vadd.f32 %v1480_v54, %v1467_v40 }
 0x22c   : > { %2343 = vrot.lane.b32.xlu1 %v2338_v55, %s3730_s18  ;;  %v2467_v55 = vsel %vm519_vm1, %v2465_v52, %v2466_v11  ;;  %v6148_v52 = vmul.f32 %v5640_v28, %v6140_v2  ;;  %v1710_v54 = vadd.f32 %v5948_v18, %v1689_v56 }
 0x22d   : > { %v6057_v57 = vpop.permute.xlu0 %1805  ;;  %v1505_v26 = vadd.f32 %v5853_v25, %v1484_v59  ;;  %v2394_v25 = vmul.f32 %v2392_v5, %v5979_v47  ;;  %v6179_v59 = vstv %s6111_s12  ;;  %s6594_s12 = sld [smem:[#allocation4 + $0x82]] }
 0x22e   : > { %v6068_v37 = vpop.permute.xlu1 %1685  ;;  %v1731_v58 = vadd.f32 %v5968_v4, %v1710_v54  ;;  %v6196_v4 = vstv %s6125_s13  ;;  %s6625_s13 = sld [smem:[#allocation4 + $0x83]] }
 0x22f   : > { %2449 = vrot.lane.b32.xlu0 %v2446_v12, %s3730_s18  ;;  %v6143_v12 = vld [vmem:[#allocation2 + $0x40] sm:$0x3f]  ;;  %v1526_v40 = vadd.f32 %v5877_v60, %v1505_v26  ;;  %v2509_v60 = vsel %vm519_vm1, %v2507_v9, %v2508_v22 }
 0x230   : > { %2357 = vrot.lane.b32.xlu1 %v2352_v62, %s3731_s20  ;;  %v6136_v62 = vstv %s6077_s10  ;;  %v2440_v18 = vmul.f32 %v5985_v3, %v6143_v12  ;;  %s6534_s10 = sld [smem:[#allocation4 + $0x80]] }
 0x231   : > { %v6090_v21 = vpop.permute.xlu0 %1826  ;;  %v2543_v13 = vmul.f32 %v6136_v62, %v5871_v53  ;;  %v6161_v45 = vmul.f32 %v6136_v62, %v5979_v47  ;;  %v1547_v5 = vadd.f32 %v5907_v36, %v1526_v40  ;;  %v2408_v36 = vmul.f32 %v2406_v32, %v5979_v47 }
 0x232   : > { %v6095_v24 = vpop.permute.xlu1 %1706  ;;  %v2581_v32 = vmul.f32 %v6179_v59, %v5871_v53 }
 0x233   : > { %2470 = vrot.lane.b32.xlu0 %v2467_v55, %s3731_s20  ;;  %v2529_v55 = vrot.slane %v6133_v39, 1  ;;  %v1568_v9 = vadd.f32 %v5929_v20, %v1547_v5  ;;  %v2549_v3 = vrot.slane %v2543_v13, 1  ;;  %v2550_v63 = vrot.slane %v6161_v45, 1 }
 0x234   : > { %2371 = vrot.lane.b32.xlu1 %v2366_v46, %s3732_s21  ;;  %v1756_v46 = vmul.f32 %v5554_v41, %v6140_v2  ;;  %v6208_v20 = vmul.f32 %v6179_v59, %v5979_v47  ;;  %v2461_v13 = vmul.f32 %v6008_v29, %v6143_v12 }
 0x235   : > { %v6115_v31 = vpop.permute.xlu0 %1847  ;;  %v2530_v56 = vsel %vm519_vm1, %v2528_v49, %v2529_v55  ;;  %v1589_v40 = vadd.f32 %v5955_v38, %v1568_v9  ;;  %v2551_v29 = vsel %vm519_vm1, %v2549_v3, %v2550_v63 }
 0x236   : > { %v6128_v7 = vpop.permute.xlu1 %1727  ;;  %v2468_v3 = vrot.slane %v2461_v13, 1 }
 0x237   : > { %2491 = vrot.lane.b32.xlu0 %v2488_v44, %s3732_s21  ;;  %v1615_v44 = vmul.f32 %v5746_v8, %v5991_v51  ;;  %v1752_v51 = vadd.f32 %v5993_v6, %v1731_v58  ;;  %v2447_v6 = vrot.slane %v2440_v18, 1  ;;  %v1610_v49 = vadd.f32 %v5974_v10, %v1589_v40 }
 0x238   : > { %2385 = vrot.lane.b32.xlu1 %v2380_v1, %s3733_s22  ;;  %v1763_v1 = vrot.slane %v6148_v52, 3  ;;  %v2588_v10 = vrot.slane %v6208_v20, 2  ;;  %v2469_v13 = vsel %vm519_vm1, %v2466_v11, %v2468_v3 }
 0x239   : > { %v6152_v61 = vpop.permute.xlu0 %1868  ;;  %v1622_v54 = vrot.slane %v1615_v44, 2  ;;  %v2587_v44 = vrot.slane %v2581_v32, 2  ;;  %v2448_v9 = vsel %vm519_vm1, %v2445_v15, %v2447_v6  ;;  %v6250_v32 = vstv %s6186_s15  ;;  %s6662_s15 = sld [smem:[#allocation4 + $0x62]] }
 0x23a   : > { %v6164_v35 = vpop.permute.xlu1 %1748 }
 0x23b   : > { %2512 = vrot.lane.b32.xlu0 %v2509_v60, %s3733_s22  ;;  %v2602_v60 = vmul.f32 %v6196_v4, %v5871_v53  ;;  %v2589_v6 = vsel %vm663_vm3, %v2587_v44, %v2588_v10 }
 0x23c   : > { %2399 = vrot.lane.b32.xlu1 %v2394_v25, %s3734_s23  ;;  %v1762_v25 = vrot.slane %v1756_v46, 3  ;;  %v6230_v46 = vmul.f32 %v6196_v4, %v5979_v47 }
 0x23d   : > { %v6192_v33 = vpop.permute.xlu0 %1889  ;;  %v2608_v40 = vrot.slane %v2602_v60, 2  ;;  %v2503_v60 = vmul.f32 %v6075_v34, %v6143_v12 }
 0x23e   : > { %v6199_v26 = vpop.permute.xlu1 %1786  ;;  %v1764_v38 = vsel %vm807_vm4, %v1762_v25, %v1763_v1  ;;  %v2609_v0 = vrot.slane %v6230_v46, 2 }
 0x23f   : > { %2533 = vrot.lane.b32.xlu0 %v2530_v56, %s3734_s23  ;;  %v1769_v18 = vadd.f32 %v1764_v38, %v1752_v51  ;;  %v2482_v56 = vmul.f32 %v6047_v50, %v6143_v12  ;;  %v1623_v51 = vsel %vm663_vm3, %v1620_v48, %v1622_v54 }
 0x240   : > { %2413 = vrot.lane.b32.xlu1 %v2408_v36, %s3735_s25  ;;  %v6236_v36 = vstv %s6170_s14  ;;  %v1627_v25 = vadd.f32 %v1623_v51, %v1610_v49  ;;  %v2610_v34 = vsel %vm663_vm3, %v2608_v40, %v2609_v0  ;;  %v2510_v40 = vrot.slane %v2503_v60, 1  ;;  %s6659_s14 = sld [smem:[#allocation4 + $0x84]] }
 0x241   : > { %v6223_v5 = vpop.permute.xlu0 %1927  ;;  %v2623_v15 = vmul.f32 %v6236_v36, %v5871_v53  ;;  %v6260_v50 = vmul.f32 %v6236_v36, %v5979_v47  ;;  %v1790_v43 = vadd.f32 %v6031_v19, %v1769_v18  ;;  %v2489_v54 = vrot.slane %v2482_v56, 1 }
 0x242   : > { %v6232_v58 = vpop.permute.xlu1 %1807  ;;  %v6277_v19 = vstv %s6214_s16  ;;  %v6284_v18 = vmul.f32 %v5640_v28, %v6250_v32  ;;  %v1648_v42 = vadd.f32 %v6000_v30, %v1627_v25  ;;  %v6304_v30 = vstv %s6238_s19  ;;  %s6672_s16 = sld [smem:[#allocation4 + $0x86]] }
 0x243   : > { %2554 = vrot.lane.b32.xlu0 %v2551_v29, %s3735_s25  ;;  %v1811_v49 = vadd.f32 %v6057_v57, %v1790_v43  ;;  %v1899_v29 = vmul.f32 %v5554_v41, %v6250_v32  ;;  %v2629_v44 = vrot.slane %v2623_v15, 2  ;;  %v2630_v57 = vrot.slane %v6260_v50, 2  ;;  %s6702_s19 = sld [smem:[#allocation4 + $0x87]] }
 0x244   : > { %2451 = vrot.lane.b32.xlu1 %v2448_v9, %s3730_s18  ;;  %v2644_v3 = vmul.f32 %v6277_v19, %v5871_v53  ;;  %v6301_v56 = vmul.f32 %v6277_v19, %v5979_v47  ;;  %v1669_v51 = vadd.f32 %v6043_v17, %v1648_v42  ;;  %v2524_v25 = vmul.f32 %v6108_v14, %v6143_v12 }
 0x245   : > { %v6253_v38 = vpop.permute.xlu0 %1948  ;;  %v1832_v9 = vadd.f32 %v6090_v21, %v1811_v49  ;;  %v2490_v21 = vsel %vm519_vm1, %v2487_v27, %v2489_v54  ;;  %v1758_v43 = vmul.f32 %v5746_v8, %v6140_v2  ;;  %v2631_v27 = vsel %vm663_vm3, %v2629_v44, %v2630_v57 }
 0x246   : > { %v6263_v48 = vpop.permute.xlu1 %1828  ;;  %v1690_v17 = vadd.f32 %v6068_v37, %v1669_v51  ;;  %v2665_v14 = vmul.f32 %v6304_v30, %v5871_v53  ;;  %v2650_v60 = vrot.slane %v2644_v3, 2  ;;  %v2651_v37 = vrot.slane %v6301_v56, 2 }
 0x247   : > { %2592 = vrot.lane.b32.xlu0 %v2589_v6, %s3730_s18  ;;  %v1853_v15 = vadd.f32 %v6115_v31, %v1832_v9  ;;  %v1905_v6 = vrot.slane %v1899_v29, 4  ;;  %v6330_v31 = vmul.f32 %v6304_v30, %v5979_v47  ;;  %v6337_v49 = vstv %s6268_s2  ;;  %s6735_s2 = sld [smem:[#allocation4 + $0x88]] }
 0x248   : > { %2472 = vrot.lane.b32.xlu1 %v2469_v13, %s3731_s20  ;;  %v1906_v13 = vrot.slane %v6284_v18, 4  ;;  %v1711_v29 = vadd.f32 %v6095_v24, %v1690_v17  ;;  %v2511_v42 = vsel %vm519_vm1, %v2508_v22, %v2510_v40  ;;  %v1765_v44 = vrot.slane %v1758_v43, 3 }
 0x249   : > { %v6288_v11 = vpop.permute.xlu0 %1969  ;;  %v1874_v2 = vadd.f32 %v6152_v61, %v1853_v15  ;;  %v2545_v61 = vmul.f32 %v6136_v62, %v6143_v12  ;;  %v2686_v62 = vmul.f32 %v6337_v49, %v5871_v53  ;;  %v6362_v3 = vmul.f32 %v6337_v49, %v5979_v47 }
 0x24a   : > { %v6295_v41 = vpop.permute.xlu1 %1849  ;;  %v1732_v24 = vadd.f32 %v6128_v7, %v1711_v29  ;;  %v1907_v23 = vsel %vm951_vm5, %v1905_v6, %v1906_v13  ;;  %v2652_v51 = vsel %vm663_vm3, %v2650_v60, %v2651_v37  ;;  %v2671_v7 = vrot.slane %v2665_v14, 2 }
 0x24b   : > { %2613 = vrot.lane.b32.xlu0 %v2610_v34, %s3731_s20  ;;  %v2531_v34 = vrot.slane %v2524_v25, 1  ;;  %v1895_v9 = vadd.f32 %v6192_v33, %v1874_v2  ;;  %v6371_v40 = vstv %s6306_s26  ;;  %v2552_v43 = vrot.slane %v2545_v61, 1  ;;  %s6755_s26 = sld [smem:[#allocation4 + $0x89]] }
 0x24c   : > { %2493 = vrot.lane.b32.xlu1 %v2490_v21, %s3732_s21  ;;  %v2672_v21 = vrot.slane %v6330_v31, 2  ;;  %v1753_v25 = vadd.f32 %v6164_v35, %v1732_v24  ;;  %v2583_v6 = vmul.f32 %v6179_v59, %v6143_v12  ;;  %v2692_v35 = vrot.slane %v2686_v62, 2 }
 0x24d   : > { %v6321_v16 = vpop.permute.xlu0 %1990  ;;  %v2532_v15 = vsel %vm519_vm1, %v2529_v55, %v2531_v34  ;;  %v1912_v17 = vadd.f32 %v1907_v23, %v1895_v9  ;;  %v2693_v2 = vrot.slane %v6362_v3, 2  ;;  %v2724_v39 = vmul.f32 %v6371_v40, %v5871_v53 }
 0x24e   : > { %v6333_v54 = vpop.permute.xlu1 %1870  ;;  %v6392_v55 = vmul.f32 %v6371_v40, %v5979_v47  ;;  %v1766_v59 = vsel %vm807_vm4, %v1763_v1, %v1765_v44  ;;  %v2590_v34 = vrot.slane %v2583_v6, 2  ;;  %v6407_v61 = vstv %s6346_s28  ;;  %v6444_v6 = vld [vmem:[#allocation2 + $0x18] sm:$0xff]  ;;  %s6774_s28 = sld [smem:[#allocation4 + $0x8a]] }
 0x24f   : > { %2634 = vrot.lane.b32.xlu0 %v2631_v27, %s3732_s21  ;;  %v2604_v27 = vmul.f32 %v6196_v4, %v6143_v12  ;;  %v2673_v4 = vsel %vm663_vm3, %v2671_v7, %v2672_v21  ;;  %v1770_v29 = vadd.f32 %v1766_v59, %v1753_v25  ;;  %v1933_v52 = vadd.f32 %v6223_v5, %v1912_v17 }
 0x250   : > { %2514 = vrot.lane.b32.xlu1 %v2511_v42, %s3733_s22  ;;  %v2553_v42 = vsel %vm519_vm1, %v2550_v63, %v2552_v43  ;;  %v6413_v1 = vstv %s6350_s29  ;;  %v2694_v45 = vsel %vm663_vm3, %v2692_v35, %v2693_v2  ;;  %v2730_v9 = vrot.slane %v2724_v39, 3  ;;  %s6808_s29 = sld [smem:[#allocation4 + $0x8b]] }
 0x251   : > { %v6356_v22 = vpop.permute.xlu0 %2011  ;;  %v2731_v63 = vrot.slane %v6392_v55, 3  ;;  %v2611_v24 = vrot.slane %v2604_v27, 2  ;;  %v1954_v23 = vadd.f32 %v6253_v38, %v1933_v52  ;;  %v2745_v5 = vmul.f32 %v6407_v61, %v5871_v53 }
 0x252   : > { %v6364_v33 = vpop.permute.xlu1 %1891  ;;  %v6434_v7 = vstv %s6373_s30  ;;  %v1791_v25 = vadd.f32 %v6199_v26, %v1770_v29  ;;  %v2625_v38 = vmul.f32 %v6236_v36, %v6143_v12  ;;  %v2042_v17 = vmul.f32 %v6444_v6, %v6413_v1  ;;  %s6828_s30 = sld [smem:[#allocation4 + $0x8d]] }
 0x253   : > { %2655 = vrot.lane.b32.xlu0 %v2652_v51, %s3733_s22  ;;  %v6431_v51 = vmul.f32 %v6407_v61, %v5979_v47  ;;  %v1975_v43 = vadd.f32 %v6288_v11, %v1954_v23  ;;  %v6450_v27 = vmul.f32 %v5640_v28, %v6413_v1  ;;  %v2766_v36 = vmul.f32 %v6434_v7, %v5871_v53 }
 0x254   : > { %2535 = vrot.lane.b32.xlu1 %v2532_v15, %s3734_s23  ;;  %v2591_v15 = vsel %vm663_vm3, %v2588_v10, %v2590_v34  ;;  %v1812_v26 = vadd.f32 %v6232_v58, %v1791_v25  ;;  %v2612_v10 = vsel %vm663_vm3, %v2609_v0, %v2611_v24  ;;  %v6463_v11 = vmul.f32 %v6434_v7, %v5979_v47 }
 0x255   : > { %v6385_v14 = vpop.permute.xlu0 %2032  ;;  %v1996_v28 = vadd.f32 %v6321_v16, %v1975_v43  ;;  %v2732_v58 = vsel %vm807_vm4, %v2730_v9, %v2731_v63  ;;  %v2751_v39 = vrot.slane %v2745_v5, 3  ;;  %v2752_v46 = vrot.slane %v6431_v51, 3 }
 0x256   : > { %v6397_v60 = vpop.permute.xlu1 %1929  ;;  %v1833_v0 = vadd.f32 %v6263_v48, %v1812_v26  ;;  %v2632_v59 = vrot.slane %v2625_v38, 2  ;;  %v2646_v16 = vmul.f32 %v6277_v19, %v6143_v12  ;;  %v2048_v34 = vrot.slane %v2042_v17, 5 }
 0x257   : > { %2676 = vrot.lane.b32.xlu0 %v2673_v4, %s3734_s23  ;;  %v6479_v4 = vstv %s6409_s5  ;;  %v2017_v29 = vadd.f32 %v6356_v22, %v1996_v28  ;;  %v2049_v52 = vrot.slane %v6450_v27, 5  ;;  %v2772_v9 = vrot.slane %v2766_v36, 3  ;;  %s6856_s5 = sld [smem:[#allocation4 + $0x8e]] }
 0x258   : > { %2556 = vrot.lane.b32.xlu1 %v2553_v42, %s3735_s25  ;;  %v1901_v42 = vmul.f32 %v5746_v8, %v6250_v32  ;;  %v1854_v48 = vadd.f32 %v6295_v41, %v1833_v0  ;;  %v2773_v24 = vrot.slane %v6463_v11, 3  ;;  %v6489_v23 = vstv %s6422_s6  ;;  %s6877_s6 = sld [smem:[#allocation4 + $0x8f]] }
 0x259   : > { %v6416_v44 = vpop.permute.xlu0 %2070  ;;  %v2038_v19 = vadd.f32 %v6385_v14, %v2017_v29  ;;  %v2753_v32 = vsel %vm807_vm4, %v2751_v39, %v2752_v46  ;;  %v2787_v22 = vmul.f32 %v6479_v4, %v5871_v53  ;;  %v6501_v41 = vmul.f32 %v6479_v4, %v5979_v47 }
 0x25a   : > { %v6425_v62 = vpop.permute.xlu1 %1950  ;;  %v1875_v25 = vadd.f32 %v6333_v54, %v1854_v48  ;;  %v2633_v14 = vsel %vm663_vm3, %v2630_v57, %v2632_v59  ;;  %v2667_v38 = vmul.f32 %v6304_v30, %v6143_v12  ;;  %v1908_v43 = vrot.slane %v1901_v42, 4 }
 0x25b   : > { %2697 = vrot.lane.b32.xlu0 %v2694_v45, %s3735_s25  ;;  %v2808_v17 = vmul.f32 %v6489_v23, %v5871_v53  ;;  %v2050_v50 = vsel %vm1095_vm6, %v2048_v34, %v2049_v52  ;;  %v2774_v26 = vsel %vm807_vm4, %v2772_v9, %v2773_v24  ;;  %v6526_v30 = vmul.f32 %v6489_v23, %v5979_v47 }
 0x25c   : > { %2594 = vrot.lane.b32.xlu1 %v2591_v15, %s3730_s18  ;;  %v2653_v15 = vrot.slane %v2646_v16, 2  ;;  %v1896_v54 = vadd.f32 %v6364_v33, %v1875_v25  ;;  %v2793_v28 = vrot.slane %v2787_v22, 3  ;;  %v6532_v33 = vstv %s6472_s7  ;;  %s6898_s7 = sld [smem:[#allocation4 + $0x90]] }
 0x25d   : > { %v6454_v20 = vpop.permute.xlu0 %2091  ;;  %v2674_v0 = vrot.slane %v2667_v38, 2  ;;  %v2688_v59 = vmul.f32 %v6337_v49, %v6143_v12  ;;  %v1909_v16 = vsel %vm951_vm5, %v1906_v13, %v1908_v43  ;;  %v2814_v29 = vrot.slane %v2808_v17, 3 }
 0x25e   : > { %v6466_v35 = vpop.permute.xlu1 %1971  ;;  %v2654_v39 = vsel %vm663_vm3, %v2651_v37, %v2653_v15  ;;  %v1913_v42 = vadd.f32 %v1909_v16, %v1896_v54  ;;  %v2815_v48 = vrot.slane %v6526_v30, 3  ;;  %v2829_v56 = vmul.f32 %v6532_v33, %v5871_v53 }
 0x25f   : > { %2735 = vrot.lane.b32.xlu0 %v2732_v58, %s3730_s18  ;;  %v2794_v58 = vrot.slane %v6501_v41, 3  ;;  %v6551_v37 = vmul.f32 %v6532_v33, %v5979_v47  ;;  %v6560_v9 = vstv %s6503_s8  ;;  %v6571_v22 = vstv %s6512_s9  ;;  %s3622_s8 = sld [smem:[#allocation4 + $0x91]] }
 0x260   : > { %2615 = vrot.lane.b32.xlu1 %v2612_v10, %s3731_s20  ;;  %v2055_v10 = vadd.f32 %v2050_v50, %v2038_v19  ;;  %v2675_v19 = vsel %vm663_vm3, %v2672_v21, %v2674_v0  ;;  %v1934_v38 = vadd.f32 %v6397_v60, %v1913_v42  ;;  %v2816_v21 = vsel %vm807_vm4, %v2814_v29, %v2815_v48  ;;  %s3623_s9 = sld [smem:[#allocation4 + $0x92]] }
 0x261   : > { %v2113_v45 = vpop.permute.xlu0 %2112  ;;  %v2795_v13 = vsel %vm807_vm4, %v2793_v28, %v2794_v58  ;;  %v2835_v43 = vrot.slane %v2829_v56, 3  ;;  %v6589_v50 = vmul.f32 %v6571_v22, %v5979_v47  ;;  %v2747_v28 = vmul.f32 %v6407_v61, %v6143_v12 }
 0x262   : > { %v6492_v5 = vpop.permute.xlu1 %1992  ;;  %v2076_v49 = vadd.f32 %v6416_v44, %v2055_v10  ;;  %v2726_v44 = vmul.f32 %v6371_v40, %v6143_v12  ;;  %v2836_v40 = vrot.slane %v6551_v37, 3  ;;  %v1955_v60 = vadd.f32 %v6425_v62, %v1934_v38 }
 0x263   : > { %2756 = vrot.lane.b32.xlu0 %v2753_v32, %s3731_s20  ;;  %v2695_v32 = vrot.slane %v2688_v59, 2  ;;  %v2044_v0 = vmul.f32 %v5746_v8, %v6413_v1  ;;  %v2185_v59 = vmul.f32 %v6444_v6, %v6560_v9  ;;  %v2874_v29 = vrot.slane %v6589_v50, 4 }
 0x264   : > { %2636 = vrot.lane.b32.xlu1 %v2633_v14, %s3732_s21  ;;  %v2097_v25 = vadd.f32 %v6454_v20, %v2076_v49  ;;  %v3688_v14 = vld [vmem:[#allocation2 + $0x20] sm:$0xff]  ;;  %v2867_v20 = vmul.f32 %v6571_v22, %v5871_v53  ;;  %v2733_v10 = vrot.slane %v2726_v44, 3  ;;  %v1976_v3 = vadd.f32 %v6466_v35, %v1955_v60 }
 0x265   : > { %v2134_v57 = vpop.permute.xlu0 %2133  ;;  %v6576_v15 = vmul.f32 %v3688_v14, %v6560_v9  ;;  %v6623_v42 = vstv %s6562_s11  ;;  %v2754_v49 = vrot.slane %v2747_v28, 3  ;;  %v2330_v41 = vstv %s6662_s15  ;;  %s3736_s11 = smov 16   ;;  %s3740_s15 = smov 80  }
 0x266   : > { %v6528_v36 = vpop.permute.xlu1 %2013  ;;  %v2118_v17 = vadd.f32 %v2113_v45, %v2097_v25  ;;  %v2696_v45 = vsel %vm663_vm3, %v2693_v2, %v2695_v32  ;;  %v2837_v2 = vsel %vm807_vm4, %v2835_v43, %v2836_v40  ;;  %v1997_v35 = vadd.f32 %v6492_v5, %v1976_v3 }
 0x267   : > { %2777 = vrot.lane.b32.xlu0 %v2774_v26, %s3732_s21  ;;  %v6592_v26 = vstv %s6534_s10  ;;  %v2192_v62 = vrot.slane %v6576_v15, 6  ;;  %v2734_v56 = vsel %vm807_vm4, %v2731_v63, %v2733_v10  ;;  %v2909_v55 = vmul.f32 %v6623_v42, %v5871_v53  ;;  %s3582_s10 = sld [smem:[#allocation4 + $0x69]] }
 0x268   : > { %2657 = vrot.lane.b32.xlu1 %v2654_v39, %s3733_s22  ;;  %v2139_v39 = vadd.f32 %v2134_v57, %v2118_v17  ;;  %v2888_v61 = vmul.f32 %v6592_v26, %v5871_v53  ;;  %v6617_v8 = vmul.f32 %v6592_v26, %v5979_v47  ;;  %v2873_v57 = vrot.slane %v2867_v20, 4 }
 0x269   : > { %v2155_v34 = vpop.permute.xlu0 %2154  ;;  %v2018_v44 = vadd.f32 %v6528_v36, %v1997_v35  ;;  %v6649_v36 = vstv %s6594_s12  ;;  %v2755_v17 = vsel %vm807_vm4, %v2752_v46, %v2754_v49  ;;  %v2810_v3 = vmul.f32 %v6489_v23, %v6143_v12  ;;  %s3737_s12 = smov 32  }
 0x26a   : > { %v6554_v18 = vpop.permute.xlu1 %2034  ;;  %v2160_v1 = vadd.f32 %v2155_v34, %v2139_v39  ;;  %v2768_v34 = vmul.f32 %v6434_v7, %v6143_v12  ;;  %v2894_v5 = vrot.slane %v2888_v61, 4  ;;  %v2895_v14 = vrot.slane %v6617_v8, 4 }
 0x26b   : > { %2798 = vrot.lane.b32.xlu0 %v2795_v13, %s3733_s22  ;;  %v2051_v13 = vrot.slane %v2044_v0, 5  ;;  %v2875_v38 = vsel %vm951_vm5, %v2873_v57, %v2874_v29  ;;  %v6644_v7 = vmul.f32 %v6623_v42, %v5979_v47  ;;  %v2930_v46 = vmul.f32 %v6649_v36, %v5871_v53 }
 0x26c   : > { %2678 = vrot.lane.b32.xlu1 %v2675_v19, %s3734_s23  ;;  %v2191_v19 = vrot.slane %v2185_v59, 6  ;;  %v2775_v20 = vrot.slane %v2768_v34, 3  ;;  %v2896_v51 = vsel %vm951_vm5, %v2894_v5, %v2895_v14  ;;  %v6677_v27 = vmul.f32 %v6649_v36, %v5979_v47 }
 0x26d   : > { %v2176_v31 = vpop.permute.xlu0 %2175  ;;  %v2916_v28 = vrot.slane %v6644_v7, 4  ;;  %v2817_v49 = vrot.slane %v2810_v3, 3  ;;  %v2831_v34 = vmul.f32 %v6532_v33, %v6143_v12  ;;  %v6716_v5 = vstv %s6672_s16  ;;  %s3741_s16 = smov 96  }
 0x26e   : > { %v6583_v54 = vpop.permute.xlu1 %2072  ;;  %v2181_v32 = vadd.f32 %v2176_v31, %v2160_v1  ;;  %v2789_v31 = vmul.f32 %v6479_v4, %v6143_v12  ;;  %v2193_v43 = vsel %vm1239_vm7, %v2191_v19, %v2192_v62  ;;  %v2052_v4 = vsel %vm1095_vm6, %v2049_v52, %v2051_v13 }
 0x26f   : > { %2819 = vrot.lane.b32.xlu0 %v2816_v21, %s3734_s23  ;;  %v2039_v21 = vadd.f32 %v6554_v18, %v2018_v44  ;;  %v6680_v52 = vstv %s6625_s13  ;;  %v2776_v59 = vsel %vm807_vm4, %v2773_v24, %v2775_v20  ;;  %v2936_v1 = vrot.slane %v2930_v46, 4  ;;  %s3738_s13 = smov 48  }
 0x270   : > { %2699 = vrot.lane.b32.xlu1 %v2696_v45, %s3735_s25  ;;  %v2198_v60 = vadd.f32 %v2193_v43, %v2181_v32  ;;  %v2915_v45 = vrot.slane %v2909_v55, 4  ;;  %v2796_v39 = vrot.slane %v2789_v31, 3  ;;  %v2951_v57 = vmul.f32 %v6680_v52, %v5871_v53 }
 0x271   : > { %v2214_v16 = vpop.permute.xlu0 %2213  ;;  %v2056_v0 = vadd.f32 %v2052_v4, %v2039_v21  ;;  %v6693_v35 = vmul.f32 %v6680_v52, %v5979_v47  ;;  %v6709_v13 = vstv %s6659_s14  ;;  %v2818_v43 = vsel %vm807_vm4, %v2815_v48, %v2817_v49  ;;  %v3690_v4 = vld [vmem:[#allocation2 + $0x28] sm:$0x3f]  ;;  %s3739_s14 = smov 64  }
 0x272   : > { %v6619_v6 = vpop.permute.xlu1 %2093  ;;  %v2917_v24 = vsel %vm951_vm5, %v2915_v45, %v2916_v28  ;;  %v2797_v23 = vsel %vm807_vm4, %v2794_v58, %v2796_v39  ;;  %v2957_v44 = vrot.slane %v2951_v57, 4  ;;  %v2869_v20 = vmul.f32 %v6571_v22, %v6143_v12 }
 0x273   : > { %2840 = vrot.lane.b32.xlu0 %v2837_v2, %s3735_s25  ;;  %v2219_v2 = vadd.f32 %v2214_v16, %v2198_v60  ;;  %v2937_v16 = vrot.slane %v6677_v27, 4  ;;  %v2077_v53 = vadd.f32 %v6583_v54, %v2056_v0  ;;  %v6749_v45 = vmul.f32 %v6716_v5, %v5979_v47 }
 0x274   : > { %2737 = vrot.lane.b32.xlu1 %v2734_v56, %s3730_s18 }
 0x275   : > { %v2235_v25 = vpop.permute.xlu0 %2234  ;;  %v2098_v58 = vadd.f32 %v6619_v6, %v2077_v53  ;;  %v2938_v33 = vsel %vm951_vm5, %v2936_v1, %v2937_v16  ;;  %v6727_v6 = vmul.f32 %v6709_v13, %v5979_v47 }
 0x276   : > { %v2115_v63 = vpop.permute.xlu1 %2114  ;;  %v2240_v11 = vadd.f32 %v2235_v25, %v2219_v2  ;;  %v2958_v25 = vrot.slane %v6693_v35, 4  ;;  %v2876_v2 = vrot.slane %v2869_v20, 4  ;;  %v2932_v20 = vmul.f32 %v6649_v36, %v6143_v12 }
 0x277   : > { %2878 = vrot.lane.b32.xlu0 %v2875_v38, %s3730_s18  ;;  %v6721_v38 = vld [vmem:[#allocation2 + $0x30] sm:$0xff]  ;;  %v2119_v21 = vadd.f32 %v2115_v63, %v2098_v58  ;;  %v2979_v0 = vrot.slane %v6727_v6, 4  ;;  %v2911_v58 = vmul.f32 %v6623_v42, %v6143_v12 }
 0x278   : > { %2758 = vrot.lane.b32.xlu1 %v2755_v17, %s3731_s20  ;;  %v2972_v31 = vmul.f32 %v6721_v38, %v6709_v13  ;;  %v2838_v17 = vrot.slane %v2831_v34, 3  ;;  %v3010_v63 = vmul.f32 %v6721_v38, %v6716_v5  ;;  %v2331_v30 = vmul.f32 %v6721_v38, %v2330_v41 }
 0x279   : > { %v2256_v18 = vpop.permute.xlu0 %2255  ;;  %v2959_v22 = vsel %vm951_vm5, %v2957_v44, %v2958_v25  ;;  %v2877_v34 = vsel %vm951_vm5, %v2874_v29, %v2876_v2 }
 0x27a   : > { %v2136_v10 = vpop.permute.xlu1 %2135  ;;  %v2261_v19 = vadd.f32 %v2256_v18, %v2240_v11  ;;  %v2187_v18 = vmul.f32 %v3690_v4, %v6560_v9  ;;  %v2978_v39 = vrot.slane %v2972_v31, 4  ;;  %v2839_v3 = vsel %vm807_vm4, %v2836_v40, %v2838_v17 }
 0x27b   : > { %2899 = vrot.lane.b32.xlu0 %v2896_v51, %s3731_s20  ;;  %v2140_v51 = vadd.f32 %v2136_v10, %v2119_v21  ;;  %v3016_v11 = vrot.slane %v3010_v63, 5  ;;  %v2918_v17 = vrot.slane %v2911_v58, 4 }
 0x27c   : > { %2779 = vrot.lane.b32.xlu1 %v2776_v59, %s3732_s21  ;;  %v6753_v59 = vstv %s6702_s19  ;;  %v2194_v1 = vrot.slane %v2187_v18, 6  ;;  %v6818_v18 = vld [vmem:[#allocation2 + $0x38] sm:$0xff]  ;;  %s3742_s19 = smov 112  }
 0x27d   : > { %v2277_v61 = vpop.permute.xlu0 %2276  ;;  %v3031_v53 = vmul.f32 %v6721_v38, %v6753_v59  ;;  %v6769_v37 = vmul.f32 %v6753_v59, %v5979_v47 }
 0x27e   : > { %v2157_v56 = vpop.permute.xlu1 %2156  ;;  %v2282_v54 = vadd.f32 %v2277_v61, %v2261_v19  ;;  %v2890_v61 = vmul.f32 %v6592_v26, %v6143_v12  ;;  %v2980_v26 = vsel %vm951_vm5, %v2978_v39, %v2979_v0  ;;  %v2195_v44 = vsel %vm1239_vm7, %v2192_v62, %v2194_v1 }
 0x27f   : > { %2920 = vrot.lane.b32.xlu0 %v2917_v24, %s3732_s21  ;;  %v2161_v10 = vadd.f32 %v2157_v56, %v2140_v51  ;;  %v3017_v56 = vrot.slane %v6749_v45, 5  ;;  %v3038_v29 = vrot.slane %v6769_v37, 5  ;;  %v6800_v62 = vstv %s6755_s26 }
 0x280   : > { %2800 = vrot.lane.b32.xlu1 %v2797_v23, %s3733_s22  ;;  %v2897_v19 = vrot.slane %v2890_v61, 4  ;;  %v6822_v36 = vmul.f32 %v6818_v18, %v6800_v62 }
 0x281   : > { %v2298_v32 = vpop.permute.xlu0 %2297  ;;  %v3018_v50 = vsel %vm1095_vm6, %v3016_v11, %v3017_v56 }
 0x282   : > { %v2178_v55 = vpop.permute.xlu1 %2177  ;;  %v2303_v60 = vadd.f32 %v2298_v32, %v2282_v54  ;;  %v6783_v32 = vstv %s6735_s2  ;;  %v3080_v2 = vrot.slane %v6822_v36, 5 }
 0x283   : > { %2941 = vrot.lane.b32.xlu0 %v2938_v33, %s3733_s22  ;;  %v2182_v24 = vadd.f32 %v2178_v55, %v2161_v10  ;;  %v3037_v33 = vrot.slane %v3031_v53, 5  ;;  %v3052_v42 = vmul.f32 %v6721_v38, %v6783_v32  ;;  %v6797_v15 = vmul.f32 %v6783_v32, %v5979_v47 }
 0x284   : > { %2821 = vrot.lane.b32.xlu1 %v2818_v43, %s3734_s23  ;;  %v2898_v43 = vsel %vm951_vm5, %v2895_v14, %v2897_v19  ;;  %v2953_v47 = vmul.f32 %v6680_v52, %v6143_v12  ;;  %v3073_v14 = vmul.f32 %v6721_v38, %v6800_v62  ;;  %v2974_v53 = vmul.f32 %v6709_v13, %v6143_v12 }
 0x285   : > { %v2319_v48 = vpop.permute.xlu0 %2318  ;;  %v2199_v54 = vadd.f32 %v2195_v44, %v2182_v24  ;;  %v3039_v8 = vsel %vm1095_vm6, %v3037_v33, %v3038_v29  ;;  %v3059_v52 = vrot.slane %v6797_v15, 5  ;;  %v3012_v33 = vmul.f32 %v6716_v5, %v6143_v12 }
 0x286   : > { %v2324_v46 = vadd.f32 %v2319_v48, %v2303_v60  ;;  %v2216_v9 = vpop.permute.xlu1 %2215  ;;  %v6826_v48 = vstv %s6774_s28  ;;  %s232_s28 = scalar_lea.vmem %s7146_s4, %s3801_s24 }
 0x287   : > { %2962 = vrot.lane.b32.xlu0 %v2959_v22, %s3734_s23  ;;  %v2220_v60 = vadd.f32 %v2216_v9, %v2199_v54  ;;  %v2939_v9 = vrot.slane %v2932_v20, 4  ;;  %v3094_v61 = vmul.f32 %v6721_v38, %v6826_v48  ;;  %v6845_v11 = vmul.f32 %v6818_v18, %v6826_v48 }
 0x288   : > { %v2333_v57 = vadd.f32 %v2331_v30, %v2324_v46  ;;  %2842 = vrot.lane.b32.xlu1 %v2839_v3, %s3735_s25  ;;  %v3058_v30 = vrot.slane %v3052_v42, 5  ;;  %v2919_v46 = vsel %vm951_vm5, %v2916_v28, %v2918_v17  ;;  %v3079_v3 = vrot.slane %v3073_v14, 5 }
 0x289   : > { %v2342_v23 = vpop.permute.xlu0 %2341  ;;  %v2960_v28 = vrot.slane %v2953_v47, 4  ;;  %v3101_v13 = vrot.slane %v6845_v11, 5  ;;  %v6875_v54 = vstv %s6828_s30  ;;  %v3019_v47 = vrot.slane %v3012_v33, 5 }
 0x28a   : > { %v2347_v40 = vadd.f32 %v2342_v23, %v2333_v57  ;;  %v2237_v49 = vpop.permute.xlu1 %2236  ;;  %v3060_v7 = vsel %vm1095_vm6, %v3058_v30, %v3059_v52  ;;  %v2940_v23 = vsel %vm951_vm5, %v2937_v16, %v2939_v9  ;;  %v3081_v27 = vsel %vm1095_vm6, %v3079_v3, %v3080_v2 }
 0x28b   : > { %2983 = vrot.lane.b32.xlu0 %v2980_v26, %s3735_s25  ;;  %v2241_v22 = vadd.f32 %v2237_v49, %v2220_v60  ;;  %v3100_v16 = vrot.slane %v3094_v61, 5  ;;  %v3153_v42 = vmul.f32 %v6721_v38, %v6875_v54  ;;  %v3033_v60 = vmul.f32 %v6753_v59, %v6143_v12 }
 0x28c   : > { %2880 = vrot.lane.b32.xlu1 %v2877_v34, %s3730_s18  ;;  %v2332_v34 = vmul.f32 %v6818_v18, %v2330_v41  ;;  %v3054_v30 = vmul.f32 %v6783_v32, %v6143_v12  ;;  %v3020_v12 = vsel %vm1095_vm6, %v3017_v56, %v3019_v47  ;;  %v6976_v33 = vstv %s3622_s8 }
 0x28d   : > { %v2356_v55 = vpop.permute.xlu0 %2355  ;;  %v3040_v32 = vrot.slane %v3033_v60, 5  ;;  %v3257_v60 = vstv %s3623_s9 }
 0x28e   : > { %v2361_v31 = vadd.f32 %v2356_v55, %v2347_v40  ;;  %v2258_v21 = vpop.permute.xlu1 %2257  ;;  %v6854_v40 = vstv %s6808_s29  ;;  %v2961_v55 = vsel %vm951_vm5, %v2958_v25, %v2960_v28  ;;  %v3102_v25 = vsel %vm1095_vm6, %v3100_v16, %v3101_v13 }
 0x28f   : > { %3021 = vrot.lane.b32.xlu0 %v3018_v50, %s3730_s18  ;;  %v2262_v39 = vadd.f32 %v2258_v21, %v2241_v22  ;;  %v3115_v58 = vmul.f32 %v6721_v38, %v6854_v40  ;;  %v6872_v44 = vmul.f32 %v6818_v18, %v6854_v40  ;;  %v2981_v50 = vrot.slane %v2974_v53, 4  ;;  %v6951_v53 = vld [vmem:[#allocation2 + $0x40] sm:$0x3f] }
 0x290   : > { %2901 = vrot.lane.b32.xlu1 %v2898_v43, %s3731_s20  ;;  %v6892_v43 = vmul.f32 %v6818_v18, %v6875_v54  ;;  %v3061_v3 = vrot.slane %v3054_v30, 5  ;;  %v6945_v28 = vstv %s6898_s7  ;;  %v3117_v47 = vmul.f32 %v6951_v53, %v6854_v40 }
 0x291   : > { %v2370_v4 = vpop.permute.xlu0 %2369  ;;  %v3121_v17 = vrot.slane %v3115_v58, 5  ;;  %v3122_v5 = vrot.slane %v6872_v44, 5  ;;  %v2982_v20 = vsel %vm951_vm5, %v2979_v0, %v2981_v50  ;;  %v6962_v16 = vmul.f32 %v6818_v18, %v6945_v28 }
 0x292   : > { %v2375_v63 = vadd.f32 %v2370_v4, %v2361_v31  ;;  %v2279_v51 = vpop.permute.xlu1 %2278  ;;  %v6907_v4 = vstv %s6856_s5  ;;  %v3096_v50 = vmul.f32 %v6951_v53, %v6826_v48  ;;  %v6991_v48 = vmul.f32 %v6818_v18, %v6976_v33 }
 0x293   : > { %3042 = vrot.lane.b32.xlu0 %v3039_v8, %s3731_s20  ;;  %v2283_v24 = vadd.f32 %v2279_v51, %v2262_v39  ;;  %v3160_v51 = vrot.slane %v6892_v43, 6  ;;  %v3123_v0 = vsel %vm1095_vm6, %v3121_v17, %v3122_v5  ;;  %v3174_v59 = vmul.f32 %v6721_v38, %v6907_v4 }
 0x294   : > { %2922 = vrot.lane.b32.xlu1 %v2919_v46, %s3732_s21  ;;  %v6922_v22 = vmul.f32 %v6818_v18, %v6907_v4  ;;  %v6925_v46 = vstv %s6877_s6  ;;  %v3244_v36 = vrot.slane %v6991_v48, 6 }
 0x295   : > { %v2384_v10 = vpop.permute.xlu0 %2383  ;;  %v3195_v61 = vmul.f32 %v6721_v38, %v6925_v46  ;;  %v6942_v56 = vmul.f32 %v6818_v18, %v6925_v46 }
 0x296   : > { %v6838_v1 = vadd.f32 %v2384_v10, %v2375_v63  ;;  %v2300_v57 = vpop.permute.xlu1 %2299  ;;  %v3159_v63 = vrot.slane %v3153_v42, 6  ;;  %v3181_v45 = vrot.slane %v6922_v22, 6 }
 0x297   : > { %3063 = vrot.lane.b32.xlu0 %v3060_v7, %s3732_s21  ;;  %v2304_v49 = vadd.f32 %v2300_v57, %v2283_v24  ;;  %v3180_v7 = vrot.slane %v3174_v59, 6  ;;  %v3202_v58 = vrot.slane %v6942_v56, 6  ;;  %v3124_v59 = vrot.slane %v3117_v47, 5 }
 0x298   : > { %2943 = vrot.lane.b32.xlu1 %v2940_v23, %s3733_s22  ;;  %v3161_v10 = vsel %vm1239_vm7, %v3159_v63, %v3160_v51  ;;  %v3041_v23 = vsel %vm1095_vm6, %v3038_v29, %v3040_v32  ;;  %v3260_v56 = vmul.f32 %v6951_v53, %v3257_v60 }
 0x299   : > { %v6859_v26 = vpop.permute.xlu0 %2397  ;;  %v3182_v29 = vsel %vm1239_vm7, %v3180_v7, %v3181_v45  ;;  %v3125_v11 = vsel %vm1095_vm6, %v3122_v5, %v3124_v59  ;;  %v2420_v7 = vstv %s3582_s10 }
 0x29a   : > { %v2321_v19 = vpop.permute.xlu1 %2320 }
 0x29b   : > { %v2325_v41 = vadd.f32 %v2321_v19, %v2304_v49  ;;  %3084 = vrot.lane.b32.xlu0 %v3081_v27, %s3733_s22  ;;  %v3075_v49 = vmul.f32 %v6951_v53, %v6800_v62  ;;  %v3216_v27 = vmul.f32 %v6721_v38, %v6945_v28  ;;  %v3062_v62 = vsel %vm1095_vm6, %v3059_v52, %v3061_v3 }
 0x29c   : > { %2964 = vrot.lane.b32.xlu1 %v2961_v55, %s3734_s23  ;;  %v3201_v19 = vrot.slane %v3195_v61, 6  ;;  %v3223_v52 = vrot.slane %v6962_v16, 6 }
 0x29d   : > { %v2334_v31 = vadd.f32 %v2332_v34, %v2325_v41  ;;  %v6886_v21 = vpop.permute.xlu0 %2411  ;;  %v3082_v55 = vrot.slane %v3075_v49, 5  ;;  %v3222_v15 = vrot.slane %v3216_v27, 6  ;;  %v3197_v49 = vmul.f32 %v6951_v53, %v6925_v46 }
 0x29e   : > { %v2344_v35 = vpop.permute.xlu1 %2343  ;;  %v2422_v27 = vmul.f32 %v6818_v18, %v2420_v7  ;;  %v2403_v46 = vadd.f32 %v6859_v26, %v6838_v1 }
 0x29f   : > { %3105 = vrot.lane.b32.xlu0 %v3102_v25, %s3734_s23  ;;  %v2348_v8 = vadd.f32 %v2344_v35, %v2334_v31  ;;  %v3203_v35 = vsel %vm1239_vm7, %v3201_v19, %v3202_v58  ;;  %v3237_v25 = vmul.f32 %v6721_v38, %v6976_v33  ;;  %v3083_v17 = vsel %vm1095_vm6, %v3080_v2, %v3082_v55 }
 0x2a0   : > { %2985 = vrot.lane.b32.xlu1 %v2982_v20, %s3735_s25  ;;  %v3103_v20 = vrot.slane %v3096_v50, 5  ;;  %v3224_v63 = vsel %vm1239_vm7, %v3222_v15, %v3223_v52  ;;  %v3258_v2 = vmul.f32 %v6721_v38, %v3257_v60  ;;  %v3204_v43 = vrot.slane %v3197_v49, 6 }
 0x2a1   : > { %v6910_v14 = vpop.permute.xlu0 %2449  ;;  %v2428_v55 = vrot.slane %v2422_v27, 1  ;;  %v2417_v15 = vadd.f32 %v6886_v21, %v2403_v46 }
 0x2a2   : > { %v2358_v6 = vpop.permute.xlu1 %2357  ;;  %v3104_v40 = vsel %vm1095_vm6, %v3101_v13, %v3103_v20  ;;  %v3264_v3 = vrot.slane %v3258_v2, 6  ;;  %v3205_v22 = vsel %vm1239_vm7, %v3202_v58, %v3204_v43 }
 0x2a3   : > { %v2362_v9 = vadd.f32 %v2358_v6, %v2348_v8  ;;  %3126 = vrot.lane.b32.xlu0 %v3123_v0, %s3735_s25  ;;  %v3243_v6 = vrot.slane %v3237_v25, 6  ;;  %v7010_v0 = vmul.f32 %v6818_v18, %v3257_v60 }
 0x2a4   : > { %3023 = vrot.lane.b32.xlu1 %v3020_v12, %s3730_s18 }
 0x2a5   : > { %v6932_v39 = vpop.permute.xlu0 %2470  ;;  %v3265_v61 = vrot.slane %v7010_v0, 6 }
 0x2a6   : > { %v2372_v57 = vpop.permute.xlu1 %2371 }
 0x2a7   : > { %v2376_v24 = vadd.f32 %v2372_v57, %v2362_v9  ;;  %3164 = vrot.lane.b32.xlu0 %v3161_v10, %s3730_s18  ;;  %v3155_v9 = vmul.f32 %v6951_v53, %v6875_v54  ;;  %v3245_v10 = vsel %vm1239_vm7, %v3243_v6, %v3244_v36  ;;  %v3176_v54 = vmul.f32 %v6951_v53, %v6907_v4 }
 0x2a8   : > { %3044 = vrot.lane.b32.xlu1 %v3041_v23, %s3731_s20  ;;  %v3266_v23 = vsel %vm1239_vm7, %v3264_v3, %v3265_v61  ;;  %v2421_v4 = vmul.f32 %v6721_v38, %v2420_v7 }
 0x2a9   : > { %v6956_v34 = vpop.permute.xlu0 %2491  ;;  %v3162_v13 = vrot.slane %v3155_v9, 6  ;;  %v3183_v5 = vrot.slane %v3176_v54, 6  ;;  %v2423_v9 = vmul.f32 %v6951_v53, %v2420_v7 }
 0x2aa   : > { %v2386_v37 = vpop.permute.xlu1 %2385  ;;  %v2427_v19 = vrot.slane %v2421_v4, 1 }
 0x2ab   : > { %v6971_v41 = vadd.f32 %v2386_v37, %v2376_v24  ;;  %3185 = vrot.lane.b32.xlu0 %v3182_v29, %s3731_s20  ;;  %v3163_v44 = vsel %vm1239_vm7, %v3160_v51, %v3162_v13  ;;  %v3218_v51 = vmul.f32 %v6951_v53, %v6945_v28  ;;  %v3239_v28 = vmul.f32 %v6951_v53, %v6976_v33 }
 0x2ac   : > { %3065 = vrot.lane.b32.xlu1 %v3062_v62, %s3732_s21  ;;  %v3184_v62 = vsel %vm1239_vm7, %v3181_v45, %v3183_v5  ;;  %v2429_v1 = vsel %vm519_vm1, %v2427_v19, %v2428_v55 }
 0x2ad   : > { %v6979_v31 = vpop.permute.xlu0 %2512  ;;  %v3225_v45 = vrot.slane %v3218_v51, 6  ;;  %v2434_v25 = vadd.f32 %v2429_v1, %v2417_v15 }
 0x2ae   : > { %v6982_v42 = vpop.permute.xlu1 %2399 }
 0x2af   : > { %3206 = vrot.lane.b32.xlu0 %v3203_v35, %s3732_s21  ;;  %v3226_v21 = vsel %vm1239_vm7, %v3223_v52, %v3225_v45  ;;  %v2455_v33 = vadd.f32 %v6910_v14, %v2434_v25  ;;  %v2404_v13 = vadd.f32 %v6982_v42, %v6971_v41 }
 0x2b0   : > { %3086 = vrot.lane.b32.xlu1 %v3083_v17, %s3733_s22  ;;  %v3246_v17 = vrot.slane %v3239_v28, 6 }
 0x2b1   : > { %v7000_v8 = vpop.permute.xlu0 %2533  ;;  %v2476_v6 = vadd.f32 %v6932_v39, %v2455_v33 }
 0x2b2   : > { %v7005_v30 = vpop.permute.xlu1 %2413  ;;  %v3247_v47 = vsel %vm1239_vm7, %v3244_v36, %v3246_v17 }
 0x2b3   : > { %3227 = vrot.lane.b32.xlu0 %v3224_v63, %s3733_s22  ;;  %v3267_v63 = vrot.slane %v3260_v56, 6  ;;  %v2497_v52 = vadd.f32 %v6956_v34, %v2476_v6 }
 0x2b4   : > { %3107 = vrot.lane.b32.xlu1 %v3104_v40, %s3734_s23 }
 0x2b5   : > { %v7019_v12 = vpop.permute.xlu0 %2554  ;;  %v3268_v59 = vsel %vm1239_vm7, %v3265_v61, %v3267_v63  ;;  %v2518_v14 = vadd.f32 %v6979_v31, %v2497_v52  ;;  %v2418_v31 = vadd.f32 %v7005_v30, %v2404_v13 }
 0x2b6   : > { %v7021_v32 = vpop.permute.xlu1 %2451 }
 0x2b7   : > { %3248 = vrot.lane.b32.xlu0 %v3245_v10, %s3734_s23  ;;  %v2539_v39 = vadd.f32 %v7000_v8, %v2518_v14 }
 0x2b8   : > { %3128 = vrot.lane.b32.xlu1 %v3125_v11, %s3735_s25 }
 0x2b9   : > { %v7032_v57 = vpop.permute.xlu0 %2592  ;;  %v2560_v34 = vadd.f32 %v7019_v12, %v2539_v39 }
 0x2ba   : > { %v7034_v24 = vpop.permute.xlu1 %2472 }
 0x2bb   : > { %3269 = vrot.lane.b32.xlu0 %v3266_v23, %s3735_s25  ;;  %v2430_v23 = vrot.slane %v2423_v9, 1 }
 0x2bc   : > { %3166 = vrot.lane.b32.xlu1 %v3163_v44, %s3730_s18  ;;  %s3589_s18 = sld [smem:[#allocation4 + $0x70]] }
 0x2bd   : > { %v2614_v37 = vpop.permute.xlu0 %2613  ;;  %v2431_v7 = vsel %vm519_vm1, %v2428_v55, %v2430_v23 }
 0x2be   : > { %v7046_v29 = vpop.permute.xlu1 %2493  ;;  %v2435_v4 = vadd.f32 %v2431_v7, %v2418_v31 }
 0x2c0   : > { %3187 = vrot.lane.b32.xlu1 %v3184_v62, %s3731_s20  ;;  %s3596_s20 = sld [smem:[#allocation4 + $0x77]]  ;;  %v2456_v42 = vadd.f32 %v7021_v32, %v2435_v4 }
 0x2c1   : > { %v2635_v50 = vpop.permute.xlu0 %2634 }
 0x2c2   : > { %v7057_v35 = vpop.permute.xlu1 %2514  ;;  %v2563_v2 = vstv %s3589_s18  ;;  %v2477_v46 = vadd.f32 %v7034_v24, %v2456_v42 }
 0x2c3   : > { %v2564_v60 = vmul.f32 %v6721_v38, %v2563_v2  ;;  %v2565_v40 = vmul.f32 %v6818_v18, %v2563_v2 }
 0x2c4   : > { %3208 = vrot.lane.b32.xlu1 %v3205_v22, %s3732_s21  ;;  %v2498_v45 = vadd.f32 %v7046_v29, %v2477_v46  ;;  %s3603_s21 = sld [smem:[#allocation4 + $0x7e]] }
 0x2c5   : > { %v2656_v26 = vpop.permute.xlu0 %2655  ;;  %v2570_v3 = vrot.slane %v2564_v60, 2  ;;  %v2571_v11 = vrot.slane %v2565_v40, 2 }
 0x2c6   : > { %v2536_v48 = vpop.permute.xlu1 %2535  ;;  %v2706_v43 = vstv %s3596_s20 }
 0x2c7   : > { %v2572_v44 = vsel %vm663_vm3, %v2570_v3, %v2571_v11  ;;  %v2707_v30 = vmul.f32 %v6721_v38, %v2706_v43  ;;  %v2708_v19 = vmul.f32 %v6818_v18, %v2706_v43 }
 0x2c8   : > { %3229 = vrot.lane.b32.xlu1 %v3226_v21, %s3733_s22  ;;  %v2577_v5 = vadd.f32 %v2572_v44, %v2560_v34  ;;  %s3610_s22 = sld [smem:[#allocation4 + $0x85]] }
 0x2c9   : > { %v2677_v58 = vpop.permute.xlu0 %2676  ;;  %v2713_v1 = vrot.slane %v2707_v30, 3  ;;  %v2714_v25 = vrot.slane %v2708_v19, 3 }
 0x2ca   : > { %v2557_v20 = vpop.permute.xlu1 %2556  ;;  %v2598_v27 = vadd.f32 %v7032_v57, %v2577_v5  ;;  %v2566_v57 = vmul.f32 %v6951_v53, %v2563_v2  ;;  %v2849_v60 = vstv %s3603_s21 }
 0x2cb   : > { %v2715_v33 = vsel %vm807_vm4, %v2713_v1, %v2714_v25  ;;  %v2851_v39 = vmul.f32 %v6818_v18, %v2849_v60 }
 0x2cc   : > { %3250 = vrot.lane.b32.xlu1 %v3247_v47, %s3734_s23  ;;  %v2619_v62 = vadd.f32 %v2614_v37, %v2598_v27  ;;  %v2519_v37 = vadd.f32 %v7057_v35, %v2498_v45  ;;  %v2573_v17 = vrot.slane %v2566_v57, 2  ;;  %s3617_s23 = sld [smem:[#allocation4 + $0x8c]] }
 0x2cd   : > { %v2698_v16 = vpop.permute.xlu0 %2697 }
 0x2ce   : > { %v2595_v0 = vpop.permute.xlu1 %2594  ;;  %v2640_v51 = vadd.f32 %v2635_v50, %v2619_v62  ;;  %v2540_v24 = vadd.f32 %v2536_v48, %v2519_v37  ;;  %v2574_v29 = vsel %vm663_vm3, %v2571_v11, %v2573_v17  ;;  %v2709_v11 = vmul.f32 %v6951_v53, %v2706_v43 }
 0x2cf   : > { %v2992_v46 = vstv %s3610_s22 }
 0x2d0   : > { %3271 = vrot.lane.b32.xlu1 %v3268_v59, %s3735_s25  ;;  %v2661_v22 = vadd.f32 %v2656_v26, %v2640_v51  ;;  %v2561_v56 = vadd.f32 %v2557_v20, %v2540_v24  ;;  %v2850_v20 = vmul.f32 %v6721_v38, %v2849_v60  ;;  %s7114_s25 = sld [smem:[#allocation3]] }
 0x2d1   : > { %v2736_v36 = vpop.permute.xlu0 %2735 }
 0x2d2   : > { %v2616_v10 = vpop.permute.xlu1 %2615  ;;  %v2682_v28 = vadd.f32 %v2677_v58, %v2661_v22  ;;  %v2578_v58 = vadd.f32 %v2574_v29, %v2561_v56  ;;  %v2856_v31 = vrot.slane %v2850_v20, 4  ;;  %v2993_v22 = vmul.f32 %v6721_v38, %v2992_v46 }
 0x2d4   : > { %v2703_v50 = vadd.f32 %v2698_v16, %v2682_v28  ;;  %v2599_v40 = vadd.f32 %v2595_v0, %v2578_v58 }
 0x2d5   : > { %v2757_v54 = vpop.permute.xlu0 %2756 }
 0x2d6   : > { %v2637_v61 = vpop.permute.xlu1 %2636  ;;  %v2720_v47 = vadd.f32 %v2715_v33, %v2703_v50  ;;  %v2620_v14 = vadd.f32 %v2616_v10, %v2599_v40  ;;  %v2999_v50 = vrot.slane %v2993_v22, 5 }
 0x2d8   : > { %v2741_v2 = vadd.f32 %v2736_v36, %v2720_v47  ;;  %v2641_v3 = vadd.f32 %v2637_v61, %v2620_v14 }
 0x2d9   : > { %v2778_v8 = vpop.permute.xlu0 %2777 }
 0x2da   : > { %v2658_v49 = vpop.permute.xlu1 %2657  ;;  %v2762_v52 = vadd.f32 %v2757_v54, %v2741_v2  ;;  %v2857_v54 = vrot.slane %v2851_v39, 4 }
 0x2db   : > { %v2662_v36 = vadd.f32 %v2658_v49, %v2641_v3 }
 0x2dc   : > { %v2783_v59 = vadd.f32 %v2778_v8, %v2762_v52  ;;  %v2716_v8 = vrot.slane %v2709_v11, 3  ;;  %v2858_v4 = vsel %vm951_vm5, %v2856_v31, %v2857_v54  ;;  %v2995_v31 = vmul.f32 %v6951_v53, %v2992_v46 }
 0x2dd   : > { %v2799_v12 = vpop.permute.xlu0 %2798 }
 0x2de   : > { %v2679_v41 = vpop.permute.xlu1 %2678  ;;  %v2804_v9 = vadd.f32 %v2799_v12, %v2783_v59  ;;  %v2717_v61 = vsel %vm807_vm4, %v2714_v25, %v2716_v8  ;;  %v2852_v25 = vmul.f32 %v6951_v53, %v2849_v60  ;;  %v3135_v59 = vstv %s3617_s23 }
 0x2df   : > { %v2683_v0 = vadd.f32 %v2679_v41, %v2662_v36  ;;  %v3136_v3 = vmul.f32 %v6721_v38, %v3135_v59 }
 0x2e1   : > { %v2820_v15 = vpop.permute.xlu0 %2819 }
 0x2e2   : > { %v2700_v55 = vpop.permute.xlu1 %2699  ;;  %v2825_v13 = vadd.f32 %v2820_v15, %v2804_v9 }
 0x2e3   : > { %v2704_v10 = vadd.f32 %v2700_v55, %v2683_v0  ;;  %v2994_v55 = vmul.f32 %v6818_v18, %v2992_v46  ;;  %v3142_v0 = vrot.slane %v3136_v3, 6 }
 0x2e5   : > { %v2841_v32 = vpop.permute.xlu0 %2840  ;;  %v2721_v42 = vadd.f32 %v2717_v61, %v2704_v10  ;;  %v3000_v24 = vrot.slane %v2994_v55, 5 }
 0x2e6   : > { %v2738_v21 = vpop.permute.xlu1 %2737  ;;  %v2846_v44 = vadd.f32 %v2841_v32, %v2825_v13 }
 0x2e7   : > { %v2742_v19 = vadd.f32 %v2738_v21, %v2721_v42 }
 0x2e8   : > { %v2863_v27 = vadd.f32 %v2858_v4, %v2846_v44  ;;  %v3002_v4 = vrot.slane %v2995_v31, 5 }
 0x2e9   : > { %v2879_v26 = vpop.permute.xlu0 %2878 }
 0x2ea   : > { %v2759_v63 = vpop.permute.xlu1 %2758  ;;  %v2884_v43 = vadd.f32 %v2879_v26, %v2863_v27  ;;  %v2859_v26 = vrot.slane %v2852_v25, 4  ;;  %v3278_v25 = vstv %s7114_s25 }
 0x2eb   : > { %v2763_v15 = vadd.f32 %v2759_v63, %v2742_v19  ;;  %v3001_v63 = vsel %vm1095_vm6, %v2999_v50, %v3000_v24 }
 0x2ec   : > { %v2860_v2 = vsel %vm951_vm5, %v2857_v54, %v2859_v26 }
 0x2ed   : > { %v2900_v6 = vpop.permute.xlu0 %2899 }
 0x2ee   : > { %v2780_v35 = vpop.permute.xlu1 %2779  ;;  %v2905_v49 = vadd.f32 %v2900_v6, %v2884_v43 }
 0x2ef   : > { %v2784_v37 = vadd.f32 %v2780_v35, %v2763_v15 }
 0x2f1   : > { %v2921_v16 = vpop.permute.xlu0 %2920 }
 0x2f2   : > { %v2801_v48 = vpop.permute.xlu1 %2800  ;;  %v2926_v41 = vadd.f32 %v2921_v16, %v2905_v49 }
 0x2f3   : > { %v2805_v32 = vadd.f32 %v2801_v48, %v2784_v37  ;;  %v3138_v37 = vmul.f32 %v6951_v53, %v3135_v59 }
 0x2f5   : > { %v2942_v34 = vpop.permute.xlu0 %2941 }
 0x2f6   : > { %v2822_v23 = vpop.permute.xlu1 %2821  ;;  %v2947_v28 = vadd.f32 %v2942_v34, %v2926_v41  ;;  %v3137_v34 = vmul.f32 %v6818_v18, %v3135_v59 }
 0x2f7   : > { %v2826_v21 = vadd.f32 %v2822_v23, %v2805_v32 }
 0x2f9   : > { %v2963_v5 = vpop.permute.xlu0 %2962 }
 0x2fa   : > { %v2843_v7 = vpop.permute.xlu1 %2842  ;;  %v2968_v1 = vadd.f32 %v2963_v5, %v2947_v28  ;;  %v3143_v5 = vrot.slane %v3137_v34, 6 }
 0x2fb   : > { %v2847_v47 = vadd.f32 %v2843_v7, %v2826_v21 }
 0x2fc   : > { %v3144_v38 = vsel %vm1239_vm7, %v3142_v0, %v3143_v5 }
 0x2fd   : > { %v2984_v12 = vpop.permute.xlu0 %2983  ;;  %v2864_v35 = vadd.f32 %v2860_v2, %v2847_v47 }
 0x2fe   : > { %v2881_v62 = vpop.permute.xlu1 %2880  ;;  %v2989_v56 = vadd.f32 %v2984_v12, %v2968_v1 }
 0x2ff   : > { %v2885_v48 = vadd.f32 %v2881_v62, %v2864_v35  ;;  %v3003_v62 = vsel %vm1095_vm6, %v3000_v24, %v3002_v4 }
 0x300   : > { %v3006_v58 = vadd.f32 %v3001_v63, %v2989_v56 }
 0x301   : > { %v3022_v51 = vpop.permute.xlu0 %3021 }
 0x302   : > { %v2902_v30 = vpop.permute.xlu1 %2901  ;;  %v3027_v60 = vadd.f32 %v3022_v51, %v3006_v58 }
 0x303   : > { %v2906_v9 = vadd.f32 %v2902_v30, %v2885_v48 }
 0x305   : > { %v3043_v45 = vpop.permute.xlu0 %3042 }
 0x306   : > { %v2923_v57 = vpop.permute.xlu1 %2922  ;;  %v3048_v16 = vadd.f32 %v3043_v45, %v3027_v60 }
 0x307   : > { %v2927_v11 = vadd.f32 %v2923_v57, %v2906_v9 }
 0x309   : > { %v3064_v17 = vpop.permute.xlu0 %3063 }
 0x30a   : > { %v2944_v33 = vpop.permute.xlu1 %2943  ;;  %v3069_v20 = vadd.f32 %v3064_v17, %v3048_v16 }
 0x30b   : > { %v2948_v44 = vadd.f32 %v2944_v33, %v2927_v11  ;;  %v3145_v33 = vrot.slane %v3138_v37, 6 }
 0x30d   : > { %v3085_v29 = vpop.permute.xlu0 %3084  ;;  %v3146_v63 = vsel %vm1239_vm7, %v3143_v5, %v3145_v33 }
 0x30e   : > { %v2965_v6 = vpop.permute.xlu1 %2964  ;;  %v3090_v13 = vadd.f32 %v3085_v29, %v3069_v20 }
 0x30f   : > { %v2969_v7 = vadd.f32 %v2965_v6, %v2948_v44 }
 0x311   : > { %v3106_v52 = vpop.permute.xlu0 %3105 }
 0x312   : > { %v2986_v40 = vpop.permute.xlu1 %2985  ;;  %v3111_v36 = vadd.f32 %v3106_v52, %v3090_v13 }
 0x313   : > { %v2990_v12 = vadd.f32 %v2986_v40, %v2969_v7 }
 0x315   : > { %v3127_v14 = vpop.permute.xlu0 %3126  ;;  %v3007_v43 = vadd.f32 %v3003_v62, %v2990_v12 }
 0x316   : > { %v3024_v39 = vpop.permute.xlu1 %3023  ;;  %v3132_v8 = vadd.f32 %v3127_v14, %v3111_v36 }
 0x317   : > { %v3028_v19 = vadd.f32 %v3024_v39, %v3007_v43 }
 0x318   : > { %v3149_v61 = vadd.f32 %v3144_v38, %v3132_v8 }
 0x319   : > { %v3165_v23 = vpop.permute.xlu0 %3164 }
 0x31a   : > { %v3045_v54 = vpop.permute.xlu1 %3044  ;;  %v3170_v51 = vadd.f32 %v3165_v23, %v3149_v61 }
 0x31b   : > { %v3049_v15 = vadd.f32 %v3045_v54, %v3028_v19 }
 0x31d   : > { %v3186_v10 = vpop.permute.xlu0 %3185 }
 0x31e   : > { %v3066_v27 = vpop.permute.xlu1 %3065  ;;  %v3191_v46 = vadd.f32 %v3186_v10, %v3170_v51 }
 0x31f   : > { %v3070_v28 = vadd.f32 %v3066_v27, %v3049_v15 }
 0x321   : > { %v3207_v18 = vpop.permute.xlu0 %3206 }
 0x322   : > { %v3087_v42 = vpop.permute.xlu1 %3086  ;;  %v3212_v41 = vadd.f32 %v3207_v18, %v3191_v46 }
 0x323   : > { %v3091_v1 = vadd.f32 %v3087_v42, %v3070_v28  ;;  %v3374_v42 = vlaneseq }
 0x325   : > { %v3228_v49 = vpop.permute.xlu0 %3227  ;;  %v3375_v51 = vshrl.u32 %v3374_v42, 7 }
 0x326   : > { %v3108_v30 = vpop.permute.xlu1 %3107  ;;  %v3233_v55 = vadd.f32 %v3228_v49, %v3212_v41 }
 0x327   : > { %v3112_v17 = vadd.f32 %v3108_v30, %v3091_v1 }
 0x329   : > { %v3249_v22 = vpop.permute.xlu0 %3248 }
 0x32a   : > { %v3129_v45 = vpop.permute.xlu1 %3128  ;;  %v3254_v57 = vadd.f32 %v3249_v22, %v3233_v55  ;;  %v3376_v22 = vsub.s32 0, %v3375_v51 }
 0x32b   : > { %v3133_v21 = vadd.f32 %v3129_v45, %v3112_v17 }
 0x32d   : > { %v3270_v32 = vpop.permute.xlu0 %3269  ;;  %v3150_v29 = vadd.f32 %v3146_v63, %v3133_v21 }
 0x32e   : > { %v3275_v50 = vadd.f32 %v3270_v32, %v3254_v57  ;;  %v3167_v24 = vpop.permute.xlu1 %3166  ;;  %v3372_v57 = vld [vmem:[%s3807_s27] sm:$0xff]  ;;  %v3373_v32 = vld [vmem:[%s3807_s27 + $0x8] sm:$0xff] }
 0x32f   : > { %v3171_v6 = vadd.f32 %v3167_v24, %v3150_v29 }
 0x330   : > { %v3279_v56 = vadd.f32 %v3278_v25, %v3275_v50 }
 0x332   : > { %v3624_v26 = vmul.f32 -1.442695, %v3279_v56  ;;  %v3188_v47 = vpop.permute.xlu1 %3187 }
 0x333   : > { %v3192_v35 = vadd.f32 %v3188_v47, %v3171_v6 }
 0x334   : > { %3672 = vpow2.f32 %v3624_v26 }
 0x336   : > { %v3209_v58 = vpop.permute.xlu1 %3208 }
 0x337   : > { %v3213_v53 = vadd.f32 %v3209_v58, %v3192_v35 }
 0x33a   : > { %v3230_v2 = vpop.permute.xlu1 %3229 }
 0x33b   : > { %v3234_v60 = vadd.f32 %v3230_v2, %v3213_v53 }
 0x33e   : > { %v3251_v52 = vpop.permute.xlu1 %3250 }
 0x33f   : > { %v3255_v16 = vadd.f32 %v3251_v52, %v3234_v60 }
 0x341   : > { %v3673_v40 = vpop.eup %3672 }
 0x342   : > { %v3287_v59 = vadd.f32 1.0, %v3673_v40  ;;  %v3272_v48 = vpop.permute.xlu1 %3271 }
 0x343   : > { %v3276_v14 = vadd.f32 %v3272_v48, %v3255_v16 }
 0x344   : > { %3674 = vrcp.f32 %v3287_v59 }
 0x345   : > { %v3280_v20 = vadd.f32 %v3278_v25, %v3276_v14 }
 0x347   : > { %v3625_v39 = vmul.f32 -1.442695, %v3280_v20 }
 0x349   : > { %3676 = vpow2.f32 %v3625_v39 }
 0x351   : > { %v3675_v9 = vpop.eup %3674 }
 0x352   : > { %v3294_v3 = vrot.slane %v3675_v9, 1  ;;  %v3298_v13 = vrot.slane %v3675_v9, 2  ;;  %v3302_v23 = vrot.slane %v3675_v9, 3  ;;  %v3306_v36 = vrot.slane %v3675_v9, 4 }
 0x353   : > { %v3310_v31 = vrot.slane %v3675_v9, 5  ;;  %v3314_v44 = vrot.slane %v3675_v9, 6  ;;  %v3318_v5 = vrot.slane %v3675_v9, 7 }
 0x354   : > { %3295 = vrot.lane.b32.xlu0 %v3294_v3, %s3736_s11 }
 0x356   : > { %v3677_v34 = vpop.eup %3676 }
 0x357   : > { %v3288_v11 = vadd.f32 1.0, %v3677_v34 }
 0x358   : > { %3299 = vrot.lane.b32.xlu0 %v3298_v13, %s3737_s12 }
 0x359   : > { %3678 = vrcp.f32 %v3288_v11 }
 0x35c   : > { %3303 = vrot.lane.b32.xlu0 %v3302_v23, %s3738_s13 }
 0x360   : > { %3307 = vrot.lane.b32.xlu0 %v3306_v36, %s3739_s14 }
 0x364   : > { %3311 = vrot.lane.b32.xlu0 %v3310_v31, %s3740_s15 }
 0x366   : > { %v3679_v54 = vpop.eup %3678 }
 0x367   : > { %v3323_v0 = vrot.slane %v3679_v54, 1  ;;  %v3327_v8 = vrot.slane %v3679_v54, 2  ;;  %v3331_v7 = vrot.slane %v3679_v54, 3  ;;  %v3335_v10 = vrot.slane %v3679_v54, 4 }
 0x368   : > { %3315 = vrot.lane.b32.xlu0 %v3314_v44, %s3741_s16  ;;  %v3339_v4 = vrot.slane %v3679_v54, 5  ;;  %v3343_v27 = vrot.slane %v3679_v54, 6  ;;  %v3347_v12 = vrot.slane %v3679_v54, 7 }
 0x369   : > { %3324 = vrot.lane.b32.xlu1 %v3323_v0, %s3736_s11 }
 0x36c   : > { %3319 = vrot.lane.b32.xlu0 %v3318_v5, %s3742_s19 }
 0x36d   : > { %3328 = vrot.lane.b32.xlu1 %v3327_v8, %s3737_s12 }
 0x371   : > { %3332 = vrot.lane.b32.xlu1 %v3331_v7, %s3738_s13 }
 0x375   : > { %3336 = vrot.lane.b32.xlu1 %v3335_v10, %s3739_s14 }
 0x379   : > { %3340 = vrot.lane.b32.xlu1 %v3339_v4, %s3740_s15 }
 0x37d   : > { %3344 = vrot.lane.b32.xlu1 %v3343_v27, %s3741_s16 }
 0x381   : > { %3348 = vrot.lane.b32.xlu1 %v3347_v12, %s3742_s19 }
 0x3c6   : > { %v3296_v38 = vpop.permute.xlu0 %3295 }
 0x3c7   : > { %v3352_v49 = vsel %vm3351_vm8, %v3675_v9, %v3296_v38 }
 0x3ca   : > { %v3300_v61 = vpop.permute.xlu0 %3299 }
 0x3cb   : > { %v3354_v46 = vsel %vm3353_vm9, %v3352_v49, %v3300_v61 }
 0x3ce   : > { %v3304_v18 = vpop.permute.xlu0 %3303 }
 0x3cf   : > { %v3356_v19 = vsel %vm3355_vm10, %v3354_v46, %v3304_v18 }
 0x3d2   : > { %v3308_v62 = vpop.permute.xlu0 %3307 }
 0x3d3   : > { %v3358_v15 = vsel %vm3357_vm11, %v3356_v19, %v3308_v62 }
 0x3d6   : > { %v3312_v43 = vpop.permute.xlu0 %3311 }
 0x3d7   : > { %v3360_v55 = vsel %vm3359_vm12, %v3358_v15, %v3312_v43 }
 0x3da   : > { %v3316_v30 = vpop.permute.xlu0 %3315 }
 0x3db   : > { %v3325_v41 = vpop.permute.xlu1 %3324  ;;  %v3362_v45 = vsel %vm3361_vm13, %v3360_v55, %v3316_v30 }
 0x3dc   : > { %v3365_v33 = vsel %vm3351_vm8, %v3679_v54, %v3325_v41 }
 0x3de   : > { %v3320_v28 = vpop.permute.xlu0 %3319 }
 0x3df   : > { %v3364_v37 = vsel %vm3363_vm14, %v3362_v45, %v3320_v28  ;;  %v3329_v1 = vpop.permute.xlu1 %3328 }
 0x3e0   : > { %v3377_v25 = vrot.slane %v3364_v37, %v3376_v22  ;;  %v3366_v21 = vsel %vm3353_vm9, %v3365_v33, %v3329_v1 }
 0x3e2   : > { %v3382_v50 = vmul.f32 %v3377_v25, %v3372_v57 }
 0x3e3   : > { %v3333_v24 = vpop.permute.xlu1 %3332 }
 0x3e4   : > { %3384 = vst [vmem:[%s232_s28] sm:$0xff] %v3382_v50  ;;  %v3367_v47 = vsel %vm3355_vm10, %v3366_v21, %v3333_v24 }
 0x3e7   : > { %v3337_v17 = vpop.permute.xlu1 %3336 }
 0x3e8   : > { %v3368_v63 = vsel %vm3357_vm11, %v3367_v47, %v3337_v17 }
 0x3eb   : > { %v3341_v56 = vpop.permute.xlu1 %3340 }
 0x3ec   : > { %v3369_v29 = vsel %vm3359_vm12, %v3368_v63, %v3341_v56 }
 0x3ef   : > { %v3345_v26 = vpop.permute.xlu1 %3344 }
 0x3f0   : > { %v3370_v58 = vsel %vm3361_vm13, %v3369_v29, %v3345_v26 }
 0x3f3   : > { %v3349_v6 = vpop.permute.xlu1 %3348 }
 0x3f4   : > { %v3371_v2 = vsel %vm3363_vm14, %v3370_v58, %v3349_v6 }
 0x3f5   : > { %v3381_v35 = vrot.slane %v3371_v2, %v3376_v22 }
 0x3f7   : > { %v3383_v53 = vmul.f32 %v3381_v35, %v3373_v32 }
 0x3f9   : > { %3385 = vst [vmem:[%s232_s28 + $0x8] sm:$0xff] %v3383_v53 }
 0x3fa PF: > { %s16_s17 = sadd.s32 1, %s3718_s17  }
 0x3fb   : > { %p13_p1 = scmp.ge.s32.totalorder %s16_s17, 4  }
 0x3fd   :  { %15 = sbr.rel (!%p13_p1) target bundleno = 3 (0x3), region = 76 }
 0x402   :  { %3407 = vsyncpa [#allocation5], 1 }
 0x403   :  { %3409 = vsyncpa [#allocation5 + $0x1], 1 }

</bundles_post_ra>
